<compile_context>
chip_gen: v7x
topology: tpu7x:2x2x1
jax: 0.10.0
libtpu: 0.0.40
codegen_flags: <defaults>
</compile_context>

<pallas_src>
import math

import numpy as np
import jax
import jax.numpy as jnp
from jax.experimental import pallas as pl
from jax.experimental.pallas import tpu as pltpu

# ----------------------- configuration (small, consistent) -----------------------
B, H, W, DIM = 2, 4, 8, 8            # batch, height, width, dim (== d_inner)
SSM_RATIO = 1.0
D_MODEL = DIM
D_MODEL_SPE = W                      # d_inner_spe must equal W for the Interval scan
D_INNER = int(SSM_RATIO * D_MODEL)   # 8
D_SPE = int(SSM_RATIO * D_MODEL_SPE) # 8 (channels seen by the SSM == W)
D_STATE = 4                          # N
K_GROUP = 4                          # 4 scan directions (fixed by 'Interval')
DT_RANK = math.ceil(D_MODEL_SPE / 16)  # = 1
D4 = D_INNER // 4
L = D4 * H                           # scan sequence length = (d_inner//4) * H
HW = H * W
KC = K_GROUP * D_SPE                 # scan rows per batch  = 32
S_ROWS = L * KC                      # stacked scan-gather rows    = 256
C_ROWS = D_INNER * HW                # stacked combine-gather rows = 256
LN_EPS = 1e-5

assert D_INNER == DIM and D_SPE == W and D_INNER == L and HW == KC


def _softplus(x):
  return jnp.where(x > 20.0, x, jnp.log1p(jnp.exp(x)))


# ===================== Interval scan / combine bookkeeping (spec) =================
# These pure-JAX functions mirror the PyTorch module exactly; they are used (a) by the
# reference and (b) traced once with *index* arrays to build the in-kernel gather matrices.
def interval_scan(x_nchw):
  # x_nchw: (B, D_INNER, H, W)  ->  xs: (B, 4, D_SPE, L)
  def strided(i):
    return jnp.transpose(x_nchw[:, i::4, :, :], (0, 2, 1, 3))   # (B, H, D4, W)
  x1, x2, x3, x4 = strided(0), strided(1), strided(2), strided(3)
  xs1 = x1.reshape(B, -1, L)
  xs2 = jnp.swapaxes(x2, 2, 3).reshape(B, -1, L)
  xs3 = jnp.flip(x3.reshape(B, -1, L), axis=-1)
  xs4 = jnp.flip(jnp.swapaxes(x4, 2, 3).reshape(B, -1, L), axis=-1)
  return jnp.stack([xs1, xs2, xs3, xs4], axis=1)


def interval_combine_and_restore(out_y):
  # out_y: (B, K, D_SPE, L) -> y: (B, H, W, D_INNER)
  def restore_a(v):
    t = jnp.swapaxes(v, 1, 2).reshape(B, W, -1, H)
    return jnp.transpose(t, (0, 3, 1, 2))

  def restore_b(v):
    t = v.reshape(B, -1, W, H)
    t = jnp.swapaxes(t, 2, 3).reshape(B, -1, L)
    return restore_a(t)

  m1 = restore_a(out_y[:, 0])
  m2 = restore_b(out_y[:, 1])
  inv = jnp.flip(out_y[:, 2:4], axis=-1)
  m3 = restore_a(inv[:, 0])
  m4 = restore_b(inv[:, 1])
  return jnp.stack([m1, m2, m3, m4], axis=-1).reshape(B, H, W, D_INNER)


def _build_permutation_constants():
  """Trace the scan/combine bookkeeping with index arrays -> 0/1 gather matrices."""
  # scan:  xc (HW, D_INNER) [rows = h*W+w, cols = d]  ->  u (KC, L) [rows = k*8+c, cols = l]
  flat = np.arange(HW * D_INNER, dtype=np.int32).reshape(H, W, D_INNER)
  x_nchw_idx = np.broadcast_to(np.transpose(flat, (2, 0, 1))[None], (B, D_INNER, H, W))
  xs_idx = np.asarray(interval_scan(jnp.asarray(x_nchw_idx)))[0]      # (K, D_SPE, L)
  src_hw = xs_idx // D_INNER
  src_d = xs_idx % D_INNER
  sperm = np.zeros((S_ROWS, HW), np.float32)
  smask = np.zeros((S_ROWS, D_INNER), np.float32)
  for l in range(L):
    for k in range(K_GROUP):
      for c in range(D_SPE):
        r = l * KC + k * D_SPE + c
        sperm[r, src_hw[k, c, l]] = 1.0
        smask[r, src_d[k, c, l]] = 1.0
  # combine: y_scan (KC, L) -> y_comb (HW, D_INNER)
  oy_idx = (np.arange(KC, dtype=np.int32)[:, None] * L
            + np.arange(L, dtype=np.int32)[None, :]).reshape(K_GROUP, D_SPE, L)
  oy_idx = np.broadcast_to(oy_idx[None], (B, K_GROUP, D_SPE, L))
  comb_idx = np.asarray(interval_combine_and_restore(jnp.asarray(oy_idx)))[0]  # (H, W, D)
  cperm = np.zeros((C_ROWS, KC), np.float32)
  cmask = np.zeros((C_ROWS, L), np.float32)
  for d in range(D_INNER):
    for h in range(H):
      for w in range(W):
        rr = d * HW + h * W + w
        s = int(comb_idx[h, w, d])
        cperm[rr, s // L] = 1.0
        cmask[rr, s % L] = 1.0
  return sperm, smask, cperm, cmask


_SPERM, _SMASK, _CPERM, _CMASK = _build_permutation_constants()


# =============================== the fused Pallas kernel ==========================
def fused_block_kernel(x_ref, w_in_ref, fc1w_ref, miscw_ref, rowp_ref,
                       mats_ref, masks_ref, out_ref):
  # One grid step == one batch.  Everything stays VMEM-resident.
  x = x_ref[...]                                   # (HW, DIM)
  miscw = miscw_ref[...]                           # (24, 8)  packed small weights
  rowp = rowp_ref[...]                             # (KC, 8)  [A_neg(4) | D | dt_bias | 0 0]

  # ---- 1) in_proj + depthwise 1x1 conv + SiLU (both branches) ----
  y = jnp.dot(x, w_in_ref[...], preferred_element_type=jnp.float32)   # (HW, 2*D_INNER)
  xp = y[:, :D_INNER]
  zp = y[:, D_INNER:]
  z = zp * jax.nn.sigmoid(zp)                                         # z = SiLU(z)
  xc = xp * miscw[12:13, :] + miscw[13:14, :]                         # depthwise 1x1 conv
  xc = xc * jax.nn.sigmoid(xc)                                        # SiLU

  # ---- 2) channel gate: sigmoid(fc2(relu(fc1(mean_hw(xc))))) ----
  zz = jnp.sum(xc, axis=0, keepdims=True) * (1.0 / HW)                # (1, D_INNER)
  h1 = jnp.maximum(
      jnp.dot(zz, fc1w_ref[...], preferred_element_type=jnp.float32) + miscw[17:18, 0:4],
      0.0)
  gate = jax.nn.sigmoid(
      jnp.dot(h1, miscw[8:12, :], preferred_element_type=jnp.float32) + miscw[16:17, :])

  # 8x8 one-hot rows (L == D_INNER == 8) for column assembly
  oh = (jax.lax.broadcasted_iota(jnp.int32, (L, L), 0)
        == jax.lax.broadcasted_iota(jnp.int32, (L, L), 1)).astype(jnp.float32)

  # ---- 3) Interval scan bookkeeping as an exact in-kernel gather ----
  # rows of the stacked gather = (l, k, c); one 1 per row -> matmul is an exact gather.
  g1 = (jnp.dot(mats_ref[0:S_ROWS, :], xc, preferred_element_type=jnp.float32)
        * masks_ref[0:S_ROWS, :])
  p1 = jnp.sum(g1, axis=-1, keepdims=True)                            # (S_ROWS, 1)
  u = jnp.zeros((KC, L), jnp.float32)                                 # rows=(k,c), cols=l
  for l in range(L):
    u = u + p1[l * KC:(l + 1) * KC, :] * oh[l:l + 1, :]

  # ---- 4) x_proj / dt_proj projections for all (k, c) at once (block-diag matmul) ----
  proj = jnp.dot(mats_ref[S_ROWS + C_ROWS:S_ROWS + C_ROWS + 9 * KC, :], u,
                 preferred_element_type=jnp.float32)                  # (9*KC, L)
  delta = _softplus(proj[0:KC, :] + rowp[:, 5:6])                     # (KC, L)
  du = delta * u
  dA, dBu, Cs, st = [], [], [], []
  for n in range(D_STATE):
    dA.append(jnp.exp(delta * rowp[:, n:n + 1]))                      # exp hoisted (A_neg)
    dBu.append(du * proj[KC * (1 + n):KC * (2 + n), :])
    Cs.append(proj[KC * (1 + D_STATE + n):KC * (2 + D_STATE + n), :])
    st.append(jnp.zeros((KC, 1), jnp.float32))

  # ---- 5) selective-scan recurrence (unrolled; carry chain = 2 VPU ops per step) ----
  y_scan = u * rowp[:, 4:5]                                           # D * u skip term
  for t in range(L):
    for n in range(D_STATE):
      st[n] = dA[n][:, t:t + 1] * st[n] + dBu[n][:, t:t + 1]
    ycol = st[0] * Cs[0][:, t:t + 1]
    for n in range(1, D_STATE):
      ycol = ycol + st[n] * Cs[n][:, t:t + 1]
    y_scan = y_scan + ycol * oh[t:t + 1, :]                           # off the carry chain

  # ---- 6) un-scan + Interval_Combine back to (hw, d) (exact gather again) ----
  g2 = (jnp.dot(mats_ref[S_ROWS:S_ROWS + C_ROWS, :], y_scan,
                preferred_element_type=jnp.float32)
        * masks_ref[S_ROWS:S_ROWS + C_ROWS, :])
  p2 = jnp.sum(g2, axis=-1, keepdims=True)                            # (C_ROWS, 1)
  yc = jnp.zeros((HW, D_INNER), jnp.float32)
  for d in range(D_INNER):
    yc = yc + p2[d * HW:(d + 1) * HW, :] * oh[d:d + 1, :]

  # ---- 7) channel gate * LayerNorm * z-gate * out_proj ----
  yg = yc * gate
  mu = jnp.mean(yg, axis=-1, keepdims=True)
  var = jnp.mean(jnp.square(yg - mu), axis=-1, keepdims=True)
  yn = (yg - mu) * jax.lax.rsqrt(var + LN_EPS) * miscw[14:15, :] + miscw[15:16, :]
  out_ref[...] = jnp.dot(yn * z, miscw[0:8, :], preferred_element_type=jnp.float32)


# =============================== wrapper ==========================================
def _block_diag_k(blocks):
  kb, n, m = blocks.shape
  out = jnp.zeros((kb * n, kb * m), blocks.dtype)
  for k in range(kb):
    out = out.at[k * n:(k + 1) * n, k * m:(k + 1) * m].set(blocks[k])
  return out


def forward_pallas(x, p):
  x2d = x.reshape(B * H * W, DIM)

  # ---- pack small weights (tiny host/XLA-side ops on parameters only) ----
  w_inT = p["w_in"].T                                               # (8, 16)
  fc1_wT = p["fc1_w"].T                                             # (8, 4)
  miscw = jnp.zeros((24, D_INNER), jnp.float32)
  miscw = miscw.at[0:8, :].set(p["out_w"].T)
  miscw = miscw.at[8:12, :].set(p["fc2_w"].T)
  miscw = miscw.at[12, :].set(p["conv_w"])
  miscw = miscw.at[13, :].set(p["conv_b"])
  miscw = miscw.at[14, :].set(p["ln_w"])
  miscw = miscw.at[15, :].set(p["ln_b"])
  miscw = miscw.at[16, :].set(p["fc2_b"])
  miscw = miscw.at[17, 0:4].set(p["fc1_b"])

  rowp = jnp.zeros((KC, 8), jnp.float32)
  rowp = rowp.at[:, 0:4].set(-jnp.exp(p["A_logs"]))                 # A = -exp(A_log)
  rowp = rowp.at[:, 4].set(p["Ds"])
  rowp = rowp.at[:, 5].set(p["dt_projs_b"].reshape(-1))

  # block-diagonal x_proj / dt_proj matrices for all (k, c) rows, stacked
  wdt = p["x_proj_w"][:, 0, :]                                      # (K, D_SPE)
  wB = p["x_proj_w"][:, DT_RANK:DT_RANK + D_STATE, :]               # (K, N, D_SPE)
  wC = p["x_proj_w"][:, DT_RANK + D_STATE:, :]                      # (K, N, D_SPE)
  dtw = p["dt_projs_w"][:, :, 0]                                    # (K, D_SPE)
  mdt = _block_diag_k(dtw[:, :, None] * wdt[:, None, :])            # (KC, KC)
  mbs = [_block_diag_k(jnp.broadcast_to(wB[:, n, :][:, None, :],
                                        (K_GROUP, D_SPE, D_SPE))) for n in range(D_STATE)]
  mcs = [_block_diag_k(jnp.broadcast_to(wC[:, n, :][:, None, :],
                                        (K_GROUP, D_SPE, D_SPE))) for n in range(D_STATE)]
  mproj = jnp.concatenate([mdt] + mbs + mcs, axis=0)                # (9*KC, KC)

  mats = jnp.concatenate(
      [jnp.asarray(_SPERM), jnp.asarray(_CPERM), mproj], axis=0)    # (800, KC)
  masks = jnp.concatenate([jnp.asarray(_SMASK), jnp.asarray(_CMASK)], axis=0)  # (512, 8)

  out2d = pl.pallas_call(
      fused_block_kernel,
      grid=(B,),
      in_specs=[
          pl.BlockSpec((HW, DIM), lambda b: (b, 0)),                         # x (per batch)
          pl.BlockSpec((DIM, 2 * D_INNER), lambda b: (0, 0)),                # in_proj W^T
          pl.BlockSpec((DIM, 4), lambda b: (0, 0)),                          # fc1 W^T
          pl.BlockSpec((24, D_INNER), lambda b: (0, 0)),                     # packed small w
          pl.BlockSpec((KC, 8), lambda b: (0, 0)),                           # A/D/dt_bias
          pl.BlockSpec((S_ROWS + C_ROWS + 9 * KC, KC), lambda b: (0, 0)),    # gathers+proj
          pl.BlockSpec((S_ROWS + C_ROWS, D_INNER), lambda b: (0, 0)),        # gather masks
      ],
      out_specs=pl.BlockSpec((HW, DIM), lambda b: (b, 0)),
      out_shape=jax.ShapeDtypeStruct((B * HW, DIM), jnp.float32),
      compiler_params=pltpu.CompilerParams(dimension_semantics=("parallel",)),
  )(x2d, w_inT, fc1_wT, miscw, rowp, mats, masks)

  return out2d.reshape(B, H, W, DIM)          # dropout = Identity (p = 0.0)


# =============================== pure-JAX reference ===============================
def reference_forward(x, p):
  x2d = x.reshape(B * H * W, DIM)
  y = x2d @ p["w_in"].T
  xp, zp = y[:, :D_INNER], y[:, D_INNER:]
  z = zp * jax.nn.sigmoid(zp)
  xc = xp * p["conv_w"][None, :] + p["conv_b"][None, :]
  xc = xc * jax.nn.sigmoid(xc)
  xc4 = xc.reshape(B, H, W, D_INNER)
  zz = jnp.mean(xc4, axis=(1, 2))
  gate = jax.nn.sigmoid(jnp.maximum(zz @ p["fc1_w"].T + p["fc1_b"], 0.0) @ p["fc2_w"].T + p["fc2_b"])
  xs = interval_scan(jnp.transpose(xc4, (0, 3, 1, 2)))
  x_dbl = jnp.einsum("bkdl,kcd->bkcl", xs, p["x_proj_w"])
  dts = x_dbl[:, :, :DT_RANK]
  Bs = x_dbl[:, :, DT_RANK:DT_RANK + D_STATE]
  Cs = x_dbl[:, :, DT_RANK + D_STATE:]
  dts = jnp.einsum("bkrl,kdr->bkdl", dts, p["dt_projs_w"])
  delta = _softplus(dts + p["dt_projs_b"][None, :, :, None])
  A = -jnp.exp(p["A_logs"].reshape(K_GROUP, D_SPE, D_STATE))
  state = jnp.zeros((B, K_GROUP, D_SPE, D_STATE), jnp.float32)
  ys = []
  for t in range(L):
    dA = jnp.exp(delta[..., t, None] * A[None])
    dBu = delta[..., t, None] * xs[..., t, None] * Bs[..., t][:, :, None, :]
    state = dA * state + dBu
    ys.append(jnp.sum(state * Cs[..., t][:, :, None, :], axis=-1))
  out_y = jnp.stack(ys, axis=-1) + xs * p["Ds"].reshape(1, K_GROUP, D_SPE, 1)
  yc = interval_combine_and_restore(out_y)
  yg = yc * gate[:, None, None, :]
  mu = jnp.mean(yg, axis=-1, keepdims=True)
  var = jnp.mean(jnp.square(yg - mu), axis=-1, keepdims=True)
  yn = (yg - mu) * jax.lax.rsqrt(var + LN_EPS) * p["ln_w"] + p["ln_b"]
  y2 = yn * z.reshape(B, H, W, D_INNER)
  return jnp.einsum("bhwd,od->bhwo", y2, p["out_w"])


# =============================== parameters (deterministic) =======================
def make_params(key):
  ks = jax.random.split(key, 12)
  nrm = lambda k, s, sc: sc * jax.random.normal(k, s, jnp.float32)
  dt_std = DT_RANK ** -0.5
  dt = jnp.exp(jax.random.uniform(ks[9], (K_GROUP, D_SPE))
               * (math.log(0.1) - math.log(0.001)) + math.log(0.001))
  dt = jnp.maximum(dt, 1e-4)
  return dict(
      w_in=nrm(ks[0], (2 * D_INNER, DIM), DIM ** -0.5),
      conv_w=1.0 + nrm(ks[1], (D_INNER,), 0.1),
      conv_b=nrm(ks[2], (D_INNER,), 0.1),
      fc1_w=nrm(ks[3], (4, DIM), DIM ** -0.5),
      fc1_b=nrm(ks[4], (4,), 0.1),
      fc2_w=nrm(ks[5], (DIM, 4), 0.5),
      fc2_b=nrm(ks[6], (DIM,), 0.1),
      x_proj_w=nrm(ks[7], (K_GROUP, DT_RANK + 2 * D_STATE, D_SPE), D_SPE ** -0.5),
      dt_projs_w=jax.random.uniform(ks[8], (K_GROUP, D_SPE, DT_RANK),
                                    minval=-dt_std, maxval=dt_std),
      dt_projs_b=dt + jnp.log(-jnp.expm1(-dt)),
      A_logs=jnp.log(jnp.tile(jnp.arange(1, D_STATE + 1, dtype=jnp.float32)[None, :],
                              (K_GROUP * D_SPE, 1))),
      Ds=jnp.ones((K_GROUP * D_SPE,), jnp.float32),
      ln_w=jnp.ones((D_INNER,), jnp.float32),
      ln_b=jnp.zeros((D_INNER,), jnp.float32),
      out_w=nrm(ks[10], (DIM, D_INNER), D_INNER ** -0.5),
  )


if __name__ == "__main__":
  key = jax.random.PRNGKey(0)
  kx, kp = jax.random.split(key)
  params = make_params(kp)
  x = jax.random.normal(kx, (B, H, W, DIM), jnp.float32)

  out = jax.jit(forward_pallas)(x, params)
  out = jax.block_until_ready(out)
  assert out.shape == (B, H, W, DIM)

  ref = reference_forward(x, params)
  err = float(jnp.max(jnp.abs(out - ref)))
  assert err < 1e-2, f"mismatch vs reference: {err}"
  print("KERNEL_OK")
</pallas_src>

<mosaic_0001>
module attributes {stable_mosaic.version = 11 : i64} {
  func.func @fused_block_kernel(%arg0: i32, %arg1: memref<32x8xf32, #tpu.memory_space<vmem>>, %arg2: memref<8x16xf32, #tpu.memory_space<vmem>>, %arg3: memref<8x4xf32, #tpu.memory_space<vmem>>, %arg4: memref<24x8xf32, #tpu.memory_space<vmem>>, %arg5: memref<32x8xf32, #tpu.memory_space<vmem>>, %arg6: memref<800x32xf32, #tpu.memory_space<vmem>>, %arg7: memref<512x8xf32, #tpu.memory_space<vmem>>, %arg8: memref<32x8xf32, #tpu.memory_space<vmem>>) attributes {dimension_semantics = [#tpu.dimension_semantics<parallel>], iteration_bounds = array<i64: 2>, scalar_prefetch = 0 : i64, scratch_operands = 0 : i64, tpu.core_type = #tpu.core_type<tc>, window_params = [{transform_indices = @transform_0, window_bounds = array<i64: 32, 8>}, {pipeline_mode = #tpu.pipeline_mode<synchronous>, transform_indices = @transform_1, window_bounds = array<i64: 8, 16>}, {pipeline_mode = #tpu.pipeline_mode<synchronous>, transform_indices = @transform_2, window_bounds = array<i64: 8, 4>}, {pipeline_mode = #tpu.pipeline_mode<synchronous>, transform_indices = @transform_3, window_bounds = array<i64: 24, 8>}, {pipeline_mode = #tpu.pipeline_mode<synchronous>, transform_indices = @transform_4, window_bounds = array<i64: 32, 8>}, {pipeline_mode = #tpu.pipeline_mode<synchronous>, transform_indices = @transform_5, window_bounds = array<i64: 800, 32>}, {pipeline_mode = #tpu.pipeline_mode<synchronous>, transform_indices = @transform_6, window_bounds = array<i64: 512, 8>}, {transform_indices = @transform_7, window_bounds = array<i64: 32, 8>}]} {
    %c0 = arith.constant 0 : index
    %c0_0 = arith.constant 0 : index
    %0 = vector.load %arg1[%c0, %c0_0] : memref<32x8xf32, #tpu.memory_space<vmem>>, vector<32x8xf32>
    %c0_1 = arith.constant 0 : index
    %c0_2 = arith.constant 0 : index
    %1 = vector.load %arg4[%c0_1, %c0_2] : memref<24x8xf32, #tpu.memory_space<vmem>>, vector<24x8xf32>
    %c0_3 = arith.constant 0 : index
    %c0_4 = arith.constant 0 : index
    %2 = vector.load %arg5[%c0_3, %c0_4] : memref<32x8xf32, #tpu.memory_space<vmem>>, vector<32x8xf32>
    %c0_5 = arith.constant 0 : index
    %c0_6 = arith.constant 0 : index
    %3 = vector.load %arg2[%c0_5, %c0_6] : memref<8x16xf32, #tpu.memory_space<vmem>>, vector<8x16xf32>
    %cst = arith.constant dense<0.000000e+00> : vector<32x16xf32>
    %4 = tpu.matmul %0, %3, %cst {dimension_numbers = #tpu.dot_dimension_numbers<[1], [0], [0], [1], [0, 0, 1, 1], [], []>} : vector<32x8xf32>, vector<8x16xf32>, vector<32x16xf32> -> vector<32x16xf32>
    %5 = vector.extract_strided_slice %4 {offsets = [0, 0], sizes = [32, 8], strides = [1, 1]} : vector<32x16xf32> to vector<32x8xf32>
    %6 = vector.extract_strided_slice %4 {offsets = [0, 8], sizes = [32, 8], strides = [1, 1]} : vector<32x16xf32> to vector<32x8xf32>
    %7 = arith.negf %6 : vector<32x8xf32>
    %8 = math.exp %7 : vector<32x8xf32>
    %cst_7 = arith.constant 1.000000e+00 : f32
    %9 = vector.broadcast %cst_7 : f32 to vector<32x8xf32>
    %10 = arith.addf %9, %8 : vector<32x8xf32>
    %11 = arith.divf %9, %10 : vector<32x8xf32>
    %12 = arith.mulf %6, %11 : vector<32x8xf32>
    %13 = vector.extract_strided_slice %1 {offsets = [12, 0], sizes = [1, 8], strides = [1, 1]} : vector<24x8xf32> to vector<1x8xf32>
    %14 = vector.broadcast %13 : vector<1x8xf32> to vector<32x8xf32>
    %15 = arith.mulf %5, %14 : vector<32x8xf32>
    %16 = vector.extract_strided_slice %1 {offsets = [13, 0], sizes = [1, 8], strides = [1, 1]} : vector<24x8xf32> to vector<1x8xf32>
    %17 = vector.broadcast %16 : vector<1x8xf32> to vector<32x8xf32>
    %18 = arith.addf %15, %17 : vector<32x8xf32>
    %19 = arith.negf %18 : vector<32x8xf32>
    %20 = math.exp %19 : vector<32x8xf32>
    %cst_8 = arith.constant 1.000000e+00 : f32
    %21 = vector.broadcast %cst_8 : f32 to vector<32x8xf32>
    %22 = arith.addf %21, %20 : vector<32x8xf32>
    %23 = arith.divf %21, %22 : vector<32x8xf32>
    %24 = arith.mulf %18, %23 : vector<32x8xf32>
    %cst_9 = arith.constant dense<0.000000e+00> : vector<8xf32>
    %25 = vector.multi_reduction <add>, %24, %cst_9 [0] : vector<32x8xf32> to vector<8xf32>
    %26 = vector.shape_cast %25 : vector<8xf32> to vector<1x8xf32>
    %cst_10 = arith.constant 3.125000e-02 : f32
    %27 = vector.broadcast %cst_10 : f32 to vector<1x8xf32>
    %28 = arith.mulf %26, %27 : vector<1x8xf32>
    %c0_11 = arith.constant 0 : index
    %c0_12 = arith.constant 0 : index
    %29 = vector.load %arg3[%c0_11, %c0_12] : memref<8x4xf32, #tpu.memory_space<vmem>>, vector<8x4xf32>
    %cst_13 = arith.constant dense<0.000000e+00> : vector<1x4xf32>
    %30 = tpu.matmul %28, %29, %cst_13 {dimension_numbers = #tpu.dot_dimension_numbers<[1], [0], [0], [1], [0, 0, 1, 1], [], []>} : vector<1x8xf32>, vector<8x4xf32>, vector<1x4xf32> -> vector<1x4xf32>
    %31 = vector.extract_strided_slice %1 {offsets = [17, 0], sizes = [1, 4], strides = [1, 1]} : vector<24x8xf32> to vector<1x4xf32>
    %32 = arith.addf %30, %31 : vector<1x4xf32>
    %cst_14 = arith.constant 0.000000e+00 : f32
    %33 = vector.broadcast %cst_14 : f32 to vector<1x4xf32>
    %34 = arith.maximumf %32, %33 : vector<1x4xf32>
    %35 = vector.extract_strided_slice %1 {offsets = [8, 0], sizes = [4, 8], strides = [1, 1]} : vector<24x8xf32> to vector<4x8xf32>
    %cst_15 = arith.constant dense<0.000000e+00> : vector<1x8xf32>
    %36 = tpu.matmul %34, %35, %cst_15 {dimension_numbers = #tpu.dot_dimension_numbers<[1], [0], [0], [1], [0, 0, 1, 1], [], []>} : vector<1x4xf32>, vector<4x8xf32>, vector<1x8xf32> -> vector<1x8xf32>
    %37 = vector.extract_strided_slice %1 {offsets = [16, 0], sizes = [1, 8], strides = [1, 1]} : vector<24x8xf32> to vector<1x8xf32>
    %38 = arith.addf %36, %37 : vector<1x8xf32>
    %39 = arith.negf %38 : vector<1x8xf32>
    %40 = math.exp %39 : vector<1x8xf32>
    %cst_16 = arith.constant 1.000000e+00 : f32
    %41 = vector.broadcast %cst_16 : f32 to vector<1x8xf32>
    %42 = arith.addf %41, %40 : vector<1x8xf32>
    %43 = arith.divf %41, %42 : vector<1x8xf32>
    %44 = tpu.iota {dimensions = array<i32: 0>} : vector<8x8xi32>
    %45 = tpu.iota {dimensions = array<i32: 1>} : vector<8x8xi32>
    %46 = arith.cmpi eq, %44, %45 : vector<8x8xi32>
    %47 = arith.extui %46 : vector<8x8xi1> to vector<8x8xi32>
    %48 = arith.sitofp %47 : vector<8x8xi32> to vector<8x8xf32>
    %c0_17 = arith.constant 0 : index
    %c0_18 = arith.constant 0 : index
    %49 = vector.load %arg6[%c0_17, %c0_18] : memref<800x32xf32, #tpu.memory_space<vmem>>, vector<256x32xf32>
    %cst_19 = arith.constant dense<0.000000e+00> : vector<256x8xf32>
    %50 = tpu.matmul %49, %24, %cst_19 {dimension_numbers = #tpu.dot_dimension_numbers<[1], [0], [0], [1], [0, 0, 1, 1], [], []>} : vector<256x32xf32>, vector<32x8xf32>, vector<256x8xf32> -> vector<256x8xf32>
    %c0_20 = arith.constant 0 : index
    %c0_21 = arith.constant 0 : index
    %51 = vector.load %arg7[%c0_20, %c0_21] : memref<512x8xf32, #tpu.memory_space<vmem>>, vector<256x8xf32>
    %52 = arith.mulf %50, %51 : vector<256x8xf32>
    %cst_22 = arith.constant dense<0.000000e+00> : vector<256xf32>
    %53 = vector.multi_reduction <add>, %52, %cst_22 [1] : vector<256x8xf32> to vector<256xf32>
    %54 = vector.shape_cast %53 : vector<256xf32> to vector<256x1xf32>
    %cst_23 = arith.constant 0.000000e+00 : f32
    %55 = vector.broadcast %cst_23 : f32 to vector<32x8xf32>
    %56 = vector.extract_strided_slice %54 {offsets = [0, 0], sizes = [32, 1], strides = [1, 1]} : vector<256x1xf32> to vector<32x1xf32>
    %57 = vector.extract_strided_slice %48 {offsets = [0, 0], sizes = [1, 8], strides = [1, 1]} : vector<8x8xf32> to vector<1x8xf32>
    %58 = vector.broadcast %56 : vector<32x1xf32> to vector<32x8xf32>
    %59 = vector.broadcast %57 : vector<1x8xf32> to vector<32x8xf32>
    %60 = arith.mulf %58, %59 : vector<32x8xf32>
    %61 = arith.addf %55, %60 : vector<32x8xf32>
    %62 = vector.extract_strided_slice %54 {offsets = [32, 0], sizes = [32, 1], strides = [1, 1]} : vector<256x1xf32> to vector<32x1xf32>
    %63 = vector.extract_strided_slice %48 {offsets = [1, 0], sizes = [1, 8], strides = [1, 1]} : vector<8x8xf32> to vector<1x8xf32>
    %64 = vector.broadcast %62 : vector<32x1xf32> to vector<32x8xf32>
    %65 = vector.broadcast %63 : vector<1x8xf32> to vector<32x8xf32>
    %66 = arith.mulf %64, %65 : vector<32x8xf32>
    %67 = arith.addf %61, %66 : vector<32x8xf32>
    %68 = vector.extract_strided_slice %54 {offsets = [64, 0], sizes = [32, 1], strides = [1, 1]} : vector<256x1xf32> to vector<32x1xf32>
    %69 = vector.extract_strided_slice %48 {offsets = [2, 0], sizes = [1, 8], strides = [1, 1]} : vector<8x8xf32> to vector<1x8xf32>
    %70 = vector.broadcast %68 : vector<32x1xf32> to vector<32x8xf32>
    %71 = vector.broadcast %69 : vector<1x8xf32> to vector<32x8xf32>
    %72 = arith.mulf %70, %71 : vector<32x8xf32>
    %73 = arith.addf %67, %72 : vector<32x8xf32>
    %74 = vector.extract_strided_slice %54 {offsets = [96, 0], sizes = [32, 1], strides = [1, 1]} : vector<256x1xf32> to vector<32x1xf32>
    %75 = vector.extract_strided_slice %48 {offsets = [3, 0], sizes = [1, 8], strides = [1, 1]} : vector<8x8xf32> to vector<1x8xf32>
    %76 = vector.broadcast %74 : vector<32x1xf32> to vector<32x8xf32>
    %77 = vector.broadcast %75 : vector<1x8xf32> to vector<32x8xf32>
    %78 = arith.mulf %76, %77 : vector<32x8xf32>
    %79 = arith.addf %73, %78 : vector<32x8xf32>
    %80 = vector.extract_strided_slice %54 {offsets = [128, 0], sizes = [32, 1], strides = [1, 1]} : vector<256x1xf32> to vector<32x1xf32>
    %81 = vector.extract_strided_slice %48 {offsets = [4, 0], sizes = [1, 8], strides = [1, 1]} : vector<8x8xf32> to vector<1x8xf32>
    %82 = vector.broadcast %80 : vector<32x1xf32> to vector<32x8xf32>
    %83 = vector.broadcast %81 : vector<1x8xf32> to vector<32x8xf32>
    %84 = arith.mulf %82, %83 : vector<32x8xf32>
    %85 = arith.addf %79, %84 : vector<32x8xf32>
    %86 = vector.extract_strided_slice %54 {offsets = [160, 0], sizes = [32, 1], strides = [1, 1]} : vector<256x1xf32> to vector<32x1xf32>
    %87 = vector.extract_strided_slice %48 {offsets = [5, 0], sizes = [1, 8], strides = [1, 1]} : vector<8x8xf32> to vector<1x8xf32>
    %88 = vector.broadcast %86 : vector<32x1xf32> to vector<32x8xf32>
    %89 = vector.broadcast %87 : vector<1x8xf32> to vector<32x8xf32>
    %90 = arith.mulf %88, %89 : vector<32x8xf32>
    %91 = arith.addf %85, %90 : vector<32x8xf32>
    %92 = vector.extract_strided_slice %54 {offsets = [192, 0], sizes = [32, 1], strides = [1, 1]} : vector<256x1xf32> to vector<32x1xf32>
    %93 = vector.extract_strided_slice %48 {offsets = [6, 0], sizes = [1, 8], strides = [1, 1]} : vector<8x8xf32> to vector<1x8xf32>
    %94 = vector.broadcast %92 : vector<32x1xf32> to vector<32x8xf32>
    %95 = vector.broadcast %93 : vector<1x8xf32> to vector<32x8xf32>
    %96 = arith.mulf %94, %95 : vector<32x8xf32>
    %97 = arith.addf %91, %96 : vector<32x8xf32>
    %98 = vector.extract_strided_slice %54 {offsets = [224, 0], sizes = [32, 1], strides = [1, 1]} : vector<256x1xf32> to vector<32x1xf32>
    %99 = vector.extract_strided_slice %48 {offsets = [7, 0], sizes = [1, 8], strides = [1, 1]} : vector<8x8xf32> to vector<1x8xf32>
    %100 = vector.broadcast %98 : vector<32x1xf32> to vector<32x8xf32>
    %101 = vector.broadcast %99 : vector<1x8xf32> to vector<32x8xf32>
    %102 = arith.mulf %100, %101 : vector<32x8xf32>
    %103 = arith.addf %97, %102 : vector<32x8xf32>
    %c512 = arith.constant 512 : index
    %c0_24 = arith.constant 0 : index
    %104 = vector.load %arg6[%c512, %c0_24] : memref<800x32xf32, #tpu.memory_space<vmem>>, vector<288x32xf32>
    %cst_25 = arith.constant dense<0.000000e+00> : vector<288x8xf32>
    %105 = tpu.matmul %104, %103, %cst_25 {dimension_numbers = #tpu.dot_dimension_numbers<[1], [0], [0], [1], [0, 0, 1, 1], [], []>} : vector<288x32xf32>, vector<32x8xf32>, vector<288x8xf32> -> vector<288x8xf32>
    %106 = vector.extract_strided_slice %105 {offsets = [0, 0], sizes = [32, 8], strides = [1, 1]} : vector<288x8xf32> to vector<32x8xf32>
    %107 = vector.extract_strided_slice %2 {offsets = [0, 5], sizes = [32, 1], strides = [1, 1]} : vector<32x8xf32> to vector<32x1xf32>
    %108 = vector.broadcast %107 : vector<32x1xf32> to vector<32x8xf32>
    %109 = arith.addf %106, %108 : vector<32x8xf32>
    %cst_26 = arith.constant 2.000000e+01 : f32
    %110 = vector.broadcast %cst_26 : f32 to vector<32x8xf32>
    %111 = arith.cmpf ogt, %109, %110 : vector<32x8xf32>
    %112 = math.exp %109 : vector<32x8xf32>
    %113 = math.log1p %112 : vector<32x8xf32>
    %114 = arith.select %111, %109, %113 : vector<32x8xi1>, vector<32x8xf32>
    %115 = arith.mulf %114, %103 : vector<32x8xf32>
    %116 = vector.extract_strided_slice %2 {offsets = [0, 0], sizes = [32, 1], strides = [1, 1]} : vector<32x8xf32> to vector<32x1xf32>
    %117 = vector.broadcast %116 : vector<32x1xf32> to vector<32x8xf32>
    %118 = arith.mulf %114, %117 : vector<32x8xf32>
    %119 = math.exp %118 : vector<32x8xf32>
    %120 = vector.extract_strided_slice %105 {offsets = [32, 0], sizes = [32, 8], strides = [1, 1]} : vector<288x8xf32> to vector<32x8xf32>
    %121 = arith.mulf %115, %120 : vector<32x8xf32>
    %122 = vector.extract_strided_slice %105 {offsets = [160, 0], sizes = [32, 8], strides = [1, 1]} : vector<288x8xf32> to vector<32x8xf32>
    %cst_27 = arith.constant 0.000000e+00 : f32
    %123 = vector.broadcast %cst_27 : f32 to vector<32x1xf32>
    %124 = vector.extract_strided_slice %2 {offsets = [0, 1], sizes = [32, 1], strides = [1, 1]} : vector<32x8xf32> to vector<32x1xf32>
    %125 = vector.broadcast %124 : vector<32x1xf32> to vector<32x8xf32>
    %126 = arith.mulf %114, %125 : vector<32x8xf32>
    %127 = math.exp %126 : vector<32x8xf32>
    %128 = vector.extract_strided_slice %105 {offsets = [64, 0], sizes = [32, 8], strides = [1, 1]} : vector<288x8xf32> to vector<32x8xf32>
    %129 = arith.mulf %115, %128 : vector<32x8xf32>
    %130 = vector.extract_strided_slice %105 {offsets = [192, 0], sizes = [32, 8], strides = [1, 1]} : vector<288x8xf32> to vector<32x8xf32>
    %cst_28 = arith.constant 0.000000e+00 : f32
    %131 = vector.broadcast %cst_28 : f32 to vector<32x1xf32>
    %132 = vector.extract_strided_slice %2 {offsets = [0, 2], sizes = [32, 1], strides = [1, 1]} : vector<32x8xf32> to vector<32x1xf32>
    %133 = vector.broadcast %132 : vector<32x1xf32> to vector<32x8xf32>
    %134 = arith.mulf %114, %133 : vector<32x8xf32>
    %135 = math.exp %134 : vector<32x8xf32>
    %136 = vector.extract_strided_slice %105 {offsets = [96, 0], sizes = [32, 8], strides = [1, 1]} : vector<288x8xf32> to vector<32x8xf32>
    %137 = arith.mulf %115, %136 : vector<32x8xf32>
    %138 = vector.extract_strided_slice %105 {offsets = [224, 0], sizes = [32, 8], strides = [1, 1]} : vector<288x8xf32> to vector<32x8xf32>
    %cst_29 = arith.constant 0.000000e+00 : f32
    %139 = vector.broadcast %cst_29 : f32 to vector<32x1xf32>
    %140 = vector.extract_strided_slice %2 {offsets = [0, 3], sizes = [32, 1], strides = [1, 1]} : vector<32x8xf32> to vector<32x1xf32>
    %141 = vector.broadcast %140 : vector<32x1xf32> to vector<32x8xf32>
    %142 = arith.mulf %114, %141 : vector<32x8xf32>
    %143 = math.exp %142 : vector<32x8xf32>
    %144 = vector.extract_strided_slice %105 {offsets = [128, 0], sizes = [32, 8], strides = [1, 1]} : vector<288x8xf32> to vector<32x8xf32>
    %145 = arith.mulf %115, %144 : vector<32x8xf32>
    %146 = vector.extract_strided_slice %105 {offsets = [256, 0], sizes = [32, 8], strides = [1, 1]} : vector<288x8xf32> to vector<32x8xf32>
    %cst_30 = arith.constant 0.000000e+00 : f32
    %147 = vector.broadcast %cst_30 : f32 to vector<32x1xf32>
    %148 = vector.extract_strided_slice %2 {offsets = [0, 4], sizes = [32, 1], strides = [1, 1]} : vector<32x8xf32> to vector<32x1xf32>
    %149 = vector.broadcast %148 : vector<32x1xf32> to vector<32x8xf32>
    %150 = arith.mulf %103, %149 : vector<32x8xf32>
    %151 = vector.extract_strided_slice %119 {offsets = [0, 0], sizes = [32, 1], strides = [1, 1]} : vector<32x8xf32> to vector<32x1xf32>
    %152 = arith.mulf %151, %123 : vector<32x1xf32>
    %153 = vector.extract_strided_slice %121 {offsets = [0, 0], sizes = [32, 1], strides = [1, 1]} : vector<32x8xf32> to vector<32x1xf32>
    %154 = arith.addf %152, %153 : vector<32x1xf32>
    %155 = vector.extract_strided_slice %127 {offsets = [0, 0], sizes = [32, 1], strides = [1, 1]} : vector<32x8xf32> to vector<32x1xf32>
    %156 = arith.mulf %155, %131 : vector<32x1xf32>
    %157 = vector.extract_strided_slice %129 {offsets = [0, 0], sizes = [32, 1], strides = [1, 1]} : vector<32x8xf32> to vector<32x1xf32>
    %158 = arith.addf %156, %157 : vector<32x1xf32>
    %159 = vector.extract_strided_slice %135 {offsets = [0, 0], sizes = [32, 1], strides = [1, 1]} : vector<32x8xf32> to vector<32x1xf32>
    %160 = arith.mulf %159, %139 : vector<32x1xf32>
    %161 = vector.extract_strided_slice %137 {offsets = [0, 0], sizes = [32, 1], strides = [1, 1]} : vector<32x8xf32> to vector<32x1xf32>
    %162 = arith.addf %160, %161 : vector<32x1xf32>
    %163 = vector.extract_strided_slice %143 {offsets = [0, 0], sizes = [32, 1], strides = [1, 1]} : vector<32x8xf32> to vector<32x1xf32>
    %164 = arith.mulf %163, %147 : vector<32x1xf32>
    %165 = vector.extract_strided_slice %145 {offsets = [0, 0], sizes = [32, 1], strides = [1, 1]} : vector<32x8xf32> to vector<32x1xf32>
    %166 = arith.addf %164, %165 : vector<32x1xf32>
    %167 = vector.extract_strided_slice %122 {offsets = [0, 0], sizes = [32, 1], strides = [1, 1]} : vector<32x8xf32> to vector<32x1xf32>
    %168 = arith.mulf %154, %167 : vector<32x1xf32>
    %169 = vector.extract_strided_slice %130 {offsets = [0, 0], sizes = [32, 1], strides = [1, 1]} : vector<32x8xf32> to vector<32x1xf32>
    %170 = arith.mulf %158, %169 : vector<32x1xf32>
    %171 = arith.addf %168, %170 : vector<32x1xf32>
    %172 = vector.extract_strided_slice %138 {offsets = [0, 0], sizes = [32, 1], strides = [1, 1]} : vector<32x8xf32> to vector<32x1xf32>
    %173 = arith.mulf %162, %172 : vector<32x1xf32>
    %174 = arith.addf %171, %173 : vector<32x1xf32>
    %175 = vector.extract_strided_slice %146 {offsets = [0, 0], sizes = [32, 1], strides = [1, 1]} : vector<32x8xf32> to vector<32x1xf32>
    %176 = arith.mulf %166, %175 : vector<32x1xf32>
    %177 = arith.addf %174, %176 : vector<32x1xf32>
    %178 = vector.extract_strided_slice %48 {offsets = [0, 0], sizes = [1, 8], strides = [1, 1]} : vector<8x8xf32> to vector<1x8xf32>
    %179 = vector.broadcast %177 : vector<32x1xf32> to vector<32x8xf32>
    %180 = vector.broadcast %178 : vector<1x8xf32> to vector<32x8xf32>
    %181 = arith.mulf %179, %180 : vector<32x8xf32>
    %182 = arith.addf %150, %181 : vector<32x8xf32>
    %183 = vector.extract_strided_slice %119 {offsets = [0, 1], sizes = [32, 1], strides = [1, 1]} : vector<32x8xf32> to vector<32x1xf32>
    %184 = arith.mulf %183, %154 : vector<32x1xf32>
    %185 = vector.extract_strided_slice %121 {offsets = [0, 1], sizes = [32, 1], strides = [1, 1]} : vector<32x8xf32> to vector<32x1xf32>
    %186 = arith.addf %184, %185 : vector<32x1xf32>
    %187 = vector.extract_strided_slice %127 {offsets = [0, 1], sizes = [32, 1], strides = [1, 1]} : vector<32x8xf32> to vector<32x1xf32>
    %188 = arith.mulf %187, %158 : vector<32x1xf32>
    %189 = vector.extract_strided_slice %129 {offsets = [0, 1], sizes = [32, 1], strides = [1, 1]} : vector<32x8xf32> to vector<32x1xf32>
    %190 = arith.addf %188, %189 : vector<32x1xf32>
    %191 = vector.extract_strided_slice %135 {offsets = [0, 1], sizes = [32, 1], strides = [1, 1]} : vector<32x8xf32> to vector<32x1xf32>
    %192 = arith.mulf %191, %162 : vector<32x1xf32>
    %193 = vector.extract_strided_slice %137 {offsets = [0, 1], sizes = [32, 1], strides = [1, 1]} : vector<32x8xf32> to vector<32x1xf32>
    %194 = arith.addf %192, %193 : vector<32x1xf32>
    %195 = vector.extract_strided_slice %143 {offsets = [0, 1], sizes = [32, 1], strides = [1, 1]} : vector<32x8xf32> to vector<32x1xf32>
    %196 = arith.mulf %195, %166 : vector<32x1xf32>
    %197 = vector.extract_strided_slice %145 {offsets = [0, 1], sizes = [32, 1], strides = [1, 1]} : vector<32x8xf32> to vector<32x1xf32>
    %198 = arith.addf %196, %197 : vector<32x1xf32>
    %199 = vector.extract_strided_slice %122 {offsets = [0, 1], sizes = [32, 1], strides = [1, 1]} : vector<32x8xf32> to vector<32x1xf32>
    %200 = arith.mulf %186, %199 : vector<32x1xf32>
    %201 = vector.extract_strided_slice %130 {offsets = [0, 1], sizes = [32, 1], strides = [1, 1]} : vector<32x8xf32> to vector<32x1xf32>
    %202 = arith.mulf %190, %201 : vector<32x1xf32>
    %203 = arith.addf %200, %202 : vector<32x1xf32>
    %204 = vector.extract_strided_slice %138 {offsets = [0, 1], sizes = [32, 1], strides = [1, 1]} : vector<32x8xf32> to vector<32x1xf32>
    %205 = arith.mulf %194, %204 : vector<32x1xf32>
    %206 = arith.addf %203, %205 : vector<32x1xf32>
    %207 = vector.extract_strided_slice %146 {offsets = [0, 1], sizes = [32, 1], strides = [1, 1]} : vector<32x8xf32> to vector<32x1xf32>
    %208 = arith.mulf %198, %207 : vector<32x1xf32>
    %209 = arith.addf %206, %208 : vector<32x1xf32>
    %210 = vector.extract_strided_slice %48 {offsets = [1, 0], sizes = [1, 8], strides = [1, 1]} : vector<8x8xf32> to vector<1x8xf32>
    %211 = vector.broadcast %209 : vector<32x1xf32> to vector<32x8xf32>
    %212 = vector.broadcast %210 : vector<1x8xf32> to vector<32x8xf32>
    %213 = arith.mulf %211, %212 : vector<32x8xf32>
    %214 = arith.addf %182, %213 : vector<32x8xf32>
    %215 = vector.extract_strided_slice %119 {offsets = [0, 2], sizes = [32, 1], strides = [1, 1]} : vector<32x8xf32> to vector<32x1xf32>
    %216 = arith.mulf %215, %186 : vector<32x1xf32>
    %217 = vector.extract_strided_slice %121 {offsets = [0, 2], sizes = [32, 1], strides = [1, 1]} : vector<32x8xf32> to vector<32x1xf32>
    %218 = arith.addf %216, %217 : vector<32x1xf32>
    %219 = vector.extract_strided_slice %127 {offsets = [0, 2], sizes = [32, 1], strides = [1, 1]} : vector<32x8xf32> to vector<32x1xf32>
    %220 = arith.mulf %219, %190 : vector<32x1xf32>
    %221 = vector.extract_strided_slice %129 {offsets = [0, 2], sizes = [32, 1], strides = [1, 1]} : vector<32x8xf32> to vector<32x1xf32>
    %222 = arith.addf %220, %221 : vector<32x1xf32>
    %223 = vector.extract_strided_slice %135 {offsets = [0, 2], sizes = [32, 1], strides = [1, 1]} : vector<32x8xf32> to vector<32x1xf32>
    %224 = arith.mulf %223, %194 : vector<32x1xf32>
    %225 = vector.extract_strided_slice %137 {offsets = [0, 2], sizes = [32, 1], strides = [1, 1]} : vector<32x8xf32> to vector<32x1xf32>
    %226 = arith.addf %224, %225 : vector<32x1xf32>
    %227 = vector.extract_strided_slice %143 {offsets = [0, 2], sizes = [32, 1], strides = [1, 1]} : vector<32x8xf32> to vector<32x1xf32>
    %228 = arith.mulf %227, %198 : vector<32x1xf32>
    %229 = vector.extract_strided_slice %145 {offsets = [0, 2], sizes = [32, 1], strides = [1, 1]} : vector<32x8xf32> to vector<32x1xf32>
    %230 = arith.addf %228, %229 : vector<32x1xf32>
    %231 = vector.extract_strided_slice %122 {offsets = [0, 2], sizes = [32, 1], strides = [1, 1]} : vector<32x8xf32> to vector<32x1xf32>
    %232 = arith.mulf %218, %231 : vector<32x1xf32>
    %233 = vector.extract_strided_slice %130 {offsets = [0, 2], sizes = [32, 1], strides = [1, 1]} : vector<32x8xf32> to vector<32x1xf32>
    %234 = arith.mulf %222, %233 : vector<32x1xf32>
    %235 = arith.addf %232, %234 : vector<32x1xf32>
    %236 = vector.extract_strided_slice %138 {offsets = [0, 2], sizes = [32, 1], strides = [1, 1]} : vector<32x8xf32> to vector<32x1xf32>
    %237 = arith.mulf %226, %236 : vector<32x1xf32>
    %238 = arith.addf %235, %237 : vector<32x1xf32>
    %239 = vector.extract_strided_slice %146 {offsets = [0, 2], sizes = [32, 1], strides = [1, 1]} : vector<32x8xf32> to vector<32x1xf32>
    %240 = arith.mulf %230, %239 : vector<32x1xf32>
    %241 = arith.addf %238, %240 : vector<32x1xf32>
    %242 = vector.extract_strided_slice %48 {offsets = [2, 0], sizes = [1, 8], strides = [1, 1]} : vector<8x8xf32> to vector<1x8xf32>
    %243 = vector.broadcast %241 : vector<32x1xf32> to vector<32x8xf32>
    %244 = vector.broadcast %242 : vector<1x8xf32> to vector<32x8xf32>
    %245 = arith.mulf %243, %244 : vector<32x8xf32>
    %246 = arith.addf %214, %245 : vector<32x8xf32>
    %247 = vector.extract_strided_slice %119 {offsets = [0, 3], sizes = [32, 1], strides = [1, 1]} : vector<32x8xf32> to vector<32x1xf32>
    %248 = arith.mulf %247, %218 : vector<32x1xf32>
    %249 = vector.extract_strided_slice %121 {offsets = [0, 3], sizes = [32, 1], strides = [1, 1]} : vector<32x8xf32> to vector<32x1xf32>
    %250 = arith.addf %248, %249 : vector<32x1xf32>
    %251 = vector.extract_strided_slice %127 {offsets = [0, 3], sizes = [32, 1], strides = [1, 1]} : vector<32x8xf32> to vector<32x1xf32>
    %252 = arith.mulf %251, %222 : vector<32x1xf32>
    %253 = vector.extract_strided_slice %129 {offsets = [0, 3], sizes = [32, 1], strides = [1, 1]} : vector<32x8xf32> to vector<32x1xf32>
    %254 = arith.addf %252, %253 : vector<32x1xf32>
    %255 = vector.extract_strided_slice %135 {offsets = [0, 3], sizes = [32, 1], strides = [1, 1]} : vector<32x8xf32> to vector<32x1xf32>
    %256 = arith.mulf %255, %226 : vector<32x1xf32>
    %257 = vector.extract_strided_slice %137 {offsets = [0, 3], sizes = [32, 1], strides = [1, 1]} : vector<32x8xf32> to vector<32x1xf32>
    %258 = arith.addf %256, %257 : vector<32x1xf32>
    %259 = vector.extract_strided_slice %143 {offsets = [0, 3], sizes = [32, 1], strides = [1, 1]} : vector<32x8xf32> to vector<32x1xf32>
    %260 = arith.mulf %259, %230 : vector<32x1xf32>
    %261 = vector.extract_strided_slice %145 {offsets = [0, 3], sizes = [32, 1], strides = [1, 1]} : vector<32x8xf32> to vector<32x1xf32>
    %262 = arith.addf %260, %261 : vector<32x1xf32>
    %263 = vector.extract_strided_slice %122 {offsets = [0, 3], sizes = [32, 1], strides = [1, 1]} : vector<32x8xf32> to vector<32x1xf32>
    %264 = arith.mulf %250, %263 : vector<32x1xf32>
    %265 = vector.extract_strided_slice %130 {offsets = [0, 3], sizes = [32, 1], strides = [1, 1]} : vector<32x8xf32> to vector<32x1xf32>
    %266 = arith.mulf %254, %265 : vector<32x1xf32>
    %267 = arith.addf %264, %266 : vector<32x1xf32>
    %268 = vector.extract_strided_slice %138 {offsets = [0, 3], sizes = [32, 1], strides = [1, 1]} : vector<32x8xf32> to vector<32x1xf32>
    %269 = arith.mulf %258, %268 : vector<32x1xf32>
    %270 = arith.addf %267, %269 : vector<32x1xf32>
    %271 = vector.extract_strided_slice %146 {offsets = [0, 3], sizes = [32, 1], strides = [1, 1]} : vector<32x8xf32> to vector<32x1xf32>
    %272 = arith.mulf %262, %271 : vector<32x1xf32>
    %273 = arith.addf %270, %272 : vector<32x1xf32>
    %274 = vector.extract_strided_slice %48 {offsets = [3, 0], sizes = [1, 8], strides = [1, 1]} : vector<8x8xf32> to vector<1x8xf32>
    %275 = vector.broadcast %273 : vector<32x1xf32> to vector<32x8xf32>
    %276 = vector.broadcast %274 : vector<1x8xf32> to vector<32x8xf32>
    %277 = arith.mulf %275, %276 : vector<32x8xf32>
    %278 = arith.addf %246, %277 : vector<32x8xf32>
    %279 = vector.extract_strided_slice %119 {offsets = [0, 4], sizes = [32, 1], strides = [1, 1]} : vector<32x8xf32> to vector<32x1xf32>
    %280 = arith.mulf %279, %250 : vector<32x1xf32>
    %281 = vector.extract_strided_slice %121 {offsets = [0, 4], sizes = [32, 1], strides = [1, 1]} : vector<32x8xf32> to vector<32x1xf32>
    %282 = arith.addf %280, %281 : vector<32x1xf32>
    %283 = vector.extract_strided_slice %127 {offsets = [0, 4], sizes = [32, 1], strides = [1, 1]} : vector<32x8xf32> to vector<32x1xf32>
    %284 = arith.mulf %283, %254 : vector<32x1xf32>
    %285 = vector.extract_strided_slice %129 {offsets = [0, 4], sizes = [32, 1], strides = [1, 1]} : vector<32x8xf32> to vector<32x1xf32>
    %286 = arith.addf %284, %285 : vector<32x1xf32>
    %287 = vector.extract_strided_slice %135 {offsets = [0, 4], sizes = [32, 1], strides = [1, 1]} : vector<32x8xf32> to vector<32x1xf32>
    %288 = arith.mulf %287, %258 : vector<32x1xf32>
    %289 = vector.extract_strided_slice %137 {offsets = [0, 4], sizes = [32, 1], strides = [1, 1]} : vector<32x8xf32> to vector<32x1xf32>
    %290 = arith.addf %288, %289 : vector<32x1xf32>
    %291 = vector.extract_strided_slice %143 {offsets = [0, 4], sizes = [32, 1], strides = [1, 1]} : vector<32x8xf32> to vector<32x1xf32>
    %292 = arith.mulf %291, %262 : vector<32x1xf32>
    %293 = vector.extract_strided_slice %145 {offsets = [0, 4], sizes = [32, 1], strides = [1, 1]} : vector<32x8xf32> to vector<32x1xf32>
    %294 = arith.addf %292, %293 : vector<32x1xf32>
    %295 = vector.extract_strided_slice %122 {offsets = [0, 4], sizes = [32, 1], strides = [1, 1]} : vector<32x8xf32> to vector<32x1xf32>
    %296 = arith.mulf %282, %295 : vector<32x1xf32>
    %297 = vector.extract_strided_slice %130 {offsets = [0, 4], sizes = [32, 1], strides = [1, 1]} : vector<32x8xf32> to vector<32x1xf32>
    %298 = arith.mulf %286, %297 : vector<32x1xf32>
    %299 = arith.addf %296, %298 : vector<32x1xf32>
    %300 = vector.extract_strided_slice %138 {offsets = [0, 4], sizes = [32, 1], strides = [1, 1]} : vector<32x8xf32> to vector<32x1xf32>
    %301 = arith.mulf %290, %300 : vector<32x1xf32>
    %302 = arith.addf %299, %301 : vector<32x1xf32>
    %303 = vector.extract_strided_slice %146 {offsets = [0, 4], sizes = [32, 1], strides = [1, 1]} : vector<32x8xf32> to vector<32x1xf32>
    %304 = arith.mulf %294, %303 : vector<32x1xf32>
    %305 = arith.addf %302, %304 : vector<32x1xf32>
    %306 = vector.extract_strided_slice %48 {offsets = [4, 0], sizes = [1, 8], strides = [1, 1]} : vector<8x8xf32> to vector<1x8xf32>
    %307 = vector.broadcast %305 : vector<32x1xf32> to vector<32x8xf32>
    %308 = vector.broadcast %306 : vector<1x8xf32> to vector<32x8xf32>
    %309 = arith.mulf %307, %308 : vector<32x8xf32>
    %310 = arith.addf %278, %309 : vector<32x8xf32>
    %311 = vector.extract_strided_slice %119 {offsets = [0, 5], sizes = [32, 1], strides = [1, 1]} : vector<32x8xf32> to vector<32x1xf32>
    %312 = arith.mulf %311, %282 : vector<32x1xf32>
    %313 = vector.extract_strided_slice %121 {offsets = [0, 5], sizes = [32, 1], strides = [1, 1]} : vector<32x8xf32> to vector<32x1xf32>
    %314 = arith.addf %312, %313 : vector<32x1xf32>
    %315 = vector.extract_strided_slice %127 {offsets = [0, 5], sizes = [32, 1], strides = [1, 1]} : vector<32x8xf32> to vector<32x1xf32>
    %316 = arith.mulf %315, %286 : vector<32x1xf32>
    %317 = vector.extract_strided_slice %129 {offsets = [0, 5], sizes = [32, 1], strides = [1, 1]} : vector<32x8xf32> to vector<32x1xf32>
    %318 = arith.addf %316, %317 : vector<32x1xf32>
    %319 = vector.extract_strided_slice %135 {offsets = [0, 5], sizes = [32, 1], strides = [1, 1]} : vector<32x8xf32> to vector<32x1xf32>
    %320 = arith.mulf %319, %290 : vector<32x1xf32>
    %321 = vector.extract_strided_slice %137 {offsets = [0, 5], sizes = [32, 1], strides = [1, 1]} : vector<32x8xf32> to vector<32x1xf32>
    %322 = arith.addf %320, %321 : vector<32x1xf32>
    %323 = vector.extract_strided_slice %143 {offsets = [0, 5], sizes = [32, 1], strides = [1, 1]} : vector<32x8xf32> to vector<32x1xf32>
    %324 = arith.mulf %323, %294 : vector<32x1xf32>
    %325 = vector.extract_strided_slice %145 {offsets = [0, 5], sizes = [32, 1], strides = [1, 1]} : vector<32x8xf32> to vector<32x1xf32>
    %326 = arith.addf %324, %325 : vector<32x1xf32>
    %327 = vector.extract_strided_slice %122 {offsets = [0, 5], sizes = [32, 1], strides = [1, 1]} : vector<32x8xf32> to vector<32x1xf32>
    %328 = arith.mulf %314, %327 : vector<32x1xf32>
    %329 = vector.extract_strided_slice %130 {offsets = [0, 5], sizes = [32, 1], strides = [1, 1]} : vector<32x8xf32> to vector<32x1xf32>
    %330 = arith.mulf %318, %329 : vector<32x1xf32>
    %331 = arith.addf %328, %330 : vector<32x1xf32>
    %332 = vector.extract_strided_slice %138 {offsets = [0, 5], sizes = [32, 1], strides = [1, 1]} : vector<32x8xf32> to vector<32x1xf32>
    %333 = arith.mulf %322, %332 : vector<32x1xf32>
    %334 = arith.addf %331, %333 : vector<32x1xf32>
    %335 = vector.extract_strided_slice %146 {offsets = [0, 5], sizes = [32, 1], strides = [1, 1]} : vector<32x8xf32> to vector<32x1xf32>
    %336 = arith.mulf %326, %335 : vector<32x1xf32>
    %337 = arith.addf %334, %336 : vector<32x1xf32>
    %338 = vector.extract_strided_slice %48 {offsets = [5, 0], sizes = [1, 8], strides = [1, 1]} : vector<8x8xf32> to vector<1x8xf32>
    %339 = vector.broadcast %337 : vector<32x1xf32> to vector<32x8xf32>
    %340 = vector.broadcast %338 : vector<1x8xf32> to vector<32x8xf32>
    %341 = arith.mulf %339, %340 : vector<32x8xf32>
    %342 = arith.addf %310, %341 : vector<32x8xf32>
    %343 = vector.extract_strided_slice %119 {offsets = [0, 6], sizes = [32, 1], strides = [1, 1]} : vector<32x8xf32> to vector<32x1xf32>
    %344 = arith.mulf %343, %314 : vector<32x1xf32>
    %345 = vector.extract_strided_slice %121 {offsets = [0, 6], sizes = [32, 1], strides = [1, 1]} : vector<32x8xf32> to vector<32x1xf32>
    %346 = arith.addf %344, %345 : vector<32x1xf32>
    %347 = vector.extract_strided_slice %127 {offsets = [0, 6], sizes = [32, 1], strides = [1, 1]} : vector<32x8xf32> to vector<32x1xf32>
    %348 = arith.mulf %347, %318 : vector<32x1xf32>
    %349 = vector.extract_strided_slice %129 {offsets = [0, 6], sizes = [32, 1], strides = [1, 1]} : vector<32x8xf32> to vector<32x1xf32>
    %350 = arith.addf %348, %349 : vector<32x1xf32>
    %351 = vector.extract_strided_slice %135 {offsets = [0, 6], sizes = [32, 1], strides = [1, 1]} : vector<32x8xf32> to vector<32x1xf32>
    %352 = arith.mulf %351, %322 : vector<32x1xf32>
    %353 = vector.extract_strided_slice %137 {offsets = [0, 6], sizes = [32, 1], strides = [1, 1]} : vector<32x8xf32> to vector<32x1xf32>
    %354 = arith.addf %352, %353 : vector<32x1xf32>
    %355 = vector.extract_strided_slice %143 {offsets = [0, 6], sizes = [32, 1], strides = [1, 1]} : vector<32x8xf32> to vector<32x1xf32>
    %356 = arith.mulf %355, %326 : vector<32x1xf32>
    %357 = vector.extract_strided_slice %145 {offsets = [0, 6], sizes = [32, 1], strides = [1, 1]} : vector<32x8xf32> to vector<32x1xf32>
    %358 = arith.addf %356, %357 : vector<32x1xf32>
    %359 = vector.extract_strided_slice %122 {offsets = [0, 6], sizes = [32, 1], strides = [1, 1]} : vector<32x8xf32> to vector<32x1xf32>
    %360 = arith.mulf %346, %359 : vector<32x1xf32>
    %361 = vector.extract_strided_slice %130 {offsets = [0, 6], sizes = [32, 1], strides = [1, 1]} : vector<32x8xf32> to vector<32x1xf32>
    %362 = arith.mulf %350, %361 : vector<32x1xf32>
    %363 = arith.addf %360, %362 : vector<32x1xf32>
    %364 = vector.extract_strided_slice %138 {offsets = [0, 6], sizes = [32, 1], strides = [1, 1]} : vector<32x8xf32> to vector<32x1xf32>
    %365 = arith.mulf %354, %364 : vector<32x1xf32>
    %366 = arith.addf %363, %365 : vector<32x1xf32>
    %367 = vector.extract_strided_slice %146 {offsets = [0, 6], sizes = [32, 1], strides = [1, 1]} : vector<32x8xf32> to vector<32x1xf32>
    %368 = arith.mulf %358, %367 : vector<32x1xf32>
    %369 = arith.addf %366, %368 : vector<32x1xf32>
    %370 = vector.extract_strided_slice %48 {offsets = [6, 0], sizes = [1, 8], strides = [1, 1]} : vector<8x8xf32> to vector<1x8xf32>
    %371 = vector.broadcast %369 : vector<32x1xf32> to vector<32x8xf32>
    %372 = vector.broadcast %370 : vector<1x8xf32> to vector<32x8xf32>
    %373 = arith.mulf %371, %372 : vector<32x8xf32>
    %374 = arith.addf %342, %373 : vector<32x8xf32>
    %375 = vector.extract_strided_slice %119 {offsets = [0, 7], sizes = [32, 1], strides = [1, 1]} : vector<32x8xf32> to vector<32x1xf32>
    %376 = arith.mulf %375, %346 : vector<32x1xf32>
    %377 = vector.extract_strided_slice %121 {offsets = [0, 7], sizes = [32, 1], strides = [1, 1]} : vector<32x8xf32> to vector<32x1xf32>
    %378 = arith.addf %376, %377 : vector<32x1xf32>
    %379 = vector.extract_strided_slice %127 {offsets = [0, 7], sizes = [32, 1], strides = [1, 1]} : vector<32x8xf32> to vector<32x1xf32>
    %380 = arith.mulf %379, %350 : vector<32x1xf32>
    %381 = vector.extract_strided_slice %129 {offsets = [0, 7], sizes = [32, 1], strides = [1, 1]} : vector<32x8xf32> to vector<32x1xf32>
    %382 = arith.addf %380, %381 : vector<32x1xf32>
    %383 = vector.extract_strided_slice %135 {offsets = [0, 7], sizes = [32, 1], strides = [1, 1]} : vector<32x8xf32> to vector<32x1xf32>
    %384 = arith.mulf %383, %354 : vector<32x1xf32>
    %385 = vector.extract_strided_slice %137 {offsets = [0, 7], sizes = [32, 1], strides = [1, 1]} : vector<32x8xf32> to vector<32x1xf32>
    %386 = arith.addf %384, %385 : vector<32x1xf32>
    %387 = vector.extract_strided_slice %143 {offsets = [0, 7], sizes = [32, 1], strides = [1, 1]} : vector<32x8xf32> to vector<32x1xf32>
    %388 = arith.mulf %387, %358 : vector<32x1xf32>
    %389 = vector.extract_strided_slice %145 {offsets = [0, 7], sizes = [32, 1], strides = [1, 1]} : vector<32x8xf32> to vector<32x1xf32>
    %390 = arith.addf %388, %389 : vector<32x1xf32>
    %391 = vector.extract_strided_slice %122 {offsets = [0, 7], sizes = [32, 1], strides = [1, 1]} : vector<32x8xf32> to vector<32x1xf32>
    %392 = arith.mulf %378, %391 : vector<32x1xf32>
    %393 = vector.extract_strided_slice %130 {offsets = [0, 7], sizes = [32, 1], strides = [1, 1]} : vector<32x8xf32> to vector<32x1xf32>
    %394 = arith.mulf %382, %393 : vector<32x1xf32>
    %395 = arith.addf %392, %394 : vector<32x1xf32>
    %396 = vector.extract_strided_slice %138 {offsets = [0, 7], sizes = [32, 1], strides = [1, 1]} : vector<32x8xf32> to vector<32x1xf32>
    %397 = arith.mulf %386, %396 : vector<32x1xf32>
    %398 = arith.addf %395, %397 : vector<32x1xf32>
    %399 = vector.extract_strided_slice %146 {offsets = [0, 7], sizes = [32, 1], strides = [1, 1]} : vector<32x8xf32> to vector<32x1xf32>
    %400 = arith.mulf %390, %399 : vector<32x1xf32>
    %401 = arith.addf %398, %400 : vector<32x1xf32>
    %402 = vector.extract_strided_slice %48 {offsets = [7, 0], sizes = [1, 8], strides = [1, 1]} : vector<8x8xf32> to vector<1x8xf32>
    %403 = vector.broadcast %401 : vector<32x1xf32> to vector<32x8xf32>
    %404 = vector.broadcast %402 : vector<1x8xf32> to vector<32x8xf32>
    %405 = arith.mulf %403, %404 : vector<32x8xf32>
    %406 = arith.addf %374, %405 : vector<32x8xf32>
    %c256 = arith.constant 256 : index
    %c0_31 = arith.constant 0 : index
    %407 = vector.load %arg6[%c256, %c0_31] : memref<800x32xf32, #tpu.memory_space<vmem>>, vector<256x32xf32>
    %cst_32 = arith.constant dense<0.000000e+00> : vector<256x8xf32>
    %408 = tpu.matmul %407, %406, %cst_32 {dimension_numbers = #tpu.dot_dimension_numbers<[1], [0], [0], [1], [0, 0, 1, 1], [], []>} : vector<256x32xf32>, vector<32x8xf32>, vector<256x8xf32> -> vector<256x8xf32>
    %c256_33 = arith.constant 256 : index
    %c0_34 = arith.constant 0 : index
    %409 = vector.load %arg7[%c256_33, %c0_34] : memref<512x8xf32, #tpu.memory_space<vmem>>, vector<256x8xf32>
    %410 = arith.mulf %408, %409 : vector<256x8xf32>
    %cst_35 = arith.constant dense<0.000000e+00> : vector<256xf32>
    %411 = vector.multi_reduction <add>, %410, %cst_35 [1] : vector<256x8xf32> to vector<256xf32>
    %412 = vector.shape_cast %411 : vector<256xf32> to vector<256x1xf32>
    %cst_36 = arith.constant 0.000000e+00 : f32
    %413 = vector.broadcast %cst_36 : f32 to vector<32x8xf32>
    %414 = vector.extract_strided_slice %412 {offsets = [0, 0], sizes = [32, 1], strides = [1, 1]} : vector<256x1xf32> to vector<32x1xf32>
    %415 = vector.extract_strided_slice %48 {offsets = [0, 0], sizes = [1, 8], strides = [1, 1]} : vector<8x8xf32> to vector<1x8xf32>
    %416 = vector.broadcast %414 : vector<32x1xf32> to vector<32x8xf32>
    %417 = vector.broadcast %415 : vector<1x8xf32> to vector<32x8xf32>
    %418 = arith.mulf %416, %417 : vector<32x8xf32>
    %419 = arith.addf %413, %418 : vector<32x8xf32>
    %420 = vector.extract_strided_slice %412 {offsets = [32, 0], sizes = [32, 1], strides = [1, 1]} : vector<256x1xf32> to vector<32x1xf32>
    %421 = vector.extract_strided_slice %48 {offsets = [1, 0], sizes = [1, 8], strides = [1, 1]} : vector<8x8xf32> to vector<1x8xf32>
    %422 = vector.broadcast %420 : vector<32x1xf32> to vector<32x8xf32>
    %423 = vector.broadcast %421 : vector<1x8xf32> to vector<32x8xf32>
    %424 = arith.mulf %422, %423 : vector<32x8xf32>
    %425 = arith.addf %419, %424 : vector<32x8xf32>
    %426 = vector.extract_strided_slice %412 {offsets = [64, 0], sizes = [32, 1], strides = [1, 1]} : vector<256x1xf32> to vector<32x1xf32>
    %427 = vector.extract_strided_slice %48 {offsets = [2, 0], sizes = [1, 8], strides = [1, 1]} : vector<8x8xf32> to vector<1x8xf32>
    %428 = vector.broadcast %426 : vector<32x1xf32> to vector<32x8xf32>
    %429 = vector.broadcast %427 : vector<1x8xf32> to vector<32x8xf32>
    %430 = arith.mulf %428, %429 : vector<32x8xf32>
    %431 = arith.addf %425, %430 : vector<32x8xf32>
    %432 = vector.extract_strided_slice %412 {offsets = [96, 0], sizes = [32, 1], strides = [1, 1]} : vector<256x1xf32> to vector<32x1xf32>
    %433 = vector.extract_strided_slice %48 {offsets = [3, 0], sizes = [1, 8], strides = [1, 1]} : vector<8x8xf32> to vector<1x8xf32>
    %434 = vector.broadcast %432 : vector<32x1xf32> to vector<32x8xf32>
    %435 = vector.broadcast %433 : vector<1x8xf32> to vector<32x8xf32>
    %436 = arith.mulf %434, %435 : vector<32x8xf32>
    %437 = arith.addf %431, %436 : vector<32x8xf32>
    %438 = vector.extract_strided_slice %412 {offsets = [128, 0], sizes = [32, 1], strides = [1, 1]} : vector<256x1xf32> to vector<32x1xf32>
    %439 = vector.extract_strided_slice %48 {offsets = [4, 0], sizes = [1, 8], strides = [1, 1]} : vector<8x8xf32> to vector<1x8xf32>
    %440 = vector.broadcast %438 : vector<32x1xf32> to vector<32x8xf32>
    %441 = vector.broadcast %439 : vector<1x8xf32> to vector<32x8xf32>
    %442 = arith.mulf %440, %441 : vector<32x8xf32>
    %443 = arith.addf %437, %442 : vector<32x8xf32>
    %444 = vector.extract_strided_slice %412 {offsets = [160, 0], sizes = [32, 1], strides = [1, 1]} : vector<256x1xf32> to vector<32x1xf32>
    %445 = vector.extract_strided_slice %48 {offsets = [5, 0], sizes = [1, 8], strides = [1, 1]} : vector<8x8xf32> to vector<1x8xf32>
    %446 = vector.broadcast %444 : vector<32x1xf32> to vector<32x8xf32>
    %447 = vector.broadcast %445 : vector<1x8xf32> to vector<32x8xf32>
    %448 = arith.mulf %446, %447 : vector<32x8xf32>
    %449 = arith.addf %443, %448 : vector<32x8xf32>
    %450 = vector.extract_strided_slice %412 {offsets = [192, 0], sizes = [32, 1], strides = [1, 1]} : vector<256x1xf32> to vector<32x1xf32>
    %451 = vector.extract_strided_slice %48 {offsets = [6, 0], sizes = [1, 8], strides = [1, 1]} : vector<8x8xf32> to vector<1x8xf32>
    %452 = vector.broadcast %450 : vector<32x1xf32> to vector<32x8xf32>
    %453 = vector.broadcast %451 : vector<1x8xf32> to vector<32x8xf32>
    %454 = arith.mulf %452, %453 : vector<32x8xf32>
    %455 = arith.addf %449, %454 : vector<32x8xf32>
    %456 = vector.extract_strided_slice %412 {offsets = [224, 0], sizes = [32, 1], strides = [1, 1]} : vector<256x1xf32> to vector<32x1xf32>
    %457 = vector.extract_strided_slice %48 {offsets = [7, 0], sizes = [1, 8], strides = [1, 1]} : vector<8x8xf32> to vector<1x8xf32>
    %458 = vector.broadcast %456 : vector<32x1xf32> to vector<32x8xf32>
    %459 = vector.broadcast %457 : vector<1x8xf32> to vector<32x8xf32>
    %460 = arith.mulf %458, %459 : vector<32x8xf32>
    %461 = arith.addf %455, %460 : vector<32x8xf32>
    %462 = vector.broadcast %43 : vector<1x8xf32> to vector<32x8xf32>
    %463 = arith.mulf %461, %462 : vector<32x8xf32>
    %cst_37 = arith.constant dense<0.000000e+00> : vector<32xf32>
    %464 = vector.multi_reduction <add>, %463, %cst_37 [1] : vector<32x8xf32> to vector<32xf32>
    %465 = vector.shape_cast %464 : vector<32xf32> to vector<32x1xf32>
    %cst_38 = arith.constant 8.000000e+00 : f32
    %466 = vector.broadcast %cst_38 : f32 to vector<32x1xf32>
    %467 = arith.divf %465, %466 : vector<32x1xf32>
    %468 = vector.broadcast %467 : vector<32x1xf32> to vector<32x8xf32>
    %469 = arith.subf %463, %468 : vector<32x8xf32>
    %470 = arith.mulf %469, %469 : vector<32x8xf32>
    %cst_39 = arith.constant dense<0.000000e+00> : vector<32xf32>
    %471 = vector.multi_reduction <add>, %470, %cst_39 [1] : vector<32x8xf32> to vector<32xf32>
    %472 = vector.shape_cast %471 : vector<32xf32> to vector<32x1xf32>
    %cst_40 = arith.constant 8.000000e+00 : f32
    %473 = vector.broadcast %cst_40 : f32 to vector<32x1xf32>
    %474 = arith.divf %472, %473 : vector<32x1xf32>
    %475 = vector.broadcast %467 : vector<32x1xf32> to vector<32x8xf32>
    %476 = arith.subf %463, %475 : vector<32x8xf32>
    %cst_41 = arith.constant 9.99999974E-6 : f32
    %477 = vector.broadcast %cst_41 : f32 to vector<32x1xf32>
    %478 = arith.addf %474, %477 : vector<32x1xf32>
    %479 = math.rsqrt %478 : vector<32x1xf32>
    %480 = vector.broadcast %479 : vector<32x1xf32> to vector<32x8xf32>
    %481 = arith.mulf %476, %480 : vector<32x8xf32>
    %482 = vector.extract_strided_slice %1 {offsets = [14, 0], sizes = [1, 8], strides = [1, 1]} : vector<24x8xf32> to vector<1x8xf32>
    %483 = vector.broadcast %482 : vector<1x8xf32> to vector<32x8xf32>
    %484 = arith.mulf %481, %483 : vector<32x8xf32>
    %485 = vector.extract_strided_slice %1 {offsets = [15, 0], sizes = [1, 8], strides = [1, 1]} : vector<24x8xf32> to vector<1x8xf32>
    %486 = vector.broadcast %485 : vector<1x8xf32> to vector<32x8xf32>
    %487 = arith.addf %484, %486 : vector<32x8xf32>
    %488 = arith.mulf %487, %12 : vector<32x8xf32>
    %489 = vector.extract_strided_slice %1 {offsets = [0, 0], sizes = [8, 8], strides = [1, 1]} : vector<24x8xf32> to vector<8x8xf32>
    %cst_42 = arith.constant dense<0.000000e+00> : vector<32x8xf32>
    %490 = tpu.matmul %488, %489, %cst_42 {dimension_numbers = #tpu.dot_dimension_numbers<[1], [0], [0], [1], [0, 0, 1, 1], [], []>} : vector<32x8xf32>, vector<8x8xf32>, vector<32x8xf32> -> vector<32x8xf32>
    %c0_43 = arith.constant 0 : index
    %c0_44 = arith.constant 0 : index
    %491 = vector.load %arg8[%c0_43, %c0_44] : memref<32x8xf32, #tpu.memory_space<vmem>>, vector<32x8xf32>
    tpu.vector_store %arg8[%c0_43, %c0_44], %490 {strides = array<i32>} : memref<32x8xf32, #tpu.memory_space<vmem>>, vector<32x8xf32>,
    return
  }
  func.func @transform_0(%arg0: i32) -> (i32, i32) {
    %c0_i32 = arith.constant 0 : i32
    %c0_i32_0 = arith.constant 0 : i32
    return %arg0, %c0_i32 : i32, i32
  }
  func.func @transform_1(%arg0: i32) -> (i32, i32) {
    %c0_i32 = arith.constant 0 : i32
    %c0_i32_0 = arith.constant 0 : i32
    %c0_i32_1 = arith.constant 0 : i32
    return %c0_i32, %c0_i32_0 : i32, i32
  }
  func.func @transform_2(%arg0: i32) -> (i32, i32) {
    %c0_i32 = arith.constant 0 : i32
    %c0_i32_0 = arith.constant 0 : i32
    %c0_i32_1 = arith.constant 0 : i32
    return %c0_i32, %c0_i32_0 : i32, i32
  }
  func.func @transform_3(%arg0: i32) -> (i32, i32) {
    %c0_i32 = arith.constant 0 : i32
    %c0_i32_0 = arith.constant 0 : i32
    %c0_i32_1 = arith.constant 0 : i32
    return %c0_i32, %c0_i32_0 : i32, i32
  }
  func.func @transform_4(%arg0: i32) -> (i32, i32) {
    %c0_i32 = arith.constant 0 : i32
    %c0_i32_0 = arith.constant 0 : i32
    %c0_i32_1 = arith.constant 0 : i32
    return %c0_i32, %c0_i32_0 : i32, i32
  }
  func.func @transform_5(%arg0: i32) -> (i32, i32) {
    %c0_i32 = arith.constant 0 : i32
    %c0_i32_0 = arith.constant 0 : i32
    %c0_i32_1 = arith.constant 0 : i32
    return %c0_i32, %c0_i32_0 : i32, i32
  }
  func.func @transform_6(%arg0: i32) -> (i32, i32) {
    %c0_i32 = arith.constant 0 : i32
    %c0_i32_0 = arith.constant 0 : i32
    %c0_i32_1 = arith.constant 0 : i32
    return %c0_i32, %c0_i32_0 : i32, i32
  }
  func.func @transform_7(%arg0: i32) -> (i32, i32) {
    %c0_i32 = arith.constant 0 : i32
    %c0_i32_0 = arith.constant 0 : i32
    return %arg0, %c0_i32 : i32, i32
  }
}

</mosaic_0001>

<bundles_post_ra>
// kernel: forward_pallas.1
= control target key start
LH: loop header
LB: loop body
LE: loop exit
PB: predicated region body
PF: predicated region fallthrough
CT: control target
= control target key end

     0   :  { %12 = vsyncpa [#allocation3], 0  ;;  %s6637_s0 = inlined_call_operand.vmem [shape: f32[64,8], index: 0, kind: input, shape index: {}]   ;;  %s6638_s1 = inlined_call_operand.vmem [shape: f32[8,16], index: 1, kind: input, shape index: {}]   ;;  %s6639_s2 = inlined_call_operand.vmem [shape: f32[8,4], index: 2, kind: input, shape index: {}]   ;;  %s6640_s3 = inlined_call_operand.vmem [shape: f32[24,8], index: 3, kind: input, shape index: {}]   ;;  %s6641_s4 = inlined_call_operand.vmem [shape: f32[32,8], index: 4, kind: input, shape index: {}]   ;;  %s6642_s5 = inlined_call_operand.vmem [shape: f32[800,32], index: 5, kind: input, shape index: {}]   ;;  %s6643_s6 = inlined_call_operand.vmem [shape: f32[512,8], index: 6, kind: input, shape index: {}]   ;;  %s6644_s7 = inlined_call_operand.hbm [shape: f32[64,8], index: 7, kind: output, shape index: {}]  }
   0x1   :  { %14 = vsyncpa [#allocation3 + $0x1], 0  ;;  %s4670_s24 = smov 0   ;;  %s4672_s25 = smov 0  }
   0x2   :  { %s4674_s26 = smov 0   ;;  %s4676_s27 = smov 0  }
   0x3 LB: > { %s4691_s28 = sadd.s32 4294967295, %s4613_s27   ;;  %s3875_s29 = sadd.s32 4294967294, %s4613_s27   ;;  %s4613_s27 = sphi %s4676_s27, %s6853_s27   ;;  %s4609_s26 = sphi %s4674_s26, %s6852_s26   ;;  %s4605_s25 = sphi %s4672_s25, %s6851_s25   ;;  %s4601_s24 = sphi %s4670_s24, %s6850_s24  }
   0x4   : > { %s4695_s30 = sadd.s32 1, %s4613_s27   ;;  %s179_s8 = sadd.s32 1, %s4609_s26 }
   0x5   : > { %s176_s9 = ssub.s32 %s4613_s27, %s4695_s30  ;;  %p189_p0 = scmp.ne.s32.totalorder %s4609_s26, %s4605_s25 }
   0x6   : > { %p177_p1 = scmp.eq.s32.totalorder %s176_s9, 0  ;;  %p190_p2 = scmp.eq.s32.totalorder %s4691_s28, 1 }
   0x7   : > { %p195_p3 = scmp.ne.s32.totalorder %s4605_s25, %s4601_s24  ;;  %p196_p4 = scmp.eq.s32.totalorder %s3875_s29, 1 }
   0x8   : > { %s4706_s10 = scalar_select %p177_p1, %s4609_s26, %s179_s8  }
   0x9   : > { %p4708_p5 = por %p190_p2, %p189_p0  ;;  %p4712_p6 = por %p196_p4, %p195_p3 }
   0xa   : > { %p3878_p7 = scmp.ge.s32.totalorder %s4613_s27, 1  ;;  %p241_p8 = scmp.lt.s32.totalorder %s4613_s27, 3 }
   0xc   : > { %p242_p9 = pnand %p3878_p7, %p241_p8 }
   0xe   : > { %245 = sbr.rel (%p242_p9) target bundleno = 3198 (0xc7e), region = 48 }
  0x15   : > { %v291_v0 = vld [vmem:[%s6638_s1] sm:$0xff]  ;;  %s3880_s15 = sshll.u32 %s4691_s28, 2  ;;  %vm292_vm0 = vcmask 64512   ;;  %v418_v5 = vlaneseq  ;;  %v4615_v10 = vmov 0.0   ;;  %vm4616_vm2 = vmmov 0   ;;  %v4769_v22 = vld [vmem:[%s6640_s3 + $0x8] sm:$0xff] }
  0x16   : > { %4135 = vmatprep.subr.mxu0 %v291_v0  ;;  %p274_p10 = scmp.lt.s32.totalorder %s3880_s15, 7  ;;  %v476_v9 = vld [vmem:[%s6639_s2] sm:$0xff]  ;;  %4143 = vmatprep.subr.mxu1 %v4615_v10  ;;  %vm677_vm3 = vcmask 261120   ;;  %vm558_vm4 = vcmask 1043456   ;;  %vm554_vm5 = vcmask 31744   ;;  %s4622_s29 = smov 1  }
  0x17   : > { %4136 = vmatpush3.msra.mxu0 %v291_v0  ;;  %v4729_v6 = vshrl.u32 %v418_v5, 7  ;;  %v641_v7 = vand.u32 127, %v418_v5  ;;  %4144 = vmatpush3.msra.mxu1 %v476_v9  ;;  %v645_v21 = vld [vmem:[%s6642_s5] sm:$0xff]  ;;  %s4626_s23 = smov 120   ;;  %s270_s14 = sand.u32 1, %s4605_s25  }
  0x18   : > { %s6855_s15 = smov (!%p274_p10, %s3880_s15), 7  ;;  %4145 = vmatprep.mubr.msk.f32.mxu1 %vm4616_vm2, %v4615_v10  ;;  %4148 = vmatprep.subr.mxu1 %v4615_v10  ;;  %s4008_s18 = sshll.u32 %s4691_s28, 9 }
  0x19   : > { %s3881_s16 = sshll.u32 %s6855_s15, 3  ;;  %6719 = vst [vmem:[#allocation5_spill] sm:$0xff] %v4729_v6  ;;  %v1173_v8 = vsub.s32 1, %v4729_v6  ;;  %v1185_v11 = vsub.s32 2, %v4729_v6  ;;  %v1197_v12 = vsub.s32 3, %v4729_v6  ;;  %vm642_vm1 = vcmp.eq.s32.totalorder %v4729_v6, %v641_v7  ;;  %v648_v7 = vld [vmem:[%s6642_s5 + $0x18] sm:$0xff]  ;;  %s6592_s21 = scalar_lea.hbm %s6644_s7, %s4008_s18 }
  0x1a   : > { %s277_s19 = scalar_lea.vmem %s6637_s0, %s3881_s16  ;;  %v420_v13 = vsub.s32 4, %v4729_v6  ;;  %v428_v14 = vsub.s32 5, %v4729_v6  ;;  %v4742_v15 = vsel %vm642_vm1, 1.0, %v4615_v10  ;;  %s3879_s15 = sshll.u32 %s270_s14, 5 }
  0x1b   : > { %v280_v1 = vld [vmem:[%s277_s19] sm:$0xff]  ;;  %v281_v2 = vld [vmem:[%s277_s19 + $0x8] sm:$0xff]  ;;  %v282_v3 = vld [vmem:[%s277_s19 + $0x10] sm:$0xff]  ;;  %v4748_v16 = vrot.slane %v4742_v15, %v1173_v8  ;;  %v4751_v17 = vrot.slane %v4742_v15, %v1185_v11  ;;  %v4754_v18 = vrot.slane %v4742_v15, %v1197_v12  ;;  %s272_s16 = scalar_lea.vmem [#allocation2], %s3879_s15  ;;  %s6596_s22 = scalar_lea.sflag [#allocation3], %s270_s14 }
  0x1c   : > { %4137 = vmatprep.mubr.msk.f32.mxu0 %vm292_vm0, %v280_v1  ;;  %v283_v4 = vld [vmem:[%s277_s19 + $0x18] sm:$0xff]  ;;  %v4757_v19 = vrot.slane %v4742_v15, %v420_v13  ;;  %v4760_v20 = vrot.slane %v4742_v15, %v428_v14  ;;  %v421_v23 = vrot.slane %v4769_v22, %v420_v13  ;;  %v429_v24 = vrot.slane %v4769_v22, %v428_v14  ;;  %v649_v8 = vld [vmem:[%s6642_s5 + $0x20] sm:$0xff]  ;;  %v650_v12 = vld [vmem:[%s6642_s5 + $0x28] sm:$0xff]  ;;  %s3813_s17 = sshll.u32 %s272_s16, 4  ;;  %s4627_s28 = smov [#allocation2]   ;;  %s6587_s17 = int_to_ptr.vmem [resolvable:$true] %s3813_s17 }
  0x1d   : > { %4138 = vmatmul.mubr.msk.f32.vlgmr.msra.gmra.mrb[0].mxu0 %vm292_vm0, %v281_v2  ;;  %6720 = vst [vmem:[#allocation6_spill] sm:$0xff] %v4748_v16  ;;  %6721 = vst [vmem:[#allocation7_spill] sm:$0xff] %v4751_v17  ;;  %v646_v2 = vld [vmem:[%s6642_s5 + $0x8] sm:$0xff]  ;;  %v651_v13 = vld [vmem:[%s6642_s5 + $0x30] sm:$0xff] }
  0x1e   : > { %4140 = vmatprep.mubr.msk.f32.mxu0 %vm292_vm0, %v282_v3  ;;  %6722 = vst [vmem:[#allocation8_spill] sm:$0xff] %v4754_v18  ;;  %6723 = vst [vmem:[#allocation9_spill] sm:$0xff] %v4757_v19  ;;  %v647_v3 = vld [vmem:[%s6642_s5 + $0x10] sm:$0xff] }
  0x1f   : > { %6724 = vst [vmem:[#allocation10_spill] sm:$0xff] %v4760_v20 }
  0x21   : > { %4141 = vmatmul.mubr.msk.f32.gmra.mrb[2].mxu0 %vm292_vm0, %v283_v4 }
  0x22   : > { %4161 = vmatprep.mubr.msk.f32.mxu0 %vm677_vm3, %v645_v21 }
  0xf0   : > { %v4773_v25 = vpop.f32.mrb[0].mxu0 }
  0xf1   : > { %6725 = vst [vmem:[#allocation11_spill] sm:$0xff] %v4773_v25  ;;  %v423_v26 = vmul.f32 %v4773_v25, %v421_v23  ;;  %v4776_v27 = vpop.f32.mrb[1].mxu0 }
  0xf2   : > { %6726 = vst [vmem:[#allocation12_spill] sm:$0xff] %v4776_v27  ;;  %v422_v28 = vmul.f32 %v421_v23, %v4776_v27 }
  0xf3   : > { %v431_v29 = vadd.f32 %v429_v24, %v423_v26 }
  0xf4   : > { %v430_v30 = vadd.f32 %v429_v24, %v422_v28  ;;  %v4779_v31 = vpop.f32.mrb[2].mxu0  ;;  %v654_v28 = vld [vmem:[%s6642_s5 + $0x48] sm:$0xff] }
  0xf5   : > { %6727 = vst [vmem:[#allocation13_spill] sm:$0xff] %v4779_v31  ;;  %v3891_v32 = vmul.f32 -1.442695, %v431_v29  ;;  %v425_v33 = vmul.f32 %v4779_v31, %v421_v23  ;;  %v4782_v34 = vpop.f32.mrb[3].mxu0 }
  0xf6   : > { %6728 = vst [vmem:[#allocation14_spill] sm:$0xff] %v4782_v34  ;;  %v3890_v35 = vmul.f32 -1.442695, %v430_v30  ;;  %v424_v36 = vmul.f32 %v421_v23, %v4782_v34  ;;  %v652_v23 = vld [vmem:[%s6642_s5 + $0x38] sm:$0xff] }
  0xf7   : > { %4453 = vpow2.f32 %v3891_v32  ;;  %v433_v37 = vadd.f32 %v429_v24, %v425_v33  ;;  %v659_v32 = vld [vmem:[%s6642_s5 + $0x70] sm:$0xff]  ;;  %v660_v33 = vld [vmem:[%s6642_s5 + $0x78] sm:$0xff] }
  0xf8   : > { %4455 = vpow2.f32 %v3890_v35  ;;  %v432_v38 = vadd.f32 %v429_v24, %v424_v36  ;;  %v653_v24 = vld [vmem:[%s6642_s5 + $0x40] sm:$0xff]  ;;  %v662_v36 = vld [vmem:[%s6642_s5 + $0x88] sm:$0xff] }
  0xf9   : > { %v3893_v39 = vmul.f32 -1.442695, %v433_v37  ;;  %v661_v35 = vld [vmem:[%s6642_s5 + $0x80] sm:$0xff] }
  0xfa   : > { %v3892_v40 = vmul.f32 -1.442695, %v432_v38 }
  0xfb   : > { %4457 = vpow2.f32 %v3893_v39  ;;  %v665_v39 = vld [vmem:[%s6642_s5 + $0xa0] sm:$0xff] }
  0xfc   : > { %4459 = vpow2.f32 %v3892_v40  ;;  %v666_v40 = vld [vmem:[%s6642_s5 + $0xa8] sm:$0xff] }
 0x101   : > { %v4454_v41 = vpop.eup %4453 }
 0x102   : > { %v4456_v42 = vpop.eup %4455  ;;  %v447_v43 = vadd.f32 1.0, %v4454_v41  ;;  %v1000_v41 = vld [vmem:[%s6643_s6 + $0x8] sm:$0xff] }
 0x103   : > { %v446_v44 = vadd.f32 1.0, %v4456_v42  ;;  %v999_v42 = vld [vmem:[%s6643_s6] sm:$0xff] }
 0x104   : > { %4461 = vrcp.f32 %v447_v43 }
 0x105   : > { %v4458_v45 = vpop.eup %4457  ;;  %4463 = vrcp.f32 %v446_v44 }
 0x106   : > { %v4460_v46 = vpop.eup %4459  ;;  %v449_v47 = vadd.f32 1.0, %v4458_v45 }
 0x107   : > { %v448_v48 = vadd.f32 1.0, %v4460_v46 }
 0x108   : > { %4465 = vrcp.f32 %v449_v47  ;;  %v1002_v47 = vld [vmem:[%s6643_s6 + $0x18] sm:$0xff] }
 0x109   : > { %4467 = vrcp.f32 %v448_v48  ;;  %v1001_v48 = vld [vmem:[%s6643_s6 + $0x10] sm:$0xff] }
 0x10e   : > { %v4462_v49 = vpop.eup %4461 }
 0x10f   : > { %v4464_v50 = vpop.eup %4463  ;;  %v459_v51 = vmul.f32 %v4462_v49, %v431_v29  ;;  %v655_v29 = vld [vmem:[%s6642_s5 + $0x50] sm:$0xff] }
 0x110   : > { %v458_v52 = vmul.f32 %v4464_v50, %v430_v30  ;;  %v656_v30 = vld [vmem:[%s6642_s5 + $0x58] sm:$0xff] }
 0x111   : > { %v463_v53 = vsel %vm292_vm0, %v459_v51, 0.0 }
 0x112   : > { %v4466_v54 = vpop.eup %4465  ;;  %v462_v55 = vsel %vm292_vm0, %v458_v52, 0.0  ;;  %v4787_v56 = vpack.c.bf16 %v459_v51, %v458_v52 }
 0x113   : > { %v4468_v57 = vpop.eup %4467  ;;  %v464_v58 = vadd.f32 %v463_v53, %v462_v55  ;;  %v461_v59 = vmul.f32 %v4466_v54, %v433_v37  ;;  %v663_v37 = vld [vmem:[%s6642_s5 + $0x90] sm:$0xff]  ;;  %v1004_v55 = vld [vmem:[%s6643_s6 + $0x28] sm:$0xff] }
 0x114   : > { %v460_v60 = vmul.f32 %v4468_v57, %v432_v38  ;;  %4336 = vmatprep.subr.bf16.mxu0 %v4787_v56  ;;  %v664_v38 = vld [vmem:[%s6642_s5 + $0x98] sm:$0xff]  ;;  %v286_v57 = vld [vmem:[%s6640_s3 + $0x10] sm:$0xff] }
 0x115   : > { %4338 = vmatpush3.bf16.msra.mxu0 %v4787_v56  ;;  %v467_v0 = vsel %vm292_vm0, %v461_v59, 0.0 }
 0x116   : > { %v465_v61 = vsel %vm292_vm0, %v460_v60, 0.0  ;;  %v4792_v62 = vpack.c.bf16 %v461_v59, %v460_v60  ;;  %v1003_v59 = vld [vmem:[%s6643_s6 + $0x20] sm:$0xff] }
 0x117   : > { %v466_v63 = vadd.f32 %v465_v61, %v464_v58 }
 0x118   : > { %4340 = vmatprep.subr.bf16.mxu0 %v4792_v62 }
 0x119   : > { %v468_v1 = vadd.f32 %v467_v0, %v466_v63  ;;  %4342 = vmatpush3.bf16.msra.mxu0 %v4792_v62 }
 0x11b   : > { %v469_v4 = vrot.slane %v468_v1, 4 }
 0x11c   : > { %4162 = vmatmul.mubr.msk.f32.vlgmr.msra.gmra.mrb[4].mxu0 %vm677_vm3, %v646_v2 }
 0x11d   : > { %v470_v5 = vadd.f32 %v469_v4, %v468_v1  ;;  %4164 = vmatprep.mubr.msk.f32.mxu0 %vm677_vm3, %v647_v3  ;;  %v478_v1 = vrot.slane %v286_v57, 1  ;;  %v1006_v3 = vld [vmem:[%s6643_s6 + $0x38] sm:$0xff] }
 0x11f   : > { %v471_v9 = vrot.slane %v470_v5, 2 }
 0x120   : > { %4165 = vmatmul.mubr.msk.f32.gmra.mrb[6].mxu0 %vm677_vm3, %v648_v7 }
 0x121   : > { %v472_v11 = vadd.f32 %v471_v9, %v470_v5  ;;  %4167 = vmatprep.mubr.msk.f32.mxu0 %vm677_vm3, %v649_v8  ;;  %v1005_v5 = vld [vmem:[%s6643_s6 + $0x30] sm:$0xff] }
 0x123   : > { %v473_v14 = vrot.slane %v472_v11, 1 }
 0x124   : > { %4168 = vmatmul.mubr.msk.f32.gmra.mrb[8].mxu0 %vm677_vm3, %v650_v12 }
 0x125   : > { %v474_v21 = vadd.f32 %v473_v14, %v472_v11  ;;  %4170 = vmatprep.mubr.msk.f32.mxu0 %vm677_vm3, %v651_v13 }
 0x127   : > { %v475_v26 = vmul.f32 0.03125, %v474_v21 }
 0x128   : > { %4171 = vmatmul.mubr.msk.f32.gmra.mrb[10].mxu0 %vm677_vm3, %v652_v23  ;;  %v1008_v23 = vld [vmem:[%s6643_s6 + $0x48] sm:$0xff] }
 0x129   : > { %4146 = vmatmul.mubr.msk.f32.vlgmr.msra.gmra.mrb[0].mxu1 %vm292_vm0, %v475_v26  ;;  %4173 = vmatprep.mubr.msk.f32.mxu0 %vm677_vm3, %v653_v24  ;;  %v1007_v24 = vld [vmem:[%s6643_s6 + $0x40] sm:$0xff] }
 0x12a   : > { %4149 = vmatpush3.msk.msra.mxu1 %vm558_vm4, %v4769_v22  ;;  %4150 = vmatprep.mubr.msk.f32.mxu1 %vm4616_vm2, %v4615_v10  ;;  %v657_v22 = vld [vmem:[%s6642_s5 + $0x60] sm:$0xff]  ;;  %v658_v10 = vld [vmem:[%s6642_s5 + $0x68] sm:$0xff] }
 0x12b   : > { %4359 = vmatprep.subr.bf16.mxu1 %v4787_v56 }
 0x12c   : > { %4174 = vmatmul.mubr.msk.f32.gmra.mrb[12].mxu0 %vm677_vm3, %v654_v28  ;;  %v667_v28 = vld [vmem:[%s6642_s5 + $0xb0] sm:$0xff] }
 0x12d   : > { %4176 = vmatprep.mubr.msk.f32.mxu0 %vm677_vm3, %v655_v29 }
 0x130   : > { %4177 = vmatmul.mubr.msk.f32.gmra.mrb[14].mxu0 %vm677_vm3, %v656_v30 }
 0x131   : > { %4179 = vmatprep.mubr.msk.f32.mxu0 %vm677_vm3, %v657_v22 }
 0x134   : > { %4180 = vmatmul.mubr.msk.f32.gmra.mrb[16].mxu0 %vm677_vm3, %v658_v10 }
 0x135   : > { %4182 = vmatprep.mubr.msk.f32.mxu0 %vm677_vm3, %v659_v32 }
 0x138   : > { %4183 = vmatmul.mubr.msk.f32.gmra.mrb[18].mxu0 %vm677_vm3, %v660_v33 }
 0x139   : > { %4185 = vmatprep.mubr.msk.f32.mxu0 %vm677_vm3, %v661_v35  ;;  %v1010_v35 = vld [vmem:[%s6643_s6 + $0x58] sm:$0xff] }
 0x13c   : > { %4186 = vmatmul.mubr.msk.f32.gmra.mrb[20].mxu0 %vm677_vm3, %v662_v36  ;;  %v1009_v36 = vld [vmem:[%s6643_s6 + $0x50] sm:$0xff] }
 0x13d   : > { %4188 = vmatprep.mubr.msk.f32.mxu0 %vm677_vm3, %v663_v37 }
 0x140   : > { %4189 = vmatmul.mubr.msk.f32.gmra.mrb[22].mxu0 %vm677_vm3, %v664_v38 }
 0x141   : > { %4191 = vmatprep.mubr.msk.f32.mxu0 %vm677_vm3, %v665_v39 }
 0x144   : > { %4192 = vmatmul.mubr.msk.f32.gmra.mrb[24].mxu0 %vm677_vm3, %v666_v40 }
 0x1ef   : > { %v4163_v43 = vpop.f32.mrb[4].mxu0 }
 0x1f0   : > { %v1032_v44 = vmul.f32 %v4163_v43, %v1000_v41  ;;  %v840_v45 = vpop.f32.mrb[5].mxu0  ;;  %v668_v43 = vld [vmem:[%s6642_s5 + $0xb8] sm:$0xff] }
 0x1f1   : > { %v1031_v46 = vmul.f32 %v999_v42, %v840_v45  ;;  %v669_v45 = vld [vmem:[%s6642_s5 + $0xc0] sm:$0xff] }
 0x1f2   : > { %v1066_v49 = vsel %vm292_vm0, %v1032_v44, 0.0  ;;  %v1011_v44 = vld [vmem:[%s6643_s6 + $0x60] sm:$0xff] }
 0x1f3   : > { %v4166_v50 = vpop.f32.mrb[6].mxu0  ;;  %1067 = vadd.xlane.f32.xlu0 %v1066_v49  ;;  %v1063_v53 = vsel %vm292_vm0, %v1031_v46, 0.0 }
 0x1f4   : > { %v1034_v51 = vmul.f32 %v4166_v50, %v1002_v47  ;;  %v850_v52 = vpop.f32.mrb[7].mxu0 }
 0x1f5   : > { %v1033_v54 = vmul.f32 %v1001_v48, %v850_v52  ;;  %v670_v52 = vld [vmem:[%s6642_s5 + $0xc8] sm:$0xff] }
 0x1f6   : > { %v1072_v58 = vsel %vm292_vm0, %v1034_v51, 0.0  ;;  %v1014_v51 = vld [vmem:[%s6643_s6 + $0x78] sm:$0xff] }
 0x1f7   : > { %1073 = vadd.xlane.f32.xlu1 %v1072_v58  ;;  %v4169_v60 = vpop.f32.mrb[8].mxu0  ;;  %1064 = vadd.xlane.f32.xlu0 %v1063_v53  ;;  %v1069_v0 = vsel %vm292_vm0, %v1033_v54, 0.0  ;;  %v1013_v53 = vld [vmem:[%s6643_s6 + $0x70] sm:$0xff] }
 0x1f8   : > { %v1036_v61 = vmul.f32 %v4169_v60, %v1004_v55  ;;  %v860_v63 = vpop.f32.mrb[9].mxu0  ;;  %v671_v54 = vld [vmem:[%s6642_s5 + $0xd0] sm:$0xff] }
 0x1f9   : > { %v1035_v2 = vmul.f32 %v1003_v59, %v860_v63  ;;  %v1016_v63 = vld [vmem:[%s6643_s6 + $0x88] sm:$0xff] }
 0x1fa   : > { %v1078_v4 = vsel %vm292_vm0, %v1036_v61, 0.0 }
 0x1fb   : > { %1079 = vadd.xlane.f32.xlu1 %v1078_v4  ;;  %v4172_v7 = vpop.f32.mrb[10].mxu0  ;;  %1070 = vadd.xlane.f32.xlu0 %v1069_v0  ;;  %v1075_v11 = vsel %vm292_vm0, %v1035_v2, 0.0  ;;  %v672_v0 = vld [vmem:[%s6642_s5 + $0xd8] sm:$0xff]  ;;  %v673_v2 = vld [vmem:[%s6642_s5 + $0xe0] sm:$0xff] }
 0x1fc   : > { %v549_v8 = vpop.f32.mrb[0].mxu1  ;;  %v1038_v9 = vmul.f32 %v4172_v7, %v1006_v3  ;;  %v870_v12 = vpop.f32.mrb[11].mxu0 }
 0x1fd   : > { %v550_v13 = vadd.f32 %v549_v8, %v478_v1  ;;  %v4147_v14 = vpop.f32.mrb[1].mxu1  ;;  %v1037_v21 = vmul.f32 %v1005_v5, %v870_v12  ;;  %v1015_v1 = vld [vmem:[%s6643_s6 + $0x80] sm:$0xff]  ;;  %v674_v12 = vld [vmem:[%s6642_s5 + $0xe8] sm:$0xff] }
 0x1fe   : > { %v1084_v10 = vsel %vm292_vm0, %v1038_v9, 0.0  ;;  %v675_v14 = vld [vmem:[%s6642_s5 + $0xf0] sm:$0xff] }
 0x1ff   : > { %v553_v26 = vmax.f32 %v550_v13, 0.0  ;;  %1076 = vadd.xlane.f32.xlu1 %v1075_v11  ;;  %v4175_v29 = vpop.f32.mrb[12].mxu0  ;;  %v1081_v30 = vsel %vm292_vm0, %v1037_v21, 0.0  ;;  %v1018_v11 = vld [vmem:[%s6643_s6 + $0x98] sm:$0xff]  ;;  %v1017_v13 = vld [vmem:[%s6643_s6 + $0x90] sm:$0xff] }
 0x200   : > { %v1040_v22 = vmul.f32 %v4175_v29, %v1008_v23  ;;  %1082 = vadd.xlane.f32.xlu0 %v1081_v30  ;;  %v880_v32 = vpop.f32.mrb[13].mxu0  ;;  %v1020_v30 = vld [vmem:[%s6643_s6 + $0xa8] sm:$0xff] }
 0x201   : > { %4151 = vmatmul.mubr.msk.f32.vlgmr.msra.gmra.mrb[2].mxu1 %vm554_vm5, %v553_v26  ;;  %v1039_v33 = vmul.f32 %v1007_v24, %v880_v32 }
 0x202   : > { %4361 = vmatpush3.bf16.msra.mxu1 %v4787_v56  ;;  %4194 = vmatprep.mubr.msk.f32.mxu1 %vm677_vm3, %v667_v28  ;;  %v1090_v40 = vsel %vm292_vm0, %v1040_v22, 0.0  ;;  %v1012_v56 = vld [vmem:[%s6643_s6 + $0x68] sm:$0xff]  ;;  %v676_v22 = vld [vmem:[%s6642_s5 + $0xf8] sm:$0xff] }
 0x203   : > { %4360 = vmatprep.subr.bf16.mxu1 %v4792_v62  ;;  %1085 = vadd.xlane.f32.xlu1 %v1084_v10  ;;  %v4178_v37 = vpop.f32.mrb[14].mxu0  ;;  %v1087_v38 = vsel %vm292_vm0, %v1039_v33, 0.0  ;;  %v1019_v10 = vld [vmem:[%s6643_s6 + $0xa0] sm:$0xff] }
 0x204   : > { %v1042_v39 = vmul.f32 %v4178_v37, %v1010_v35  ;;  %1088 = vadd.xlane.f32.xlu0 %v1087_v38  ;;  %v890_v41 = vpop.f32.mrb[15].mxu0 }
 0x205   : > { %v1041_v42 = vmul.f32 %v1009_v36, %v890_v41 }
 0x206   : > { %4362 = vmatpush3.bf16.msra.mxu1 %v4792_v62  ;;  %v1096_v49 = vsel %vm292_vm0, %v1042_v39, 0.0 }
 0x207   : > { %1091 = vadd.xlane.f32.xlu1 %v1090_v40  ;;  %v4181_v46 = vpop.f32.mrb[16].mxu0  ;;  %v1093_v47 = vsel %vm292_vm0, %v1041_v42, 0.0 }
 0x208   : > { %v1044_v48 = vmul.f32 %v4181_v46, %v1012_v56  ;;  %1094 = vadd.xlane.f32.xlu0 %v1093_v47  ;;  %v900_v62 = vpop.f32.mrb[17].mxu0  ;;  %v1022_v56 = vld [vmem:[%s6643_s6 + $0xb8] sm:$0xff] }
 0x209   : > { %4195 = vmatmul.mubr.msk.f32.vlgmr.msra.gmra.mrb[4].mxu1 %vm677_vm3, %v668_v43  ;;  %v1043_v50 = vmul.f32 %v1011_v44, %v900_v62  ;;  %v1021_v43 = vld [vmem:[%s6643_s6 + $0xb0] sm:$0xff]  ;;  %v1023_v62 = vld [vmem:[%s6643_s6 + $0xc0] sm:$0xff] }
 0x20a   : > { %4197 = vmatprep.mubr.msk.f32.mxu1 %vm677_vm3, %v669_v45  ;;  %v1102_v59 = vsel %vm292_vm0, %v1044_v48, 0.0  ;;  %v1024_v48 = vld [vmem:[%s6643_s6 + $0xc8] sm:$0xff] }
 0x20b   : > { %1097 = vadd.xlane.f32.xlu1 %v1096_v49  ;;  %v4184_v55 = vpop.f32.mrb[18].mxu0  ;;  %v1099_v57 = vsel %vm292_vm0, %v1043_v50, 0.0 }
 0x20c   : > { %v1046_v58 = vmul.f32 %v4184_v55, %v1014_v51  ;;  %1100 = vadd.xlane.f32.xlu0 %v1099_v57  ;;  %v910_v60 = vpop.f32.mrb[19].mxu0  ;;  %v1026_v55 = vld [vmem:[%s6643_s6 + $0xd8] sm:$0xff] }
 0x20d   : > { %4198 = vmatmul.mubr.msk.f32.gmra.mrb[6].mxu1 %vm677_vm3, %v670_v52  ;;  %v1045_v61 = vmul.f32 %v1013_v53, %v910_v60 }
 0x20e   : > { %4200 = vmatprep.mubr.msk.f32.mxu1 %vm677_vm3, %v671_v54  ;;  %v1108_v7 = vsel %vm292_vm0, %v1046_v58, 0.0  ;;  %v1025_v58 = vld [vmem:[%s6643_s6 + $0xd0] sm:$0xff] }
 0x20f   : > { %1103 = vadd.xlane.f32.xlu1 %v1102_v59  ;;  %v4187_v3 = vpop.f32.mrb[20].mxu0  ;;  %v1105_v4 = vsel %vm292_vm0, %v1045_v61, 0.0 }
 0x210   : > { %v1048_v5 = vmul.f32 %v4187_v3, %v1016_v63  ;;  %1106 = vadd.xlane.f32.xlu0 %v1105_v4  ;;  %v920_v8 = vpop.f32.mrb[21].mxu0  ;;  %v1027_v3 = vld [vmem:[%s6643_s6 + $0xe0] sm:$0xff] }
 0x211   : > { %4201 = vmatmul.mubr.msk.f32.gmra.mrb[8].mxu1 %vm677_vm3, %v672_v0  ;;  %v1047_v9 = vmul.f32 %v1015_v1, %v920_v8  ;;  %v1028_v1 = vld [vmem:[%s6643_s6 + $0xe8] sm:$0xff] }
 0x212   : > { %4203 = vmatprep.mubr.msk.f32.mxu1 %vm677_vm3, %v673_v2  ;;  %v1114_v26 = vsel %vm292_vm0, %v1048_v5, 0.0 }
 0x213   : > { %1109 = vadd.xlane.f32.xlu1 %v1108_v7  ;;  %v4190_v21 = vpop.f32.mrb[22].mxu0  ;;  %v1111_v23 = vsel %vm292_vm0, %v1047_v9, 0.0 }
 0x214   : > { %v1050_v24 = vmul.f32 %v4190_v21, %v1018_v11  ;;  %1112 = vadd.xlane.f32.xlu0 %v1111_v23  ;;  %v930_v28 = vpop.f32.mrb[23].mxu0  ;;  %v1030_v11 = vld [vmem:[%s6643_s6 + $0xf8] sm:$0xff] }
 0x215   : > { %4204 = vmatmul.mubr.msk.f32.gmra.mrb[10].mxu1 %vm677_vm3, %v674_v12  ;;  %v1049_v29 = vmul.f32 %v1017_v13, %v930_v28  ;;  %v1029_v13 = vld [vmem:[%s6643_s6 + $0xf0] sm:$0xff] }
 0x216   : > { %4206 = vmatprep.mubr.msk.f32.mxu1 %vm677_vm3, %v675_v14  ;;  %v1120_v36 = vsel %vm292_vm0, %v1050_v24, 0.0 }
 0x217   : > { %1115 = vadd.xlane.f32.xlu1 %v1114_v26  ;;  %v4193_v32 = vpop.f32.mrb[24].mxu0  ;;  %v1117_v33 = vsel %vm292_vm0, %v1049_v29, 0.0 }
 0x218   : > { %v1052_v35 = vmul.f32 %v4193_v32, %v1020_v30  ;;  %1118 = vadd.xlane.f32.xlu0 %v1117_v33  ;;  %v940_v37 = vpop.f32.mrb[25].mxu0  ;;  %v1255_v30 = vld [vmem:[%s6642_s5 + $0x200] sm:$0xff] }
 0x219   : > { %4207 = vmatmul.mubr.msk.f32.gmra.mrb[12].mxu1 %vm677_vm3, %v676_v22  ;;  %v1051_v38 = vmul.f32 %v1019_v10, %v940_v37  ;;  %v6648_v37 = vmov 5  }
 0x21a   : > { %v1126_v40 = vsel %vm292_vm0, %v1052_v35, 0.0  ;;  %4217 = vmatprep.mubr.msk.f32.mxu1 %vm677_vm3, %v1255_v30  ;;  %4417 = vset.pattern.permute.xlu1 %v6648_v37 }
 0x21b   : > { %1121 = vadd.xlane.f32.xlu1 %v1120_v36  ;;  %v1123_v39 = vsel %vm292_vm0, %v1051_v38, 0.0  ;;  %v288_v38 = vld [vmem:[%s6641_s4 + $0x8] sm:$0xff]  ;;  %4416 = vset.pattern.permute.xlu0 %v6648_v37 }
 0x21c   : > { %1124 = vadd.xlane.f32.xlu0 %v1123_v39 }
 0x21f   : > { %1127 = vadd.xlane.f32.xlu1 %v1126_v40 }
 0x280   : > { %v1068_v10 = vpop.xlane.xlu0 %1067 }
 0x284   : > { %v5066_v22 = vpop.xlane.xlu1 %1073  ;;  %v1065_v33 = vpop.xlane.xlu0 %1064 }
 0x288   : > { %v1080_v32 = vpop.xlane.xlu1 %1079  ;;  %v5068_v36 = vpop.xlane.xlu0 %1070 }
 0x28c   : > { %v1077_v35 = vpop.xlane.xlu1 %1076 }
 0x28d   : > { %v1083_v40 = vpop.xlane.xlu0 %1082 }
 0x290   : > { %v1086_v39 = vpop.xlane.xlu1 %1085 }
 0x2d4   : > { %v5020_v41 = vpop.f32.mrb[2].mxu1 }
 0x2d5   : > { %6729 = vst [vmem:[#allocation15_spill] sm:$0xff] %v5020_v41  ;;  %v4152_v42 = vpop.f32.mrb[3].mxu1 }
 0x2d6   : > { %v5078_v42 = vld [vmem:[%s6641_s4 + $0x10] sm:$0xff] }
 0x2dc   : > { %v4196_v44 = vpop.f32.mrb[4].mxu1 }
 0x2dd   : > { %v1054_v45 = vmul.f32 %v4196_v44, %v1022_v56  ;;  %v950_v46 = vpop.f32.mrb[5].mxu1  ;;  %v1092_v56 = vpop.xlane.xlu1 %1091  ;;  %v5084_v44 = vld [vmem:[%s6641_s4 + $0x18] sm:$0xff] }
 0x2de   : > { %v1053_v47 = vmul.f32 %v1021_v43, %v950_v46  ;;  %v1089_v43 = vpop.xlane.xlu0 %1088  ;;  %v6656_v46 = vmov 0  }
 0x2df   : > { %v1132_v49 = vsel %vm292_vm0, %v1054_v45, 0.0 }
 0x2e0   : > { %1133 = vadd.xlane.f32.xlu1 %v1132_v49  ;;  %v4199_v50 = vpop.f32.mrb[6].mxu1  ;;  %v1129_v51 = vsel %vm292_vm0, %v1053_v47, 0.0 }
 0x2e1   : > { %v1056_v52 = vmul.f32 %v4199_v50, %v1024_v48  ;;  %1130 = vadd.xlane.f32.xlu0 %v1129_v51  ;;  %v960_v53 = vpop.f32.mrb[7].mxu1  ;;  %v1098_v45 = vpop.xlane.xlu1 %1097  ;;  %v5091_v48 = vld [vmem:[%s6641_s4] sm:$0xff]  ;;  %v6652_v50 = vmov 2   ;;  %v6654_v51 = vmov 1  }
 0x2e2   : > { %v1055_v54 = vmul.f32 %v1023_v62, %v960_v53  ;;  %v1095_v47 = vpop.xlane.xlu0 %1094 }
 0x2e3   : > { %v1138_v57 = vsel %vm292_vm0, %v1056_v52, 0.0 }
 0x2e4   : > { %1139 = vadd.xlane.f32.xlu1 %v1138_v57  ;;  %v4202_v59 = vpop.f32.mrb[8].mxu1  ;;  %v1135_v60 = vsel %vm292_vm0, %v1055_v54, 0.0  ;;  %v6650_v54 = vmov 3   ;;  %v6647_v57 = vsub.s32 0, %v4729_v6 }
 0x2e5   : > { %v1058_v61 = vmul.f32 %v4202_v59, %v1026_v55  ;;  %1136 = vadd.xlane.f32.xlu0 %v1135_v60  ;;  %v970_v63 = vpop.f32.mrb[9].mxu1  ;;  %v1104_v49 = vpop.xlane.xlu1 %1103 }
 0x2e6   : > { %v1057_v0 = vmul.f32 %v1025_v58, %v970_v63  ;;  %v1101_v62 = vpop.xlane.xlu0 %1100  ;;  %v5106_v59 = vrot.slane %v4742_v15, %v6647_v57  ;;  %v1176_v63 = vmul.f32 %v4748_v16, %v1080_v32 }
 0x2e7   : > { %v1144_v2 = vsel %vm292_vm0, %v1058_v61, 0.0 }
 0x2e8   : > { %1145 = vadd.xlane.f32.xlu1 %v1144_v2  ;;  %v4205_v4 = vpop.f32.mrb[10].mxu1  ;;  %v1141_v5 = vsel %vm292_vm0, %v1057_v0, 0.0  ;;  %6730 = vst [vmem:[#allocation16_spill] sm:$0xff] %v5106_v59  ;;  %v1164_v61 = vmul.f32 %v5106_v59, %v1068_v10  ;;  %v1175_v2 = vmul.f32 %v4748_v16, %v1077_v35 }
 0x2e9   : > { %v1060_v7 = vmul.f32 %v4205_v4, %v1028_v1  ;;  %1142 = vadd.xlane.f32.xlu0 %v1141_v5  ;;  %v980_v8 = vpop.f32.mrb[11].mxu1  ;;  %v1110_v52 = vpop.xlane.xlu1 %1109  ;;  %v1163_v1 = vmul.f32 %v5106_v59, %v1065_v33  ;;  %v1188_v4 = vmul.f32 %v4751_v17, %v1092_v56  ;;  %v1189_v33 = vmul.f32 %v4751_v17, %v1095_v47 }
 0x2ea   : > { %v1059_v9 = vmul.f32 %v1027_v3, %v980_v8  ;;  %v1107_v53 = vpop.xlane.xlu0 %1106  ;;  %v1180_v3 = vadd.f32 %v1176_v63, %v1164_v61 }
 0x2eb   : > { %v1150_v12 = vsel %vm292_vm0, %v1060_v7, 0.0  ;;  %v1179_v5 = vadd.f32 %v1175_v2, %v1163_v1  ;;  %v1187_v7 = vmul.f32 %v4751_v17, %v1089_v43  ;;  %v6645_v43 = vsub.s32 7, %v4729_v6 }
 0x2ec   : > { %1151 = vadd.xlane.f32.xlu1 %v1150_v12  ;;  %v4208_v14 = vpop.f32.mrb[12].mxu1  ;;  %v1147_v21 = vsel %vm292_vm0, %v1059_v9, 0.0  ;;  %v1166_v9 = vmul.f32 %v5106_v59, %v5066_v22  ;;  %v1190_v22 = vmul.f32 %v4751_v17, %v1098_v45 }
 0x2ed   : > { %v1062_v23 = vmul.f32 %v4208_v14, %v1030_v11  ;;  %1148 = vadd.xlane.f32.xlu0 %v1147_v21  ;;  %v990_v24 = vpop.f32.mrb[13].mxu1  ;;  %v1116_v55 = vpop.xlane.xlu1 %1115  ;;  %v1178_v11 = vmul.f32 %v4748_v16, %v1086_v39  ;;  %v1177_v14 = vmul.f32 %v4748_v16, %v1083_v40  ;;  %v1192_v21 = vadd.f32 %v1188_v4, %v1180_v3 }
 0x2ee   : > { %v1061_v26 = vmul.f32 %v1029_v13, %v990_v24  ;;  %v1113_v58 = vpop.xlane.xlu0 %1112  ;;  %v1165_v13 = vmul.f32 %v5106_v59, %v5068_v36  ;;  %v1191_v24 = vadd.f32 %v1187_v7, %v1179_v5  ;;  %v1212_v36 = vmul.f32 %v4757_v19, %v1116_v55 }
 0x2ef   : > { %v1156_v28 = vsel %vm292_vm0, %v1062_v23, 0.0  ;;  %v1200_v23 = vmul.f32 %v4754_v18, %v1104_v49  ;;  %v1182_v30 = vadd.f32 %v1178_v11, %v1166_v9  ;;  %v1211_v39 = vmul.f32 %v4757_v19, %v1113_v58 }
 0x2f0   : > { %1157 = vadd.xlane.f32.xlu1 %v1156_v28  ;;  %v1153_v29 = vsel %vm292_vm0, %v1061_v26, 0.0  ;;  %v1199_v26 = vmul.f32 %v4754_v18, %v1101_v62  ;;  %v1181_v32 = vadd.f32 %v1177_v14, %v1165_v13  ;;  %v1202_v49 = vmul.f32 %v4754_v18, %v1110_v52 }
 0x2f1   : > { %1154 = vadd.xlane.f32.xlu0 %v1153_v29  ;;  %v1122_v60 = vpop.xlane.xlu1 %1121  ;;  %v6646_v29 = vsub.s32 6, %v4729_v6  ;;  %v1204_v35 = vadd.f32 %v1200_v23, %v1192_v21  ;;  %v1194_v45 = vadd.f32 %v1190_v22, %v1182_v30  ;;  %v1201_v55 = vmul.f32 %v4754_v18, %v1107_v53 }
 0x2f2   : > { %v1119_v0 = vpop.xlane.xlu0 %1118  ;;  %v1193_v47 = vadd.f32 %v1189_v33, %v1181_v32  ;;  %v5150_v3 = vrot.slane %v4742_v15, %v6645_v43  ;;  %v1214_v4 = vmul.f32 %v4757_v19, %v1122_v60 }
 0x2f3   : > { %v5138_v56 = vrot.slane %v4742_v15, %v6646_v29  ;;  %v1216_v58 = vadd.f32 %v1212_v36, %v1204_v35  ;;  %v1206_v52 = vadd.f32 %v1202_v49, %v1194_v45 }
 0x2f4   : > { %6732 = vst [vmem:[#allocation18_spill] sm:$0xff] %v5150_v3  ;;  %v1205_v7 = vadd.f32 %v1201_v55, %v1193_v47  ;;  %v1256_v55 = vld [vmem:[%s6642_s5 + $0x208] sm:$0xff] }
 0x2f5   : > { %v1128_v8 = vpop.xlane.xlu1 %1127  ;;  %6731 = vst [vmem:[#allocation17_spill] sm:$0xff] %v5138_v56  ;;  %v1218_v60 = vadd.f32 %v1214_v4, %v1206_v52  ;;  %v1263_v52 = vld [vmem:[%s6642_s5 + $0x240] sm:$0xff]  ;;  %v1264_v4 = vld [vmem:[%s6642_s5 + $0x248] sm:$0xff] }
 0x2f6   : > { %v1125_v12 = vpop.xlane.xlu0 %1124  ;;  %v1224_v61 = vmul.f32 %v4760_v20, %v1128_v8 }
 0x2f7   : > { %v1223_v1 = vmul.f32 %v4760_v20, %v1125_v12 }
 0x2f8   : > { %v1228_v9 = vadd.f32 %v1224_v61, %v1216_v58  ;;  %v1257_v58 = vld [vmem:[%s6642_s5 + $0x210] sm:$0xff]  ;;  %v1259_v61 = vld [vmem:[%s6642_s5 + $0x220] sm:$0xff] }
 0x301   : > { %1651 = vperm.xlu1 %4417, %v288_v38  }
 0x305   : > { %1656 = vperm.xlu1 %4417, %v5078_v42  }
 0x307   : > { %1646 = vperm.xlu0 %4416, %v5091_v48  }
 0x309   : > { %1661 = vperm.xlu1 %4417, %v5084_v44  }
 0x30b   : > { %4421 = vset.pattern.permute.xlu0 %v6652_v50 }
 0x30c   : > { %1793 = vperm.xlu0 %4421, %v288_v38  }
 0x30d   : > { %4418 = vset.pattern.permute.xlu1 %v6656_v46 }
 0x30e   : > { %1725 = vperm.xlu1 %4418, %v5091_v48  }
 0x310   : > { %4423 = vset.pattern.permute.xlu0 %v6654_v51 }
 0x311   : > { %1765 = vperm.xlu0 %4423, %v5078_v42  }
 0x312   : > { %1729 = vperm.xlu1 %4418, %v288_v38  }
 0x315   : > { %4426 = vset.pattern.permute.xlu0 %v6650_v54 }
 0x316   : > { %4419 = vset.pattern.permute.xlu1 %v6654_v51  ;;  %1825 = vperm.xlu0 %4426, %v288_v38  }
 0x317   : > { %1757 = vperm.xlu1 %4419, %v5091_v48  }
 0x31a   : > { %1829 = vperm.xlu0 %4426, %v5078_v42  }
 0x31b   : > { %1761 = vperm.xlu1 %4419, %v288_v38   ;;  %v1203_v38 = vadd.f32 %v1199_v26, %v1191_v24 }
 0x31d   : > { %v1215_v63 = vadd.f32 %v1211_v39, %v1203_v38 }
 0x31e   : > { %4431 = vset.pattern.permute.xlu0 %v6656_v46 }
 0x31f   : > { %4420 = vset.pattern.permute.xlu1 %v6652_v50  ;;  %v1227_v15 = vadd.f32 %v1223_v1, %v1215_v63  ;;  %v1260_v63 = vld [vmem:[%s6642_s5 + $0x228] sm:$0xff]  ;;  %v1261_v1 = vld [vmem:[%s6642_s5 + $0x230] sm:$0xff] }
 0x320   : > { %1789 = vperm.xlu1 %4420, %v5091_v48  }
 0x324   : > { %4422 = vset.pattern.permute.xlu1 %v6656_v46 }
 0x325   : > { %1733 = vperm.xlu1 %4422, %v5078_v42  }
 0x329   : > { %1737 = vperm.xlu1 %4422, %v5084_v44  }
 0x32d   : > { %4424 = vset.pattern.permute.xlu1 %v6654_v51 }
 0x32e   : > { %1769 = vperm.xlu1 %4424, %v5084_v44  }
 0x332   : > { %4425 = vset.pattern.permute.xlu1 %v6650_v54 }
 0x333   : > { %1821 = vperm.xlu1 %4425, %v5091_v48   ;;  %v1213_v48 = vmul.f32 %v4757_v19, %v1119_v0 }
 0x335   : > { %v1217_v24 = vadd.f32 %v1213_v48, %v1205_v7  ;;  %v1267_v7 = vld [vmem:[%s6642_s5 + $0x260] sm:$0xff]  ;;  %v1268_v48 = vld [vmem:[%s6642_s5 + $0x268] sm:$0xff] }
 0x337   : > { %4427 = vset.pattern.permute.xlu1 %v6652_v50 }
 0x338   : > { %1797 = vperm.xlu1 %4427, %v5078_v42  }
 0x33c   : > { %1801 = vperm.xlu1 %4427, %v5084_v44  }
 0x340   : > { %4428 = vset.pattern.permute.xlu1 %v6650_v54 }
 0x341   : > { %1833 = vperm.xlu1 %4428, %v5084_v44   ;;  %v1258_v44 = vld [vmem:[%s6642_s5 + $0x218] sm:$0xff] }
 0x36d   : > { %v1134_v28 = vpop.xlane.xlu1 %1133 }
 0x36e   : > { %v1131_v10 = vpop.xlane.xlu0 %1130  ;;  %v1226_v11 = vmul.f32 %v4760_v20, %v1134_v28 }
 0x36f   : > { %v1225_v12 = vmul.f32 %v4760_v20, %v1131_v10 }
 0x370   : > { %v1230_v28 = vadd.f32 %v1226_v11, %v1218_v60  ;;  %v1271_v11 = vld [vmem:[%s6642_s5 + $0x280] sm:$0xff] }
 0x371   : > { %v1140_v40 = vpop.xlane.xlu1 %1139  ;;  %v1229_v42 = vadd.f32 %v1225_v12, %v1217_v24  ;;  %v1273_v12 = vld [vmem:[%s6642_s5 + $0x290] sm:$0xff]  ;;  %v1275_v60 = vld [vmem:[%s6642_s5 + $0x2a0] sm:$0xff]  ;;  %v1280_v24 = vld [vmem:[%s6642_s5 + $0x2c8] sm:$0xff] }
 0x372   : > { %v1137_v62 = vpop.xlane.xlu0 %1136  ;;  %v1236_v5 = vmul.f32 %v5138_v56, %v1140_v40 }
 0x373   : > { %v1235_v8 = vmul.f32 %v5138_v56, %v1137_v62 }
 0x374   : > { %v1240_v14 = vadd.f32 %v1236_v5, %v1228_v9  ;;  %v1265_v5 = vld [vmem:[%s6642_s5 + $0x250] sm:$0xff]  ;;  %v1270_v9 = vld [vmem:[%s6642_s5 + $0x278] sm:$0xff] }
 0x375   : > { %v1146_v2 = vpop.xlane.xlu1 %1145  ;;  %v1239_v26 = vadd.f32 %v1235_v8, %v1227_v15  ;;  %v1269_v8 = vld [vmem:[%s6642_s5 + $0x270] sm:$0xff]  ;;  %v1272_v15 = vld [vmem:[%s6642_s5 + $0x288] sm:$0xff] }
 0x376   : > { %v1143_v53 = vpop.xlane.xlu0 %1142  ;;  %v1238_v21 = vmul.f32 %v5138_v56, %v1146_v2  ;;  %v1262_v2 = vld [vmem:[%s6642_s5 + $0x238] sm:$0xff] }
 0x377   : > { %v1237_v30 = vmul.f32 %v5138_v56, %v1143_v53  ;;  %v1266_v53 = vld [vmem:[%s6642_s5 + $0x258] sm:$0xff] }
 0x378   : > { %v1242_v35 = vadd.f32 %v1238_v21, %v1230_v28  ;;  %v1277_v21 = vld [vmem:[%s6642_s5 + $0x2b0] sm:$0xff]  ;;  %v1284_v28 = vld [vmem:[%s6642_s5 + $0x2e8] sm:$0xff] }
 0x379   : > { %v1152_v13 = vpop.xlane.xlu1 %1151  ;;  %v1241_v39 = vadd.f32 %v1237_v30, %v1229_v42  ;;  %v1282_v30 = vld [vmem:[%s6642_s5 + $0x2d8] sm:$0xff]  ;;  %v1285_v42 = vld [vmem:[%s6642_s5 + $0x2f0] sm:$0xff] }
 0x37a   : > { %v1248_v23 = vmul.f32 %v5150_v3, %v1152_v13  ;;  %v1149_v0 = vpop.xlane.xlu0 %1148  ;;  %v1274_v13 = vld [vmem:[%s6642_s5 + $0x298] sm:$0xff] }
 0x37b   : > { %v1247_v22 = vmul.f32 %v5150_v3, %v1149_v0  ;;  %v1279_v0 = vld [vmem:[%s6642_s5 + $0x2c0] sm:$0xff] }
 0x37c   : > { %v5164_v32 = vadd.f32 %v1248_v23, %v1240_v14  ;;  %v1276_v14 = vld [vmem:[%s6642_s5 + $0x2a8] sm:$0xff]  ;;  %v1278_v23 = vld [vmem:[%s6642_s5 + $0x2b8] sm:$0xff] }
 0x37d   : > { %v5167_v10 = vadd.f32 %v1247_v22, %v1239_v26  ;;  %v1158_v33 = vpop.xlane.xlu1 %1157  ;;  %v1281_v26 = vld [vmem:[%s6642_s5 + $0x2d0] sm:$0xff]  ;;  %v1283_v22 = vld [vmem:[%s6642_s5 + $0x2e0] sm:$0xff] }
 0x37e   : > { %6733 = vst [vmem:[#allocation19_spill] sm:$0xff] %v5164_v32  ;;  %v1250_v36 = vmul.f32 %v5150_v3, %v1158_v33  ;;  %v1155_v38 = vpop.xlane.xlu0 %1154  ;;  %v1286_v33 = vld [vmem:[%s6642_s5 + $0x2f8] sm:$0xff] }
 0x37f   : > { %6734 = vst [vmem:[#allocation20_spill] sm:$0xff] %v5167_v10  ;;  %v1249_v40 = vmul.f32 %v5150_v3, %v1155_v38  ;;  %v4343_v45 = vpack.c.bf16 %v5164_v32, %v5167_v10  ;;  %v1289_v38 = vld [vmem:[%s6642_s5 + $0x310] sm:$0xff] }
 0x380   : > { %v5173_v49 = vadd.f32 %v1250_v36, %v1242_v35  ;;  %v1287_v35 = vld [vmem:[%s6642_s5 + $0x300] sm:$0xff]  ;;  %v1288_v36 = vld [vmem:[%s6642_s5 + $0x308] sm:$0xff] }
 0x381   : > { %v5176_v62 = vadd.f32 %v1249_v40, %v1241_v39  ;;  %4344 = vmatprep.subr.bf16.mxu1 %v4343_v45  ;;  %v1290_v39 = vld [vmem:[%s6642_s5 + $0x318] sm:$0xff]  ;;  %v1652_v40 = vpop.permute.xlu1 %1651 }
 0x382   : > { %6735 = vst [vmem:[#allocation21_spill] sm:$0xff] %v5173_v49  ;;  %4346 = vmatpush3.bf16.msra.mxu1 %v4343_v45 }
 0x383   : > { %6736 = vst [vmem:[#allocation22_spill] sm:$0xff] %v5176_v62  ;;  %v4347_v47 = vpack.c.bf16 %v5173_v49, %v5176_v62 }
 0x385   : > { %4348 = vmatprep.subr.bf16.mxu1 %v4347_v47  ;;  %v1657_v45 = vpop.permute.xlu1 %1656 }
 0x386   : > { %4350 = vmatpush3.bf16.msra.mxu1 %v4347_v47 }
 0x389   : > { %4218 = vmatmul.mubr.msk.f32.vlgmr.msra.gmra.mrb[14].mxu1 %vm677_vm3, %v1256_v55  ;;  %v1662_v47 = vpop.permute.xlu1 %1661 }
 0x38a   : > { %4220 = vmatprep.mubr.msk.f32.mxu1 %vm677_vm3, %v1257_v58 }
 0x38d   : > { %4221 = vmatmul.mubr.msk.f32.gmra.mrb[16].mxu1 %vm677_vm3, %v1258_v44  ;;  %v5321_v55 = vpop.permute.xlu1 %1725 }
 0x38e   : > { %4223 = vmatprep.mubr.msk.f32.mxu1 %vm677_vm3, %v1259_v61 }
 0x391   : > { %4224 = vmatmul.mubr.msk.f32.gmra.mrb[18].mxu1 %vm677_vm3, %v1260_v63  ;;  %v5323_v58 = vpop.permute.xlu1 %1729  ;;  %v1647_v63 = vpop.permute.xlu0 %1646 }
 0x392   : > { %4226 = vmatprep.mubr.msk.f32.mxu1 %vm677_vm3, %v1261_v1 }
 0x395   : > { %4227 = vmatmul.mubr.msk.f32.gmra.mrb[20].mxu1 %vm677_vm3, %v1262_v2 }
 0x396   : > { %4229 = vmatprep.mubr.msk.f32.mxu1 %vm677_vm3, %v1263_v52  ;;  %v5325_v44 = vpop.permute.xlu1 %1757 }
 0x399   : > { %4230 = vmatmul.mubr.msk.f32.gmra.mrb[22].mxu1 %vm677_vm3, %v1264_v4 }
 0x39a   : > { %4232 = vmatprep.mubr.msk.f32.mxu1 %vm677_vm3, %v1265_v5  ;;  %v5327_v61 = vpop.permute.xlu1 %1761 }
 0x39d   : > { %4233 = vmatmul.mubr.msk.f32.gmra.mrb[24].mxu1 %vm677_vm3, %v1266_v53 }
 0x39e   : > { %4235 = vmatprep.mubr.msk.f32.mxu1 %vm677_vm3, %v1267_v7 }
 0x39f   : > { %v5334_v53 = vpop.permute.xlu1 %1789 }
 0x3a1   : > { %4236 = vmatmul.mubr.msk.f32.gmra.mrb[26].mxu1 %vm677_vm3, %v1268_v48 }
 0x3a2   : > { %4238 = vmatprep.mubr.msk.f32.mxu1 %vm677_vm3, %v1269_v8 }
 0x3a5   : > { %4239 = vmatmul.mubr.msk.f32.gmra.mrb[28].mxu1 %vm677_vm3, %v1270_v9 }
 0x3a6   : > { %4241 = vmatprep.mubr.msk.f32.mxu1 %vm677_vm3, %v1271_v11 }
 0x3a9   : > { %4242 = vmatmul.mubr.msk.f32.gmra.mrb[30].mxu1 %vm677_vm3, %v1272_v15 }
 0x3aa   : > { %4244 = vmatprep.mubr.msk.f32.mxu1 %vm677_vm3, %v1273_v12 }
 0x3ad   : > { %4245 = vmatmul.mubr.msk.f32.gmra.mrb[32].mxu1 %vm677_vm3, %v1274_v13 }
 0x3ae   : > { %4247 = vmatprep.mubr.msk.f32.mxu1 %vm677_vm3, %v1275_v60  ;;  %v5345_v60 = vpop.permute.xlu1 %1733 }
 0x3b1   : > { %4248 = vmatmul.mubr.msk.f32.gmra.mrb[34].mxu1 %vm677_vm3, %v1276_v14 }
 0x3b2   : > { %4250 = vmatprep.mubr.msk.f32.mxu1 %vm677_vm3, %v1277_v21 }
 0x3b5   : > { %4251 = vmatmul.mubr.msk.f32.gmra.mrb[36].mxu1 %vm677_vm3, %v1278_v23 }
 0x3b6   : > { %4253 = vmatprep.mubr.msk.f32.mxu1 %vm677_vm3, %v1279_v0 }
 0x3b9   : > { %4254 = vmatmul.mubr.msk.f32.gmra.mrb[38].mxu1 %vm677_vm3, %v1280_v24  ;;  %v5353_v24 = vpop.permute.xlu1 %1737 }
 0x3ba   : > { %4256 = vmatprep.mubr.msk.f32.mxu1 %vm677_vm3, %v1281_v26 }
 0x3bd   : > { %4257 = vmatmul.mubr.msk.f32.gmra.mrb[40].mxu1 %vm677_vm3, %v1282_v30 }
 0x3be   : > { %4259 = vmatprep.mubr.msk.f32.mxu1 %vm677_vm3, %v1283_v22 }
 0x3c1   : > { %4260 = vmatmul.mubr.msk.f32.gmra.mrb[42].mxu1 %vm677_vm3, %v1284_v28 }
 0x3c2   : > { %4262 = vmatprep.mubr.msk.f32.mxu1 %vm677_vm3, %v1285_v42 }
 0x3c5   : > { %4263 = vmatmul.mubr.msk.f32.gmra.mrb[44].mxu1 %vm677_vm3, %v1286_v33 }
 0x3c6   : > { %4265 = vmatprep.mubr.msk.f32.mxu1 %vm677_vm3, %v1287_v35 }
 0x3c9   : > { %4266 = vmatmul.mubr.msk.f32.gmra.mrb[46].mxu1 %vm677_vm3, %v1288_v36 }
 0x3ca   : > { %4268 = vmatprep.mubr.msk.f32.mxu1 %vm677_vm3, %v1289_v38 }
 0x3cd   : > { %4269 = vmatmul.mubr.msk.f32.gmra.mrb[48].mxu1 %vm677_vm3, %v1290_v39 }
 0x45c   : > { %v4219_v1 = vpop.f32.mrb[14].mxu1 }
 0x45d   : > { %v5329_v2 = vadd.f32 %v4219_v1, %v1652_v40  ;;  %v1465_v52 = vpop.f32.mrb[15].mxu1 }
 0x45e   : > { %v5331_v4 = vadd.f32 %v1647_v63, %v1465_v52 }
 0x45f   : > { %v1674_v5 = vmul.f32 1.442695, %v5329_v2  ;;  %vm1669_vm6 = vcmp.gt.f32.partialorder %v5329_v2, 20.0 }
 0x460   : > { %v1672_v7 = vmul.f32 1.442695, %v5331_v4  ;;  %v4222_v48 = vpop.f32.mrb[16].mxu1  ;;  %vm1668_vm7 = vcmp.gt.f32.partialorder %v5331_v4, 20.0 }
 0x461   : > { %4469 = vpow2.f32 %v1674_v5  ;;  %v5337_v8 = vadd.f32 %v4222_v48, %v1662_v47  ;;  %v1475_v9 = vpop.f32.mrb[17].mxu1 }
 0x462   : > { %4471 = vpow2.f32 %v1672_v7  ;;  %v5339_v11 = vadd.f32 %v1657_v45, %v1475_v9  ;;  %v5361_v45 = vpop.permute.xlu1 %1769 }
 0x463   : > { %v1678_v15 = vmul.f32 1.442695, %v5337_v8  ;;  %vm1671_vm8 = vcmp.gt.f32.partialorder %v5337_v8, 20.0 }
 0x464   : > { %v1676_v12 = vmul.f32 1.442695, %v5339_v11  ;;  %v5343_v13 = vpop.f32.mrb[18].mxu1  ;;  %vm1670_vm10 = vcmp.gt.f32.partialorder %v5339_v11, 20.0 }
 0x465   : > { %4473 = vpow2.f32 %v1678_v15  ;;  %v5347_v14 = vpop.f32.mrb[19].mxu1 }
 0x466   : > { %4475 = vpow2.f32 %v1676_v12  ;;  %v1822_v43 = vpop.permute.xlu1 %1821 }
 0x468   : > { %v5349_v21 = vpop.f32.mrb[20].mxu1 }
 0x469   : > { %v5351_v23 = vpop.f32.mrb[21].mxu1 }
 0x46a   : > { %v1798_v31 = vpop.permute.xlu1 %1797 }
 0x46b   : > { %v4470_v0 = vpop.eup %4469 }
 0x46c   : > { %v4472_v26 = vpop.eup %4471  ;;  %v1689_v30 = vadd.f32 1.0, %v4470_v0  ;;  %v5355_v22 = vpop.f32.mrb[22].mxu1  ;;  %v1692_v39 = vmul.f32 -0.5, %v4470_v0  ;;  %v1695_v9 = vand.u32 2147483647, %v4470_v0 }
 0x46d   : > { %v1680_v28 = vadd.f32 1.0, %v4472_v26  ;;  %v5357_v42 = vpop.f32.mrb[23].mxu1  ;;  %v1683_v63 = vmul.f32 -0.5, %v4472_v26  ;;  %v1686_v12 = vand.u32 2147483647, %v4472_v26 }
 0x46e   : > { %4477 = vlog2.f32 %v1689_v30  ;;  %v1693_v7 = vadd.f32 1.0, %v1692_v39  ;;  %vm1696_vm9 = vcmp.lt.f32.partialorder %v1695_v9, 0.0004427343 }
 0x46f   : > { %v4474_v33 = vpop.eup %4473  ;;  %4479 = vlog2.f32 %v1680_v28  ;;  %v1684_v15 = vadd.f32 1.0, %v1683_v63  ;;  %vm1687_vm11 = vcmp.lt.f32.partialorder %v1686_v12, 0.0004427343 }
 0x470   : > { %v4476_v35 = vpop.eup %4475  ;;  %v1707_v36 = vadd.f32 1.0, %v4474_v33  ;;  %v5359_v38 = vpop.f32.mrb[24].mxu1  ;;  %v1710_v1 = vmul.f32 -0.5, %v4474_v33  ;;  %v1713_v30 = vand.u32 2147483647, %v4474_v33  ;;  %v1694_v39 = vmul.f32 %v4470_v0, %v1693_v7 }
 0x471   : > { %v1698_v40 = vadd.f32 1.0, %v4476_v35  ;;  %v5363_v47 = vpop.f32.mrb[25].mxu1  ;;  %v1701_v52 = vmul.f32 -0.5, %v4476_v35  ;;  %v1704_v28 = vand.u32 2147483647, %v4476_v35  ;;  %v1685_v46 = vmul.f32 %v4472_v26, %v1684_v15 }
 0x472   : > { %4481 = vlog2.f32 %v1707_v36  ;;  %v1711_v57 = vadd.f32 1.0, %v1710_v1  ;;  %v5370_v36 = vpop.permute.xlu0 %1793  ;;  %vm5379_vm12 = vcmp.lt.f32.partialorder %v1713_v30, 0.0004427343 }
 0x473   : > { %4483 = vlog2.f32 %v1698_v40  ;;  %v1702_v37 = vadd.f32 1.0, %v1701_v52  ;;  %vm5383_vm13 = vcmp.lt.f32.partialorder %v1704_v28, 0.0004427343 }
 0x474   : > { %v5365_v5 = vpop.f32.mrb[26].mxu1  ;;  %v1712_v26 = vmul.f32 %v4474_v33, %v1711_v57 }
 0x475   : > { %v5367_v48 = vpop.f32.mrb[27].mxu1  ;;  %v1703_v9 = vmul.f32 %v4476_v35, %v1702_v37 }
 0x476   : > { %v1766_v33 = vpop.permute.xlu0 %1765 }
 0x478   : > { %v4478_v29 = vpop.eup %4477  ;;  %v5372_v40 = vpop.f32.mrb[28].mxu1 }
 0x479   : > { %v4480_v54 = vpop.eup %4479  ;;  %v1691_v50 = vmul.f32 0.6931472, %v4478_v29  ;;  %v5376_v63 = vpop.f32.mrb[29].mxu1 }
 0x47a   : > { %v1682_v51 = vmul.f32 0.6931472, %v4480_v54 }
 0x47b   : > { %v1697_v1 = vsel %vm1696_vm9, %v1694_v39, %v1691_v50 }
 0x47c   : > { %v4482_v0 = vpop.eup %4481  ;;  %v5390_v7 = vsel %vm1669_vm6, %v5329_v2, %v1697_v1  ;;  %v1688_v54 = vsel %vm1687_vm11, %v1685_v46, %v1682_v51  ;;  %v5392_v15 = vpop.f32.mrb[30].mxu1 }
 0x47d   : > { %v4484_v50 = vpop.eup %4483  ;;  %v1741_v12 = vmul.f32 %v5323_v58, %v5390_v7  ;;  %v1716_v30 = vsel %vm1668_vm7, %v5331_v4, %v1688_v54  ;;  %v1773_v28 = vmul.f32 %v5327_v61, %v5390_v7  ;;  %v1709_v39 = vmul.f32 0.6931472, %v4482_v0  ;;  %v5401_v2 = vpop.f32.mrb[31].mxu1 }
 0x47e   : > { %v1740_v46 = vmul.f32 %v5321_v55, %v1716_v30  ;;  %v1772_v37 = vmul.f32 %v5325_v44, %v1716_v30  ;;  %v1700_v51 = vmul.f32 0.6931472, %v4484_v50  ;;  %v1804_v57 = vmul.f32 %v5334_v53, %v1716_v30 }
 0x47f   : > { %v1746_v58 = vmul.f32 1.442695, %v1741_v12  ;;  %v1778_v35 = vmul.f32 1.442695, %v1773_v28  ;;  %v1715_v4 = vsel %vm5379_vm12, %v1712_v26, %v1709_v39  ;;  %v5410_v61 = vmul.f32 %v5390_v7, %v5164_v32  ;;  %v1802_v39 = vpop.permute.xlu1 %1801 }
 0x480   : > { %v1744_v1 = vmul.f32 1.442695, %v1740_v46  ;;  %v1776_v0 = vmul.f32 1.442695, %v1772_v37  ;;  %v5415_v55 = vsel %vm1671_vm8, %v5337_v8, %v1715_v4  ;;  %v1706_v44 = vsel %vm5383_vm13, %v1703_v9, %v1700_v51  ;;  %v5419_v53 = vpop.f32.mrb[32].mxu1 }
 0x481   : > { %4485 = vpow2.f32 %v1746_v58  ;;  %v1718_v52 = vsel %vm1670_vm10, %v5339_v11, %v1706_v44  ;;  %v1808_v54 = vmul.f32 1.442695, %v1804_v57  ;;  %v1743_v26 = vmul.f32 %v5353_v24, %v5415_v55  ;;  %v5426_v50 = vpop.f32.mrb[33].mxu1 }
 0x482   : > { %4487 = vpow2.f32 %v1744_v1  ;;  %v1742_v8 = vmul.f32 %v5345_v60, %v1718_v52  ;;  %v1775_v29 = vmul.f32 %v5361_v45, %v5415_v55  ;;  %v5433_v9 = vmul.f32 %v5343_v13, %v5410_v61  ;;  %v1826_v60 = vpop.permute.xlu0 %1825 }
 0x483   : > { %4489 = vpow2.f32 %v1776_v0  ;;  %v1750_v12 = vmul.f32 1.442695, %v1743_v26  ;;  %v1720_v11 = vmul.f32 %v1716_v30, %v5167_v10  ;;  %v1836_v28 = vmul.f32 %v1822_v43, %v1716_v30 }
 0x484   : > { %4491 = vpow2.f32 %v1778_v35  ;;  %v1748_v24 = vmul.f32 1.442695, %v1742_v8  ;;  %v1782_v46 = vmul.f32 1.442695, %v1775_v29  ;;  %v1723_v37 = vmul.f32 %v5415_v55, %v5173_v49  ;;  %v5438_v51 = vpop.f32.mrb[34].mxu1 }
 0x485   : > { %4493 = vpow2.f32 %v1808_v54  ;;  %v5441_v45 = vmul.f32 %v1720_v11, %v5347_v14  ;;  %v1840_v13 = vmul.f32 1.442695, %v1836_v28  ;;  %v1805_v57 = vmul.f32 %v5370_v36, %v5390_v7  ;;  %v5445_v58 = vpop.f32.mrb[35].mxu1 }
 0x486   : > { %6742 = vst [vmem:[#allocation24_spill] sm:$0xff] %v5445_v58  ;;  %4495 = vpow2.f32 %v1748_v24  ;;  %v5448_v43 = vmul.f32 %v5349_v21, %v1723_v37  ;;  %v1722_v30 = vmul.f32 %v1718_v52, %v5176_v62  ;;  %v5453_v35 = vmul.f32 %v5355_v22, %v5410_v61  ;;  %v1830_v8 = vpop.permute.xlu0 %1829 }
 0x487   : > { %6741 = vst [vmem:[#allocation23_spill] sm:$0xff] %v5441_v45  ;;  %4497 = vpow2.f32 %v1750_v12  ;;  %v1810_v4 = vmul.f32 1.442695, %v1805_v57  ;;  %v5456_v14 = vmul.f32 %v1720_v11, %v5357_v42  ;;  %v1806_v1 = vmul.f32 %v1798_v31, %v1718_v52 }
 0x488   : > { %4499 = vpow2.f32 %v1782_v46  ;;  %v5459_v36 = vmul.f32 %v1722_v30, %v5351_v23  ;;  %v5462_v0 = vmul.f32 %v5359_v38, %v1723_v37  ;;  %v1774_v21 = vmul.f32 %v1766_v33, %v1718_v52  ;;  %v5464_v44 = vpop.f32.mrb[36].mxu1  ;;  %v1834_v33 = vpop.permute.xlu1 %1833 }
 0x489   : > { %6743 = vst [vmem:[#allocation25_spill] sm:$0xff] %v5456_v14  ;;  %4501 = vpow2.f32 %v1840_v13  ;;  %v1812_v54 = vmul.f32 1.442695, %v1806_v1  ;;  %v5467_v22 = vmul.f32 %v1722_v30, %v5363_v47  ;;  %v5471_v42 = vmul.f32 %v5365_v5, %v5410_v61  ;;  %v5473_v31 = vpop.f32.mrb[37].mxu1 }
 0x48a   : > { %6744 = vst [vmem:[#allocation26_spill] sm:$0xff] %v5473_v31  ;;  %4503 = vpow2.f32 %v1810_v4  ;;  %v1780_v23 = vmul.f32 1.442695, %v1774_v21  ;;  %v5476_v26 = vmul.f32 %v1720_v11, %v5367_v48  ;;  %v1807_v38 = vmul.f32 %v1802_v39, %v5415_v55 }
 0x48b   : > { %v5479_v29 = vpop.eup %4485  ;;  %4505 = vpow2.f32 %v1812_v54  ;;  %v5482_v47 = vmul.f32 %v5372_v40, %v1723_v37  ;;  %v1837_v5 = vmul.f32 %v1826_v60, %v5390_v7  ;;  %v5486_v12 = vmul.f32 %v1722_v30, %v5376_v63 }
 0x48c   : > { %v5488_v28 = vpop.eup %4487  ;;  %4507 = vpow2.f32 %v1780_v23  ;;  %v1814_v48 = vmul.f32 1.442695, %v1807_v38  ;;  %v5492_v39 = vmul.f32 %v5392_v15, %v5410_v61  ;;  %v5495_v24 = vmul.f32 %v1720_v11, %v5401_v2  ;;  %v5497_v46 = vpop.f32.mrb[38].mxu1 }
 0x48d   : > { %6745 = vst [vmem:[#allocation27_spill] sm:$0xff] %v5486_v12  ;;  %6746 = vst [vmem:[#allocation28_spill] sm:$0xff] %v5497_v46  ;;  %v5499_v40 = vpop.eup %4489  ;;  %v1842_v13 = vmul.f32 1.442695, %v1837_v5  ;;  %v1839_v7 = vmul.f32 %v1834_v33, %v5415_v55  ;;  %v1838_v63 = vmul.f32 %v1830_v8, %v1718_v52  ;;  %v5503_v60 = vmul.f32 %v5419_v53, %v1723_v37  ;;  %v5505_v57 = vpop.f32.mrb[39].mxu1 }
 0x48e   : > { %6747 = vst [vmem:[#allocation29_spill] sm:$0xff] %v5505_v57  ;;  %v5507_v4 = vpop.eup %4491  ;;  %4509 = vpow2.f32 %v1814_v48  ;;  %v5510_v15 = vmul.f32 %v1722_v30, %v5426_v50  ;;  %v1873_v2 = vmul.f32 0.0, %v5479_v29  ;;  %v1872_v61 = vmul.f32 0.0, %v5488_v28 }
 0x48f   : > { %v5514_v11 = vpop.eup %4493  ;;  %4511 = vpow2.f32 %v1842_v13  ;;  %v1846_v55 = vmul.f32 1.442695, %v1839_v7  ;;  %v1844_v52 = vmul.f32 1.442695, %v1838_v63  ;;  %v1881_v53 = vmul.f32 0.0, %v5507_v4 }
 0x490   : > { %v5517_v37 = vpop.eup %4495  ;;  %v1877_v1 = vadd.f32 %v1873_v2, %v5433_v9  ;;  %v1876_v21 = vadd.f32 %v1872_v61, %v5441_v45  ;;  %v5521_v54 = vpop.f32.mrb[40].mxu1  ;;  %v1880_v50 = vmul.f32 0.0, %v5499_v40  ;;  %v1888_v30 = vmul.f32 0.0, %v5514_v11 }
 0x491   : > { %6748 = vst [vmem:[#allocation30_spill] sm:$0xff] %v5521_v54  ;;  %v5525_v23 = vpop.eup %4497  ;;  %4513 = vpow2.f32 %v1846_v55  ;;  %v5527_v38 = vpop.f32.mrb[41].mxu1  ;;  %v1885_v33 = vadd.f32 %v1881_v53, %v5453_v35  ;;  %v1874_v8 = vmul.f32 0.0, %v5517_v37 }
 0x492   : > { %6749 = vst [vmem:[#allocation31_spill] sm:$0xff] %v5527_v38  ;;  %v5531_v5 = vpop.eup %4499  ;;  %4515 = vpow2.f32 %v1844_v52  ;;  %1966 = vrot.lane.b32.xlu1 %v1877_v1, %s4622_s29  ;;  %v1905_v48 = vmul.f32 %v5438_v51, %v1877_v1  ;;  %1964 = vrot.lane.b32.xlu0 %v1876_v21, %s4622_s29  ;;  %v1904_v13 = vmul.f32 %v1876_v21, %v5445_v58  ;;  %v1875_v61 = vmul.f32 0.0, %v5525_v23 }
 0x493   : > { %v1884_v7 = vadd.f32 %v1880_v50, %v5456_v14  ;;  %v5538_v63 = vpop.eup %4501  ;;  %v1909_v2 = vmul.f32 %v5497_v46, %v1885_v33  ;;  %v5543_v55 = vadd.f32 %v1874_v8, %v5459_v36  ;;  %v1892_v25 = vadd.f32 %v1888_v30, %v5476_v26 }
 0x494   : > { %v5545_v52 = vpop.eup %4503  ;;  %v5547_v53 = vpop.f32.mrb[42].mxu1  ;;  %v1883_v21 = vmul.f32 0.0, %v5531_v5  ;;  %v1879_v8 = vadd.f32 %v1875_v61, %v5448_v43 }
 0x495   : > { %v1908_v1 = vmul.f32 %v1884_v7, %v5505_v57  ;;  %v5552_v50 = vpop.eup %4505  ;;  %v1913_v34 = vadd.f32 %v1909_v2, %v1905_v48  ;;  %v5554_v6 = vpop.f32.mrb[43].mxu1  ;;  %v1889_v27 = vmul.f32 0.0, %v5545_v52  ;;  %v1906_v41 = vmul.f32 %v5543_v55, %v5473_v31 }
 0x496   : > { %6750 = vst [vmem:[#allocation32_spill] sm:$0xff] %v5552_v50  ;;  %v5560_v49 = vpop.eup %4507  ;;  %1990 = vrot.lane.b32.xlu1 %v1885_v33, %s4622_s29  ;;  %1988 = vrot.lane.b32.xlu0 %v1884_v7, %s4622_s29  ;;  %v1916_v3 = vmul.f32 %v1892_v25, %v5554_v6  ;;  %v1890_v48 = vmul.f32 0.0, %v5552_v50  ;;  %v1907_v62 = vmul.f32 %v5464_v44, %v1879_v8  ;;  %v1896_v7 = vmul.f32 0.0, %v5538_v63 }
 0x497   : > { %v1912_v30 = vadd.f32 %v1908_v1, %v1904_v13  ;;  %v1893_v2 = vadd.f32 %v1889_v27, %v5471_v42  ;;  %v1887_v61 = vadd.f32 %v1883_v21, %v5462_v0  ;;  %v1882_v56 = vmul.f32 0.0, %v5560_v49 }
 0x498   : > { %v5570_v20 = vpop.eup %4509  ;;  %v5572_v19 = vpop.f32.mrb[44].mxu1  ;;  %v1894_v13 = vadd.f32 %v1890_v48, %v5486_v12 }
 0x499   : > { %6751 = vst [vmem:[#allocation33_spill] sm:$0xff] %v5570_v20  ;;  %6752 = vst [vmem:[#allocation34_spill] sm:$0xff] %v5572_v19  ;;  %v1920_v33 = vadd.f32 %v1916_v3, %v1912_v30  ;;  %v5576_v1 = vpop.eup %4511  ;;  %v1917_v18 = vmul.f32 %v5547_v53, %v1893_v2  ;;  %v5579_v27 = vpop.f32.mrb[45].mxu1  ;;  %v1911_v17 = vmul.f32 %v5521_v54, %v1887_v61  ;;  %v1891_v16 = vmul.f32 0.0, %v5570_v20 }
 0x49a   : > { %6753 = vst [vmem:[#allocation35_spill] sm:$0xff] %v5579_v27  ;;  %v1886_v21 = vadd.f32 %v1882_v56, %v5467_v22  ;;  %2014 = vrot.lane.b32.xlu1 %v1893_v2, %s4622_s29  ;;  %2012 = vrot.lane.b32.xlu0 %v1892_v25, %s4622_s29  ;;  %v1897_v3 = vmul.f32 0.0, %v5576_v1  ;;  %v1918_v30 = vmul.f32 %v1894_v13, %v5579_v27 }
 0x49b   : > { %v5588_v48 = vpop.eup %4513  ;;  %v1921_v32 = vadd.f32 %v1917_v18, %v1913_v34  ;;  %v1915_v59 = vadd.f32 %v1911_v17, %v1907_v62  ;;  %v1895_v12 = vadd.f32 %v1891_v16, %v5482_v47  ;;  %v1900_v25 = vadd.f32 %v1896_v7, %v5495_v24 }
 0x49c   : > { %6754 = vst [vmem:[#allocation36_spill] sm:$0xff] %v5588_v48  ;;  %v1910_v10 = vmul.f32 %v1886_v21, %v5527_v38  ;;  %v5592_v50 = vpop.eup %4515  ;;  %v5594_v56 = vpop.f32.mrb[46].mxu1  ;;  %v1901_v2 = vadd.f32 %v1897_v3, %v5492_v39  ;;  %v1899_v20 = vmul.f32 0.0, %v5588_v48 }
 0x49d   : > { %6755 = vst [vmem:[#allocation37_spill] sm:$0xff] %v5592_v50  ;;  %v5599_v54 = vpop.f32.mrb[47].mxu1  ;;  %v1919_v18 = vmul.f32 %v5572_v19, %v1895_v12  ;;  %v1898_v17 = vmul.f32 0.0, %v5592_v50 }
 0x49e   : > { %v1914_v27 = vadd.f32 %v1910_v10, %v1906_v41  ;;  %2038 = vrot.lane.b32.xlu1 %v1901_v2, %s4622_s29  ;;  %v1925_v16 = vmul.f32 %v5594_v56, %v1901_v2  ;;  %v1924_v34 = vmul.f32 %v1900_v25, %v5599_v54  ;;  %2036 = vrot.lane.b32.xlu0 %v1900_v25, %s4622_s29 }
 0x49f   : > { %v1923_v62 = vadd.f32 %v1919_v18, %v1915_v59  ;;  %v1903_v7 = vadd.f32 %v1899_v20, %v5503_v60  ;;  %v1902_v41 = vadd.f32 %v1898_v17, %v5510_v15 }
 0x4a0   : > { %v1922_v3 = vadd.f32 %v1918_v30, %v1914_v27  ;;  %v5608_v48 = vpop.f32.mrb[48].mxu1  ;;  %v5611_v10 = vadd.f32 %v1925_v16, %v1921_v32  ;;  %v5613_v19 = vadd.f32 %v1924_v34, %v1920_v33 }
 0x4a1   : > { %v5615_v50 = vpop.f32.mrb[49].mxu1  ;;  %v1927_v2 = vmul.f32 %v5608_v48, %v1903_v7 }
 0x4a2   : > { %6756 = vst [vmem:[#allocation38_spill] sm:$0xff] %v5611_v10  ;;  %6757 = vst [vmem:[#allocation39_spill] sm:$0xff] %v5613_v19  ;;  %1970 = vrot.lane.b32.xlu1 %v1879_v8, %s4622_s29  ;;  %1968 = vrot.lane.b32.xlu0 %v5543_v55, %s4622_s29  ;;  %v1926_v59 = vmul.f32 %v1902_v41, %v5615_v50  ;;  %v6767_v19 = vld [vmem:[#allocation35_spill] sm:$0xff] }
 0x4a3   : > { %v5622_v20 = vadd.f32 %v1927_v2, %v1923_v62 }
 0x4a4   : > { %v5624_v27 = vadd.f32 %v1926_v59, %v1922_v3 }
 0x4a5   : > { %6758 = vst [vmem:[#allocation40_spill] sm:$0xff] %v5622_v20 }
 0x4a6   : > { %6759 = vst [vmem:[#allocation41_spill] sm:$0xff] %v5624_v27  ;;  %1994 = vrot.lane.b32.xlu1 %v1887_v61, %s4622_s29  ;;  %1992 = vrot.lane.b32.xlu0 %v1886_v21, %s4622_s29 }
 0x4aa   : > { %2018 = vrot.lane.b32.xlu1 %v1895_v12, %s4622_s29  ;;  %2016 = vrot.lane.b32.xlu0 %v1894_v13, %s4622_s29 }
 0x4ae   : > { %2042 = vrot.lane.b32.xlu1 %v1903_v7, %s4622_s29  ;;  %2040 = vrot.lane.b32.xlu0 %v1902_v41, %s4622_s29 }
 0x504   : > { %v1967_v32 = vpop.permute.xlu1 %1966  ;;  %v1965_v55 = vpop.permute.xlu0 %1964 }
 0x505   : > { %v1977_v8 = vmul.f32 %v5479_v29, %v1967_v32  ;;  %v1976_v33 = vmul.f32 %v5488_v28, %v1965_v55 }
 0x507   : > { %v1981_v30 = vadd.f32 %v1977_v8, %v5433_v9  ;;  %v1980_v61 = vadd.f32 %v1976_v33, %v5441_v45 }
 0x508   : > { %v1991_v25 = vpop.permute.xlu1 %1990  ;;  %v1989_v21 = vpop.permute.xlu0 %1988 }
 0x509   : > { %v2057_v12 = vmul.f32 %v5438_v51, %v1981_v30  ;;  %v2056_v13 = vmul.f32 %v1980_v61, %v5445_v58  ;;  %v2001_v18 = vmul.f32 %v5507_v4, %v1991_v25  ;;  %2118 = vrot.lane.b32.xlu1 %v1981_v30, %s4622_s29  ;;  %v2000_v17 = vmul.f32 %v5499_v40, %v1989_v21 }
 0x50a   : > { %2116 = vrot.lane.b32.xlu0 %v1980_v61, %s4622_s29 }
 0x50b   : > { %v2005_v16 = vadd.f32 %v2001_v18, %v5453_v35  ;;  %v2004_v34 = vadd.f32 %v2000_v17, %v5456_v14 }
 0x50c   : > { %v2015_v62 = vpop.permute.xlu1 %2014  ;;  %v2013_v3 = vpop.permute.xlu0 %2012 }
 0x50d   : > { %v2061_v7 = vmul.f32 %v5497_v46, %v2005_v16  ;;  %v2060_v41 = vmul.f32 %v2004_v34, %v5505_v57  ;;  %v2025_v2 = vmul.f32 %v5545_v52, %v2015_v62  ;;  %2142 = vrot.lane.b32.xlu1 %v2005_v16, %s4622_s29  ;;  %v2024_v59 = vmul.f32 %v5514_v11, %v2013_v3 }
 0x50e   : > { %2140 = vrot.lane.b32.xlu0 %v2004_v34, %s4622_s29 }
 0x50f   : > { %v2065_v32 = vadd.f32 %v2061_v7, %v2057_v12  ;;  %v2064_v55 = vadd.f32 %v2060_v41, %v2056_v13  ;;  %v2029_v8 = vadd.f32 %v2025_v2, %v5471_v42  ;;  %v2028_v33 = vadd.f32 %v2024_v59, %v5476_v26 }
 0x510   : > { %v2039_v30 = vpop.permute.xlu1 %2038  ;;  %v2037_v61 = vpop.permute.xlu0 %2036 }
 0x511   : > { %v2069_v25 = vmul.f32 %v5547_v53, %v2029_v8  ;;  %v2068_v21 = vmul.f32 %v2028_v33, %v5554_v6  ;;  %v2049_v18 = vmul.f32 %v5576_v1, %v2039_v30  ;;  %2166 = vrot.lane.b32.xlu1 %v2029_v8, %s4622_s29  ;;  %v2048_v17 = vmul.f32 %v5538_v63, %v2037_v61 }
 0x512   : > { %2164 = vrot.lane.b32.xlu0 %v2028_v33, %s4622_s29 }
 0x513   : > { %v2073_v12 = vadd.f32 %v2069_v25, %v2065_v32  ;;  %v2072_v13 = vadd.f32 %v2068_v21, %v2064_v55  ;;  %v2053_v16 = vadd.f32 %v2049_v18, %v5492_v39  ;;  %v2052_v34 = vadd.f32 %v2048_v17, %v5495_v24 }
 0x514   : > { %v1971_v62 = vpop.permute.xlu1 %1970  ;;  %v1969_v3 = vpop.permute.xlu0 %1968 }
 0x515   : > { %v2077_v7 = vmul.f32 %v5594_v56, %v2053_v16  ;;  %v2076_v41 = vmul.f32 %v2052_v34, %v5599_v54  ;;  %v1979_v2 = vmul.f32 %v5525_v23, %v1971_v62  ;;  %2190 = vrot.lane.b32.xlu1 %v2053_v16, %s4622_s29  ;;  %v1978_v59 = vmul.f32 %v5517_v37, %v1969_v3  ;;  %v6762_v62 = vld [vmem:[#allocation30_spill] sm:$0xff] }
 0x516   : > { %2188 = vrot.lane.b32.xlu0 %v2052_v34, %s4622_s29 }
 0x517   : > { %v1983_v32 = vadd.f32 %v1979_v2, %v5448_v43  ;;  %v1982_v55 = vadd.f32 %v1978_v59, %v5459_v36  ;;  %v5668_v8 = vadd.f32 %v2076_v41, %v2072_v13  ;;  %v5670_v33 = vadd.f32 %v2077_v7, %v2073_v12  ;;  %v6763_v41 = vld [vmem:[#allocation33_spill] sm:$0xff]  ;;  %v6764_v59 = vld [vmem:[#allocation32_spill] sm:$0xff] }
 0x518   : > { %v1995_v30 = vpop.permute.xlu1 %1994  ;;  %v1993_v61 = vpop.permute.xlu0 %1992 }
 0x519   : > { %6760 = vst [vmem:[#allocation42_spill] sm:$0xff] %v5668_v8  ;;  %6761 = vst [vmem:[#allocation43_spill] sm:$0xff] %v5670_v33  ;;  %v2059_v25 = vmul.f32 %v5464_v44, %v1983_v32  ;;  %v2058_v21 = vmul.f32 %v1982_v55, %v5473_v31  ;;  %v2003_v18 = vmul.f32 %v5531_v5, %v1995_v30  ;;  %2122 = vrot.lane.b32.xlu1 %v1983_v32, %s4622_s29  ;;  %v6766_v33 = vld [vmem:[#allocation34_spill] sm:$0xff] }
 0x51a   : > { %v2002_v17 = vmul.f32 %v5560_v49, %v1993_v61  ;;  %2120 = vrot.lane.b32.xlu0 %v1982_v55, %s4622_s29 }
 0x51b   : > { %v2007_v16 = vadd.f32 %v2003_v18, %v5462_v0  ;;  %v6765_v18 = vld [vmem:[#allocation27_spill] sm:$0xff] }
 0x51c   : > { %v2006_v13 = vadd.f32 %v2002_v17, %v5467_v22  ;;  %v2019_v12 = vpop.permute.xlu1 %2018  ;;  %v2017_v34 = vpop.permute.xlu0 %2016 }
 0x51d   : > { %v2063_v3 = vmul.f32 %v6762_v62, %v2007_v16  ;;  %v2027_v2 = vmul.f32 %v6763_v41, %v2019_v12  ;;  %2146 = vrot.lane.b32.xlu1 %v2007_v16, %s4622_s29  ;;  %v2026_v32 = vmul.f32 %v6764_v59, %v2017_v34  ;;  %v6769_v16 = vld [vmem:[#allocation37_spill] sm:$0xff] }
 0x51e   : > { %v2062_v7 = vmul.f32 %v2006_v13, %v5527_v38  ;;  %2144 = vrot.lane.b32.xlu0 %v2006_v13, %s4622_s29  ;;  %v6768_v38 = vld [vmem:[#allocation36_spill] sm:$0xff] }
 0x51f   : > { %v2067_v30 = vadd.f32 %v2063_v3, %v2059_v25  ;;  %v2031_v61 = vadd.f32 %v2027_v2, %v5482_v47  ;;  %v2030_v17 = vadd.f32 %v2026_v32, %v6765_v18 }
 0x520   : > { %v2066_v55 = vadd.f32 %v2062_v7, %v2058_v21  ;;  %v2043_v20 = vpop.permute.xlu1 %2042  ;;  %v2041_v27 = vpop.permute.xlu0 %2040 }
 0x521   : > { %v2071_v8 = vmul.f32 %v6766_v33, %v2031_v61  ;;  %v2070_v10 = vmul.f32 %v2030_v17, %v6767_v19  ;;  %v2051_v12 = vmul.f32 %v6768_v38, %v2043_v20  ;;  %2170 = vrot.lane.b32.xlu1 %v2031_v61, %s4622_s29  ;;  %v2050_v34 = vmul.f32 %v6769_v16, %v2041_v27 }
 0x522   : > { %2168 = vrot.lane.b32.xlu0 %v2030_v17, %s4622_s29 }
 0x523   : > { %v2075_v25 = vadd.f32 %v2071_v8, %v2067_v30  ;;  %v2074_v21 = vadd.f32 %v2070_v10, %v2066_v55  ;;  %v2055_v13 = vadd.f32 %v2051_v12, %v5503_v60  ;;  %v2054_v3 = vadd.f32 %v2050_v34, %v5510_v15 }
 0x525   : > { %v2079_v7 = vmul.f32 %v5608_v48, %v2055_v13  ;;  %v2078_v2 = vmul.f32 %v2054_v3, %v5615_v50  ;;  %2194 = vrot.lane.b32.xlu1 %v2055_v13, %s4622_s29 }
 0x526   : > { %2192 = vrot.lane.b32.xlu0 %v2054_v3, %s4622_s29 }
 0x527   : > { %v5700_v20 = vadd.f32 %v2078_v2, %v2074_v21  ;;  %v5702_v32 = vadd.f32 %v2079_v7, %v2075_v25 }
 0x529   : > { %6770 = vst [vmem:[#allocation33_spill] sm:$0xff] %v5700_v20  ;;  %6771 = vst [vmem:[#allocation32_spill] sm:$0xff] %v5702_v32 }
 0x57b   : > { %v2119_v27 = vpop.permute.xlu1 %2118 }
 0x57c   : > { %v2129_v8 = vmul.f32 %v5479_v29, %v2119_v27  ;;  %v2117_v10 = vpop.permute.xlu0 %2116 }
 0x57d   : > { %v2128_v30 = vmul.f32 %v5488_v28, %v2117_v10 }
 0x57e   : > { %v2133_v55 = vadd.f32 %v2129_v8, %v5433_v9 }
 0x57f   : > { %v2132_v61 = vadd.f32 %v2128_v30, %v5441_v45  ;;  %v2143_v17 = vpop.permute.xlu1 %2142 }
 0x580   : > { %v2209_v12 = vmul.f32 %v5438_v51, %v2133_v55  ;;  %v2153_v34 = vmul.f32 %v5507_v4, %v2143_v17  ;;  %2270 = vrot.lane.b32.xlu1 %v2133_v55, %s4622_s29  ;;  %v2141_v21 = vpop.permute.xlu0 %2140 }
 0x581   : > { %v2208_v25 = vmul.f32 %v2132_v61, %v5445_v58  ;;  %v2152_v13 = vmul.f32 %v5499_v40, %v2141_v21  ;;  %2268 = vrot.lane.b32.xlu0 %v2132_v61, %s4622_s29 }
 0x582   : > { %v2157_v3 = vadd.f32 %v2153_v34, %v5453_v35 }
 0x583   : > { %v2156_v7 = vadd.f32 %v2152_v13, %v5456_v14  ;;  %v2167_v2 = vpop.permute.xlu1 %2166 }
 0x584   : > { %v2213_v27 = vmul.f32 %v5497_v46, %v2157_v3  ;;  %v2177_v8 = vmul.f32 %v5545_v52, %v2167_v2  ;;  %2294 = vrot.lane.b32.xlu1 %v2157_v3, %s4622_s29  ;;  %v2165_v10 = vpop.permute.xlu0 %2164 }
 0x585   : > { %v2212_v30 = vmul.f32 %v2156_v7, %v5505_v57  ;;  %v2176_v55 = vmul.f32 %v5514_v11, %v2165_v10  ;;  %2292 = vrot.lane.b32.xlu0 %v2156_v7, %s4622_s29 }
 0x586   : > { %v2217_v17 = vadd.f32 %v2213_v27, %v2209_v12  ;;  %v2181_v61 = vadd.f32 %v2177_v8, %v5471_v42 }
 0x587   : > { %v2216_v34 = vadd.f32 %v2212_v30, %v2208_v25  ;;  %v2180_v21 = vadd.f32 %v2176_v55, %v5476_v26  ;;  %v2191_v13 = vpop.permute.xlu1 %2190 }
 0x588   : > { %v2221_v32 = vmul.f32 %v5547_v53, %v2181_v61  ;;  %v2201_v2 = vmul.f32 %v5576_v1, %v2191_v13  ;;  %2318 = vrot.lane.b32.xlu1 %v2181_v61, %s4622_s29  ;;  %v2189_v3 = vpop.permute.xlu0 %2188 }
 0x589   : > { %v2220_v20 = vmul.f32 %v2180_v21, %v5554_v6  ;;  %v2200_v10 = vmul.f32 %v5538_v63, %v2189_v3  ;;  %2316 = vrot.lane.b32.xlu0 %v2180_v21, %s4622_s29 }
 0x58a   : > { %v2225_v12 = vadd.f32 %v2221_v32, %v2217_v17  ;;  %v2205_v7 = vadd.f32 %v2201_v2, %v5492_v39 }
 0x58b   : > { %v2224_v25 = vadd.f32 %v2220_v20, %v2216_v34  ;;  %v2204_v27 = vadd.f32 %v2200_v10, %v5495_v24  ;;  %v2123_v8 = vpop.permute.xlu1 %2122 }
 0x58c   : > { %v2229_v30 = vmul.f32 %v5594_v56, %v2205_v7  ;;  %v2131_v55 = vmul.f32 %v5525_v23, %v2123_v8  ;;  %2342 = vrot.lane.b32.xlu1 %v2205_v7, %s4622_s29  ;;  %v2121_v61 = vpop.permute.xlu0 %2120 }
 0x58d   : > { %v2228_v13 = vmul.f32 %v2204_v27, %v5599_v54  ;;  %v2130_v3 = vmul.f32 %v5517_v37, %v2121_v61  ;;  %2340 = vrot.lane.b32.xlu0 %v2204_v27, %s4622_s29 }
 0x58e   : > { %v2135_v32 = vadd.f32 %v2131_v55, %v5448_v43  ;;  %v5739_v17 = vadd.f32 %v2229_v30, %v2225_v12 }
 0x58f   : > { %v2134_v20 = vadd.f32 %v2130_v3, %v5459_v36  ;;  %v2147_v34 = vpop.permute.xlu1 %2146  ;;  %v5742_v21 = vadd.f32 %v2228_v13, %v2224_v25  ;;  %v6774_v3 = vld [vmem:[#allocation31_spill] sm:$0xff] }
 0x590   : > { %6772 = vst [vmem:[#allocation27_spill] sm:$0xff] %v5739_v17  ;;  %v2211_v2 = vmul.f32 %v5464_v44, %v2135_v32  ;;  %v2155_v10 = vmul.f32 %v5531_v5, %v2147_v34  ;;  %2274 = vrot.lane.b32.xlu1 %v2135_v32, %s4622_s29  ;;  %v2145_v7 = vpop.permute.xlu0 %2144 }
 0x591   : > { %6773 = vst [vmem:[#allocation34_spill] sm:$0xff] %v5742_v21  ;;  %v2210_v8 = vmul.f32 %v2134_v20, %v5473_v31  ;;  %v2154_v27 = vmul.f32 %v5560_v49, %v2145_v7  ;;  %2272 = vrot.lane.b32.xlu0 %v2134_v20, %s4622_s29 }
 0x592   : > { %v2159_v12 = vadd.f32 %v2155_v10, %v5462_v0 }
 0x593   : > { %v2158_v30 = vadd.f32 %v2154_v27, %v5467_v22  ;;  %v2171_v55 = vpop.permute.xlu1 %2170 }
 0x594   : > { %v2215_v25 = vmul.f32 %v6762_v62, %v2159_v12  ;;  %v2179_v61 = vmul.f32 %v6763_v41, %v2171_v55  ;;  %2298 = vrot.lane.b32.xlu1 %v2159_v12, %s4622_s29  ;;  %v2169_v13 = vpop.permute.xlu0 %2168 }
 0x595   : > { %v2214_v32 = vmul.f32 %v2158_v30, %v6774_v3  ;;  %v2178_v34 = vmul.f32 %v6764_v59, %v2169_v13  ;;  %2296 = vrot.lane.b32.xlu0 %v2158_v30, %s4622_s29 }
 0x596   : > { %v2219_v7 = vadd.f32 %v2215_v25, %v2211_v2  ;;  %v2183_v20 = vadd.f32 %v2179_v61, %v5482_v47 }
 0x597   : > { %v2218_v10 = vadd.f32 %v2214_v32, %v2210_v8  ;;  %v2182_v27 = vadd.f32 %v2178_v34, %v6765_v18  ;;  %v2195_v17 = vpop.permute.xlu1 %2194 }
 0x598   : > { %v2223_v21 = vmul.f32 %v6766_v33, %v2183_v20  ;;  %v2203_v55 = vmul.f32 %v6768_v38, %v2195_v17  ;;  %2322 = vrot.lane.b32.xlu1 %v2183_v20, %s4622_s29  ;;  %v2193_v12 = vpop.permute.xlu0 %2192 }
 0x599   : > { %v2222_v3 = vmul.f32 %v2182_v27, %v6767_v19  ;;  %v2202_v13 = vmul.f32 %v6769_v16, %v2193_v12  ;;  %2320 = vrot.lane.b32.xlu0 %v2182_v27, %s4622_s29 }
 0x59a   : > { %v2227_v2 = vadd.f32 %v2223_v21, %v2219_v7  ;;  %v2207_v30 = vadd.f32 %v2203_v55, %v5503_v60 }
 0x59b   : > { %v2226_v8 = vadd.f32 %v2222_v3, %v2218_v10  ;;  %v2206_v25 = vadd.f32 %v2202_v13, %v5510_v15 }
 0x59c   : > { %v2231_v61 = vmul.f32 %v5608_v48, %v2207_v30  ;;  %2346 = vrot.lane.b32.xlu1 %v2207_v30, %s4622_s29 }
 0x59d   : > { %v2230_v17 = vmul.f32 %v2206_v25, %v5615_v50  ;;  %2344 = vrot.lane.b32.xlu0 %v2206_v25, %s4622_s29 }
 0x59e   : > { %v5772_v32 = vadd.f32 %v2231_v61, %v2227_v2 }
 0x59f   : > { %v5774_v34 = vadd.f32 %v2230_v17, %v2226_v8 }
 0x5a0   : > { %6775 = vst [vmem:[#allocation35_spill] sm:$0xff] %v5772_v32 }
 0x5a1   : > { %6776 = vst [vmem:[#allocation36_spill] sm:$0xff] %v5774_v34 }
 0x5f2   : > { %v2271_v20 = vpop.permute.xlu1 %2270 }
 0x5f3   : > { %v2281_v21 = vmul.f32 %v5479_v29, %v2271_v20  ;;  %v2269_v7 = vpop.permute.xlu0 %2268 }
 0x5f4   : > { %v2280_v3 = vmul.f32 %v5488_v28, %v2269_v7 }
 0x5f5   : > { %v2285_v10 = vadd.f32 %v2281_v21, %v5433_v9 }
 0x5f6   : > { %v2284_v27 = vadd.f32 %v2280_v3, %v5441_v45  ;;  %v2295_v55 = vpop.permute.xlu1 %2294 }
 0x5f7   : > { %v2361_v12 = vmul.f32 %v5438_v51, %v2285_v10  ;;  %v2305_v13 = vmul.f32 %v5507_v4, %v2295_v55  ;;  %2422 = vrot.lane.b32.xlu1 %v2285_v10, %s4622_s29  ;;  %v2293_v2 = vpop.permute.xlu0 %2292 }
 0x5f8   : > { %v2360_v30 = vmul.f32 %v2284_v27, %v5445_v58  ;;  %v2304_v8 = vmul.f32 %v5499_v40, %v2293_v2  ;;  %2420 = vrot.lane.b32.xlu0 %v2284_v27, %s4622_s29 }
 0x5f9   : > { %v2309_v25 = vadd.f32 %v2305_v13, %v5453_v35 }
 0x5fa   : > { %v2308_v61 = vadd.f32 %v2304_v8, %v5456_v14  ;;  %v2319_v17 = vpop.permute.xlu1 %2318 }
 0x5fb   : > { %v2365_v20 = vmul.f32 %v5497_v46, %v2309_v25  ;;  %v2329_v21 = vmul.f32 %v5545_v52, %v2319_v17  ;;  %2446 = vrot.lane.b32.xlu1 %v2309_v25, %s4622_s29  ;;  %v2317_v7 = vpop.permute.xlu0 %2316 }
 0x5fc   : > { %v2364_v3 = vmul.f32 %v2308_v61, %v5505_v57  ;;  %v2328_v10 = vmul.f32 %v5514_v11, %v2317_v7  ;;  %2444 = vrot.lane.b32.xlu0 %v2308_v61, %s4622_s29 }
 0x5fd   : > { %v2369_v55 = vadd.f32 %v2365_v20, %v2361_v12  ;;  %v2333_v27 = vadd.f32 %v2329_v21, %v5471_v42 }
 0x5fe   : > { %v2368_v13 = vadd.f32 %v2364_v3, %v2360_v30  ;;  %v2332_v2 = vadd.f32 %v2328_v10, %v5476_v26  ;;  %v2343_v8 = vpop.permute.xlu1 %2342 }
 0x5ff   : > { %v2373_v32 = vmul.f32 %v5547_v53, %v2333_v27  ;;  %v2353_v17 = vmul.f32 %v5576_v1, %v2343_v8  ;;  %2470 = vrot.lane.b32.xlu1 %v2333_v27, %s4622_s29  ;;  %v2341_v25 = vpop.permute.xlu0 %2340 }
 0x600   : > { %v2372_v34 = vmul.f32 %v2332_v2, %v5554_v6  ;;  %v2352_v7 = vmul.f32 %v5538_v63, %v2341_v25  ;;  %2468 = vrot.lane.b32.xlu0 %v2332_v2, %s4622_s29 }
 0x601   : > { %v2377_v12 = vadd.f32 %v2373_v32, %v2369_v55  ;;  %v2357_v61 = vadd.f32 %v2353_v17, %v5492_v39 }
 0x602   : > { %v2376_v30 = vadd.f32 %v2372_v34, %v2368_v13  ;;  %v2356_v20 = vadd.f32 %v2352_v7, %v5495_v24  ;;  %v2275_v21 = vpop.permute.xlu1 %2274 }
 0x603   : > { %v2381_v3 = vmul.f32 %v5594_v56, %v2357_v61  ;;  %v2283_v10 = vmul.f32 %v5525_v23, %v2275_v21  ;;  %2494 = vrot.lane.b32.xlu1 %v2357_v61, %s4622_s29  ;;  %v2273_v27 = vpop.permute.xlu0 %2272 }
 0x604   : > { %v2380_v8 = vmul.f32 %v2356_v20, %v5599_v54  ;;  %v2282_v25 = vmul.f32 %v5517_v37, %v2273_v27  ;;  %2492 = vrot.lane.b32.xlu0 %v2356_v20, %s4622_s29 }
 0x605   : > { %v2287_v32 = vadd.f32 %v2283_v10, %v5448_v43  ;;  %v5811_v55 = vadd.f32 %v2381_v3, %v2377_v12 }
 0x606   : > { %v2286_v34 = vadd.f32 %v2282_v25, %v5459_v36  ;;  %v2299_v13 = vpop.permute.xlu1 %2298  ;;  %v5814_v2 = vadd.f32 %v2380_v8, %v2376_v30  ;;  %v6779_v25 = vld [vmem:[#allocation31_spill] sm:$0xff] }
 0x607   : > { %6777 = vst [vmem:[#allocation37_spill] sm:$0xff] %v5811_v55  ;;  %v2363_v17 = vmul.f32 %v5464_v44, %v2287_v32  ;;  %v2307_v7 = vmul.f32 %v5531_v5, %v2299_v13  ;;  %2426 = vrot.lane.b32.xlu1 %v2287_v32, %s4622_s29  ;;  %v2297_v61 = vpop.permute.xlu0 %2296 }
 0x608   : > { %6778 = vst [vmem:[#allocation44_spill] sm:$0xff] %v5814_v2  ;;  %v2362_v21 = vmul.f32 %v2286_v34, %v5473_v31  ;;  %v2306_v20 = vmul.f32 %v5560_v49, %v2297_v61  ;;  %2424 = vrot.lane.b32.xlu0 %v2286_v34, %s4622_s29 }
 0x609   : > { %v2311_v12 = vadd.f32 %v2307_v7, %v5462_v0 }
 0x60a   : > { %v2310_v3 = vadd.f32 %v2306_v20, %v5467_v22  ;;  %v2323_v10 = vpop.permute.xlu1 %2322 }
 0x60b   : > { %v2367_v30 = vmul.f32 %v6762_v62, %v2311_v12  ;;  %v2331_v27 = vmul.f32 %v6763_v41, %v2323_v10  ;;  %2450 = vrot.lane.b32.xlu1 %v2311_v12, %s4622_s29  ;;  %v2321_v8 = vpop.permute.xlu0 %2320 }
 0x60c   : > { %v2366_v32 = vmul.f32 %v2310_v3, %v6779_v25  ;;  %v2330_v13 = vmul.f32 %v6764_v59, %v2321_v8  ;;  %2448 = vrot.lane.b32.xlu0 %v2310_v3, %s4622_s29 }
 0x60d   : > { %v2371_v61 = vadd.f32 %v2367_v30, %v2363_v17  ;;  %v2335_v34 = vadd.f32 %v2331_v27, %v5482_v47 }
 0x60e   : > { %v2370_v7 = vadd.f32 %v2366_v32, %v2362_v21  ;;  %v2334_v20 = vadd.f32 %v2330_v13, %v6765_v18  ;;  %v2347_v2 = vpop.permute.xlu1 %2346 }
 0x60f   : > { %v2375_v55 = vmul.f32 %v6766_v33, %v2335_v34  ;;  %v2355_v10 = vmul.f32 %v6768_v38, %v2347_v2  ;;  %2474 = vrot.lane.b32.xlu1 %v2335_v34, %s4622_s29  ;;  %v2345_v12 = vpop.permute.xlu0 %2344 }
 0x610   : > { %v2374_v25 = vmul.f32 %v2334_v20, %v6767_v19  ;;  %v2354_v8 = vmul.f32 %v6769_v16, %v2345_v12  ;;  %2472 = vrot.lane.b32.xlu0 %v2334_v20, %s4622_s29 }
 0x611   : > { %v2379_v17 = vadd.f32 %v2375_v55, %v2371_v61  ;;  %v2359_v3 = vadd.f32 %v2355_v10, %v5503_v60 }
 0x612   : > { %v2378_v21 = vadd.f32 %v2374_v25, %v2370_v7  ;;  %v2358_v30 = vadd.f32 %v2354_v8, %v5510_v15 }
 0x613   : > { %v2383_v27 = vmul.f32 %v5608_v48, %v2359_v3  ;;  %2498 = vrot.lane.b32.xlu1 %v2359_v3, %s4622_s29 }
 0x614   : > { %v2382_v2 = vmul.f32 %v2358_v30, %v5615_v50  ;;  %2496 = vrot.lane.b32.xlu0 %v2358_v30, %s4622_s29 }
 0x615   : > { %v5844_v32 = vadd.f32 %v2383_v27, %v2379_v17 }
 0x616   : > { %v5846_v13 = vadd.f32 %v2382_v2, %v2378_v21 }
 0x617   : > { %6780 = vst [vmem:[#allocation45_spill] sm:$0xff] %v5844_v32 }
 0x618   : > { %6781 = vst [vmem:[#allocation46_spill] sm:$0xff] %v5846_v13 }
 0x669   : > { %v2423_v34 = vpop.permute.xlu1 %2422 }
 0x66a   : > { %v2433_v55 = vmul.f32 %v5479_v29, %v2423_v34  ;;  %v2421_v61 = vpop.permute.xlu0 %2420 }
 0x66b   : > { %v2432_v25 = vmul.f32 %v5488_v28, %v2421_v61 }
 0x66c   : > { %v2437_v7 = vadd.f32 %v2433_v55, %v5433_v9 }
 0x66d   : > { %v2436_v20 = vadd.f32 %v2432_v25, %v5441_v45  ;;  %v2447_v10 = vpop.permute.xlu1 %2446 }
 0x66e   : > { %v2513_v12 = vmul.f32 %v5438_v51, %v2437_v7  ;;  %v2457_v8 = vmul.f32 %v5507_v4, %v2447_v10  ;;  %2574 = vrot.lane.b32.xlu1 %v2437_v7, %s4622_s29  ;;  %v2445_v17 = vpop.permute.xlu0 %2444 }
 0x66f   : > { %v2512_v3 = vmul.f32 %v2436_v20, %v5445_v58  ;;  %v2456_v21 = vmul.f32 %v5499_v40, %v2445_v17  ;;  %2572 = vrot.lane.b32.xlu0 %v2436_v20, %s4622_s29 }
 0x670   : > { %v2461_v30 = vadd.f32 %v2457_v8, %v5453_v35 }
 0x671   : > { %v2460_v27 = vadd.f32 %v2456_v21, %v5456_v14  ;;  %v2471_v2 = vpop.permute.xlu1 %2470 }
 0x672   : > { %v2517_v34 = vmul.f32 %v5497_v46, %v2461_v30  ;;  %v2481_v55 = vmul.f32 %v5545_v52, %v2471_v2  ;;  %2598 = vrot.lane.b32.xlu1 %v2461_v30, %s4622_s29  ;;  %v2469_v61 = vpop.permute.xlu0 %2468 }
 0x673   : > { %v2516_v25 = vmul.f32 %v2460_v27, %v5505_v57  ;;  %v2480_v7 = vmul.f32 %v5514_v11, %v2469_v61  ;;  %2596 = vrot.lane.b32.xlu0 %v2460_v27, %s4622_s29 }
 0x674   : > { %v2521_v10 = vadd.f32 %v2517_v34, %v2513_v12  ;;  %v2485_v20 = vadd.f32 %v2481_v55, %v5471_v42 }
 0x675   : > { %v2520_v8 = vadd.f32 %v2516_v25, %v2512_v3  ;;  %v2484_v17 = vadd.f32 %v2480_v7, %v5476_v26  ;;  %v2495_v21 = vpop.permute.xlu1 %2494 }
 0x676   : > { %v2525_v13 = vmul.f32 %v5547_v53, %v2485_v20  ;;  %v2505_v2 = vmul.f32 %v5576_v1, %v2495_v21  ;;  %2622 = vrot.lane.b32.xlu1 %v2485_v20, %s4622_s29  ;;  %v2493_v30 = vpop.permute.xlu0 %2492 }
 0x677   : > { %v2524_v32 = vmul.f32 %v2484_v17, %v5554_v6  ;;  %v2504_v61 = vmul.f32 %v5538_v63, %v2493_v30  ;;  %2620 = vrot.lane.b32.xlu0 %v2484_v17, %s4622_s29 }
 0x678   : > { %v2529_v12 = vadd.f32 %v2525_v13, %v2521_v10  ;;  %v2509_v27 = vadd.f32 %v2505_v2, %v5492_v39 }
 0x679   : > { %v2528_v3 = vadd.f32 %v2524_v32, %v2520_v8  ;;  %v2508_v34 = vadd.f32 %v2504_v61, %v5495_v24  ;;  %v2427_v55 = vpop.permute.xlu1 %2426 }
 0x67a   : > { %v2533_v25 = vmul.f32 %v5594_v56, %v2509_v27  ;;  %v2435_v7 = vmul.f32 %v5525_v23, %v2427_v55  ;;  %2646 = vrot.lane.b32.xlu1 %v2509_v27, %s4622_s29  ;;  %v2425_v20 = vpop.permute.xlu0 %2424 }
 0x67b   : > { %v2532_v21 = vmul.f32 %v2508_v34, %v5599_v54  ;;  %v2434_v30 = vmul.f32 %v5517_v37, %v2425_v20  ;;  %2644 = vrot.lane.b32.xlu0 %v2508_v34, %s4622_s29 }
 0x67c   : > { %v2439_v13 = vadd.f32 %v2435_v7, %v5448_v43  ;;  %v5883_v10 = vadd.f32 %v2533_v25, %v2529_v12 }
 0x67d   : > { %v2438_v32 = vadd.f32 %v2434_v30, %v5459_v36  ;;  %v2451_v8 = vpop.permute.xlu1 %2450  ;;  %v5886_v17 = vadd.f32 %v2532_v21, %v2528_v3  ;;  %v6784_v30 = vld [vmem:[#allocation31_spill] sm:$0xff] }
 0x67e   : > { %6782 = vst [vmem:[#allocation47_spill] sm:$0xff] %v5883_v10  ;;  %v2515_v2 = vmul.f32 %v5464_v44, %v2439_v13  ;;  %v2459_v61 = vmul.f32 %v5531_v5, %v2451_v8  ;;  %2578 = vrot.lane.b32.xlu1 %v2439_v13, %s4622_s29  ;;  %v2449_v27 = vpop.permute.xlu0 %2448 }
 0x67f   : > { %6783 = vst [vmem:[#allocation48_spill] sm:$0xff] %v5886_v17  ;;  %v2514_v55 = vmul.f32 %v2438_v32, %v5473_v31  ;;  %v2458_v34 = vmul.f32 %v5560_v49, %v2449_v27  ;;  %2576 = vrot.lane.b32.xlu0 %v2438_v32, %s4622_s29  ;;  %v6706_v27 = vmov 4  }
 0x680   : > { %v2463_v12 = vadd.f32 %v2459_v61, %v5462_v0  ;;  %4429 = vset.pattern.permute.xlu1 %v6706_v27 }
 0x681   : > { %v2462_v25 = vadd.f32 %v2458_v34, %v5467_v22  ;;  %v2475_v7 = vpop.permute.xlu1 %2474 }
 0x682   : > { %v2519_v3 = vmul.f32 %v6762_v62, %v2463_v12  ;;  %v2483_v20 = vmul.f32 %v6763_v41, %v2475_v7  ;;  %2602 = vrot.lane.b32.xlu1 %v2463_v12, %s4622_s29  ;;  %v2473_v21 = vpop.permute.xlu0 %2472 }
 0x683   : > { %v2518_v13 = vmul.f32 %v2462_v25, %v6784_v30  ;;  %v2482_v8 = vmul.f32 %v6764_v59, %v2473_v21  ;;  %2600 = vrot.lane.b32.xlu0 %v2462_v25, %s4622_s29 }
 0x684   : > { %v2523_v32 = vadd.f32 %v2519_v3, %v2515_v2  ;;  %v2487_v61 = vadd.f32 %v2483_v20, %v5482_v47 }
 0x685   : > { %v2522_v34 = vadd.f32 %v2518_v13, %v2514_v55  ;;  %v2486_v17 = vadd.f32 %v2482_v8, %v6765_v18  ;;  %v2499_v10 = vpop.permute.xlu1 %2498 }
 0x686   : > { %v2527_v7 = vmul.f32 %v6766_v33, %v2487_v61  ;;  %v2507_v12 = vmul.f32 %v6768_v38, %v2499_v10  ;;  %2626 = vrot.lane.b32.xlu1 %v2487_v61, %s4622_s29  ;;  %v2497_v30 = vpop.permute.xlu0 %2496 }
 0x687   : > { %v2526_v21 = vmul.f32 %v2486_v17, %v6767_v19  ;;  %v2506_v25 = vmul.f32 %v6769_v16, %v2497_v30  ;;  %2624 = vrot.lane.b32.xlu0 %v2486_v17, %s4622_s29 }
 0x688   : > { %v2531_v2 = vadd.f32 %v2527_v7, %v2523_v32  ;;  %v2511_v3 = vadd.f32 %v2507_v12, %v5503_v60 }
 0x689   : > { %v2530_v55 = vadd.f32 %v2526_v21, %v2522_v34  ;;  %v2510_v20 = vadd.f32 %v2506_v25, %v5510_v15 }
 0x68a   : > { %v2535_v13 = vmul.f32 %v5608_v48, %v2511_v3  ;;  %2650 = vrot.lane.b32.xlu1 %v2511_v3, %s4622_s29 }
 0x68b   : > { %v2534_v10 = vmul.f32 %v2510_v20, %v5615_v50  ;;  %2648 = vrot.lane.b32.xlu0 %v2510_v20, %s4622_s29 }
 0x68c   : > { %v5917_v8 = vadd.f32 %v2535_v13, %v2531_v2 }
 0x68d   : > { %v5919_v61 = vadd.f32 %v2534_v10, %v2530_v55 }
 0x68e   : > { %6785 = vst [vmem:[#allocation49_spill] sm:$0xff] %v5917_v8 }
 0x68f   : > { %6786 = vst [vmem:[#allocation50_spill] sm:$0xff] %v5919_v61 }
 0x6e0   : > { %v2575_v30 = vpop.permute.xlu1 %2574 }
 0x6e1   : > { %v2585_v17 = vmul.f32 %v5479_v29, %v2575_v30  ;;  %v2573_v32 = vpop.permute.xlu0 %2572 }
 0x6e2   : > { %v2584_v34 = vmul.f32 %v5488_v28, %v2573_v32 }
 0x6e3   : > { %v2589_v7 = vadd.f32 %v2585_v17, %v5433_v9 }
 0x6e4   : > { %v2588_v12 = vadd.f32 %v2584_v34, %v5441_v45  ;;  %v2599_v21 = vpop.permute.xlu1 %2598 }
 0x6e5   : > { %v2665_v25 = vmul.f32 %v5438_v51, %v2589_v7  ;;  %v2609_v3 = vmul.f32 %v5507_v4, %v2599_v21  ;;  %2726 = vrot.lane.b32.xlu1 %v2589_v7, %s4622_s29  ;;  %v2597_v2 = vpop.permute.xlu0 %2596 }
 0x6e6   : > { %v2664_v55 = vmul.f32 %v2588_v12, %v5445_v58  ;;  %v2608_v20 = vmul.f32 %v5499_v40, %v2597_v2  ;;  %2724 = vrot.lane.b32.xlu0 %v2588_v12, %s4622_s29 }
 0x6e7   : > { %v2613_v13 = vadd.f32 %v2609_v3, %v5453_v35 }
 0x6e8   : > { %v2612_v10 = vadd.f32 %v2608_v20, %v5456_v14  ;;  %v2623_v30 = vpop.permute.xlu1 %2622 }
 0x6e9   : > { %v2669_v17 = vmul.f32 %v5497_v46, %v2613_v13  ;;  %v2633_v32 = vmul.f32 %v5545_v52, %v2623_v30  ;;  %2750 = vrot.lane.b32.xlu1 %v2613_v13, %s4622_s29  ;;  %v2621_v34 = vpop.permute.xlu0 %2620 }
 0x6ea   : > { %v2668_v7 = vmul.f32 %v2612_v10, %v5505_v57  ;;  %v2632_v21 = vmul.f32 %v5514_v11, %v2621_v34  ;;  %2748 = vrot.lane.b32.xlu0 %v2612_v10, %s4622_s29 }
 0x6eb   : > { %v2673_v2 = vadd.f32 %v2669_v17, %v2665_v25  ;;  %v2637_v12 = vadd.f32 %v2633_v32, %v5471_v42 }
 0x6ec   : > { %v2672_v3 = vadd.f32 %v2668_v7, %v2664_v55  ;;  %v2636_v20 = vadd.f32 %v2632_v21, %v5476_v26  ;;  %v2647_v27 = vpop.permute.xlu1 %2646 }
 0x6ed   : > { %v2677_v8 = vmul.f32 %v5547_v53, %v2637_v12  ;;  %v2657_v30 = vmul.f32 %v5576_v1, %v2647_v27  ;;  %2774 = vrot.lane.b32.xlu1 %v2637_v12, %s4622_s29  ;;  %v2645_v13 = vpop.permute.xlu0 %2644 }
 0x6ee   : > { %v2676_v61 = vmul.f32 %v2636_v20, %v5554_v6  ;;  %v2656_v34 = vmul.f32 %v5538_v63, %v2645_v13  ;;  %2772 = vrot.lane.b32.xlu0 %v2636_v20, %s4622_s29 }
 0x6ef   : > { %v2681_v25 = vadd.f32 %v2677_v8, %v2673_v2  ;;  %v2661_v10 = vadd.f32 %v2657_v30, %v5492_v39 }
 0x6f0   : > { %v2680_v55 = vadd.f32 %v2676_v61, %v2672_v3  ;;  %v2660_v17 = vadd.f32 %v2656_v34, %v5495_v24  ;;  %v2579_v32 = vpop.permute.xlu1 %2578 }
 0x6f1   : > { %v2685_v7 = vmul.f32 %v5594_v56, %v2661_v10  ;;  %v2587_v27 = vmul.f32 %v5525_v23, %v2579_v32  ;;  %2798 = vrot.lane.b32.xlu1 %v2661_v10, %s4622_s29  ;;  %v2577_v21 = vpop.permute.xlu0 %2576 }
 0x6f2   : > { %v2684_v12 = vmul.f32 %v2660_v17, %v5599_v54  ;;  %v2586_v13 = vmul.f32 %v5517_v37, %v2577_v21  ;;  %2796 = vrot.lane.b32.xlu0 %v2660_v17, %s4622_s29 }
 0x6f3   : > { %v2591_v8 = vadd.f32 %v2587_v27, %v5448_v43  ;;  %v5956_v2 = vadd.f32 %v2685_v7, %v2681_v25 }
 0x6f4   : > { %v2590_v61 = vadd.f32 %v2586_v13, %v5459_v36  ;;  %v2603_v3 = vpop.permute.xlu1 %2602  ;;  %v5959_v20 = vadd.f32 %v2684_v12, %v2680_v55  ;;  %v6789_v13 = vld [vmem:[#allocation31_spill] sm:$0xff] }
 0x6f5   : > { %6787 = vst [vmem:[#allocation51_spill] sm:$0xff] %v5956_v2  ;;  %v2667_v30 = vmul.f32 %v5464_v44, %v2591_v8  ;;  %v2611_v34 = vmul.f32 %v5531_v5, %v2603_v3  ;;  %2730 = vrot.lane.b32.xlu1 %v2591_v8, %s4622_s29  ;;  %v2601_v10 = vpop.permute.xlu0 %2600 }
 0x6f6   : > { %6788 = vst [vmem:[#allocation52_spill] sm:$0xff] %v5959_v20  ;;  %v2666_v32 = vmul.f32 %v2590_v61, %v5473_v31  ;;  %v2610_v17 = vmul.f32 %v5560_v49, %v2601_v10  ;;  %2728 = vrot.lane.b32.xlu0 %v2590_v61, %s4622_s29 }
 0x6f7   : > { %v2615_v25 = vadd.f32 %v2611_v34, %v5462_v0 }
 0x6f8   : > { %v2614_v7 = vadd.f32 %v2610_v17, %v5467_v22  ;;  %v2627_v27 = vpop.permute.xlu1 %2626 }
 0x6f9   : > { %v2671_v55 = vmul.f32 %v6762_v62, %v2615_v25  ;;  %v2635_v21 = vmul.f32 %v6763_v41, %v2627_v27  ;;  %2754 = vrot.lane.b32.xlu1 %v2615_v25, %s4622_s29  ;;  %v2625_v12 = vpop.permute.xlu0 %2624 }
 0x6fa   : > { %v2670_v8 = vmul.f32 %v2614_v7, %v6789_v13  ;;  %v2634_v3 = vmul.f32 %v6764_v59, %v2625_v12  ;;  %2752 = vrot.lane.b32.xlu0 %v2614_v7, %s4622_s29 }
 0x6fb   : > { %v2675_v10 = vadd.f32 %v2671_v55, %v2667_v30  ;;  %v2639_v61 = vadd.f32 %v2635_v21, %v5482_v47 }
 0x6fc   : > { %v2674_v34 = vadd.f32 %v2670_v8, %v2666_v32  ;;  %v2638_v17 = vadd.f32 %v2634_v3, %v6765_v18  ;;  %v2651_v2 = vpop.permute.xlu1 %2650 }
 0x6fd   : > { %v2679_v20 = vmul.f32 %v6766_v33, %v2639_v61  ;;  %v2659_v27 = vmul.f32 %v6768_v38, %v2651_v2  ;;  %2778 = vrot.lane.b32.xlu1 %v2639_v61, %s4622_s29  ;;  %v2649_v25 = vpop.permute.xlu0 %2648  ;;  %v6792_v61 = vld [vmem:[#allocation39_spill] sm:$0xff] }
 0x6fe   : > { %v2678_v13 = vmul.f32 %v2638_v17, %v6767_v19  ;;  %v2658_v12 = vmul.f32 %v6769_v16, %v2649_v25  ;;  %2776 = vrot.lane.b32.xlu0 %v2638_v17, %s4622_s29  ;;  %v6794_v17 = vld [vmem:[#allocation42_spill] sm:$0xff]  ;;  %v6796_v25 = vmov 4  }
 0x6ff   : > { %v2683_v30 = vadd.f32 %v2679_v20, %v2675_v10  ;;  %v2663_v7 = vadd.f32 %v2659_v27, %v5503_v60  ;;  %v4545_v20 = vld [vmem:[%s6641_s4 + $0x8] sm:$0xff]  ;;  %v6791_v10 = vmov 0   ;;  %v6795_v27 = vld [vmem:[#allocation43_spill] sm:$0xff] }
 0x700   : > { %v2682_v32 = vadd.f32 %v2678_v13, %v2674_v34  ;;  %v2662_v55 = vadd.f32 %v2658_v12, %v5510_v15  ;;  %v6790_v13 = vld [vmem:[#allocation38_spill] sm:$0xff]  ;;  %v6793_v34 = vmov 1   ;;  %v4546_v12 = vld [vmem:[%s6641_s4 + $0x18] sm:$0xff] }
 0x701   : > { %v2687_v21 = vmul.f32 %v5608_v48, %v2663_v7  ;;  %2802 = vrot.lane.b32.xlu1 %v2663_v7, %s4622_s29  ;;  %v6798_v7 = vmov 2  }
 0x702   : > { %v2686_v2 = vmul.f32 %v2662_v55, %v5615_v50  ;;  %2800 = vrot.lane.b32.xlu0 %v2662_v55, %s4622_s29 }
 0x703   : > { %v5989_v8 = vadd.f32 %v2687_v21, %v2683_v30  ;;  %v6797_v30 = vld [vmem:[#allocation41_spill] sm:$0xff] }
 0x704   : > { %v5991_v3 = vadd.f32 %v2686_v2, %v2682_v32 }
 0x705   : > { %1857 = vperm.xlu1 %4429, %v4545_v20  }
 0x706   : > { %1939 = vperm.xlu0 %4431, %v6790_v13  }
 0x709   : > { %4430 = vset.pattern.permute.xlu1 %v6791_v10 }
 0x70a   : > { %1934 = vperm.xlu1 %4430, %v6792_v61  }
 0x70e   : > { %4432 = vset.pattern.permute.xlu1 %v6793_v34 }
 0x70f   : > { %2086 = vperm.xlu1 %4432, %v6794_v17  }
 0x713   : > { %2091 = vperm.xlu1 %4432, %v6795_v27  }
 0x717   : > { %4433 = vset.pattern.permute.xlu1 %v6796_v25 }
 0x718   : > { %1865 = vperm.xlu1 %4433, %v4546_v12  }
 0x71c   : > { %4434 = vset.pattern.permute.xlu1 %v6791_v10 }
 0x71d   : > { %1944 = vperm.xlu1 %4434, %v6797_v30  }
 0x721   : > { %4435 = vset.pattern.permute.xlu1 %v6798_v7 }
 0x757   : > { %v2727_v32 = vpop.permute.xlu1 %2726 }
 0x758   : > { %v2737_v55 = vmul.f32 %v5479_v29, %v2727_v32  ;;  %v2725_v21 = vpop.permute.xlu0 %2724 }
 0x759   : > { %v2736_v2 = vmul.f32 %v5488_v28, %v2725_v21 }
 0x75a   : > { %v2741_v20 = vadd.f32 %v2737_v55, %v5433_v9 }
 0x75b   : > { %v2740_v13 = vadd.f32 %v2736_v2, %v5441_v45  ;;  %v2751_v61 = vpop.permute.xlu1 %2750 }
 0x75c   : > { %v2761_v17 = vmul.f32 %v5507_v4, %v2751_v61  ;;  %2878 = vrot.lane.b32.xlu1 %v2741_v20, %s4622_s29  ;;  %v2749_v10 = vpop.permute.xlu0 %2748  ;;  %v2817_v55 = vmul.f32 %v5438_v51, %v2741_v20 }
 0x75d   : > { %v2816_v27 = vmul.f32 %v2740_v13, %v5445_v58  ;;  %v2760_v12 = vmul.f32 %v5499_v40, %v2749_v10  ;;  %2876 = vrot.lane.b32.xlu0 %v2740_v13, %s4622_s29 }
 0x75e   : > { %v2765_v30 = vadd.f32 %v2761_v17, %v5453_v35 }
 0x75f   : > { %v2764_v32 = vadd.f32 %v2760_v12, %v5456_v14  ;;  %v2775_v21 = vpop.permute.xlu1 %2774 }
 0x760   : > { %v2821_v2 = vmul.f32 %v5497_v46, %v2765_v30  ;;  %v2785_v61 = vmul.f32 %v5545_v52, %v2775_v21  ;;  %2902 = vrot.lane.b32.xlu1 %v2765_v30, %s4622_s29  ;;  %v2773_v45 = vpop.permute.xlu0 %2772 }
 0x761   : > { %v2820_v58 = vmul.f32 %v2764_v32, %v5505_v57  ;;  %v2784_v10 = vmul.f32 %v5514_v11, %v2773_v45  ;;  %2900 = vrot.lane.b32.xlu0 %v2764_v32, %s4622_s29 }
 0x762   : > { %v2825_v13 = vadd.f32 %v2821_v2, %v2817_v55  ;;  %v2789_v17 = vadd.f32 %v2785_v61, %v5471_v42 }
 0x763   : > { %v2824_v12 = vadd.f32 %v2820_v58, %v2816_v27  ;;  %v2788_v14 = vadd.f32 %v2784_v10, %v5476_v26  ;;  %v2799_v20 = vpop.permute.xlu1 %2798 }
 0x764   : > { %v2829_v46 = vmul.f32 %v5547_v53, %v2789_v17  ;;  %v2809_v21 = vmul.f32 %v5576_v1, %v2799_v20  ;;  %2926 = vrot.lane.b32.xlu1 %v2789_v17, %s4622_s29  ;;  %v2797_v30 = vpop.permute.xlu0 %2796 }
 0x765   : > { %v2828_v57 = vmul.f32 %v2788_v14, %v5554_v6  ;;  %v2808_v45 = vmul.f32 %v5538_v63, %v2797_v30  ;;  %2924 = vrot.lane.b32.xlu0 %v2788_v14, %s4622_s29 }
 0x766   : > { %v2833_v32 = vadd.f32 %v2829_v46, %v2825_v13  ;;  %v2813_v55 = vadd.f32 %v2809_v21, %v5492_v39 }
 0x767   : > { %v2832_v58 = vadd.f32 %v2828_v57, %v2824_v12  ;;  %v2812_v27 = vadd.f32 %v2808_v45, %v5495_v24  ;;  %v2731_v2 = vpop.permute.xlu1 %2730 }
 0x768   : > { %v2837_v61 = vmul.f32 %v5594_v56, %v2813_v55  ;;  %v2739_v10 = vmul.f32 %v5525_v23, %v2731_v2  ;;  %2950 = vrot.lane.b32.xlu1 %v2813_v55, %s4622_s29  ;;  %v2729_v17 = vpop.permute.xlu0 %2728 }
 0x769   : > { %v2836_v20 = vmul.f32 %v2812_v27, %v5599_v54  ;;  %v2738_v30 = vmul.f32 %v5517_v37, %v2729_v17  ;;  %2948 = vrot.lane.b32.xlu0 %v2812_v27, %s4622_s29 }
 0x76a   : > { %v2743_v14 = vadd.f32 %v2739_v10, %v5448_v43  ;;  %v6044_v46 = vadd.f32 %v2837_v61, %v2833_v32 }
 0x76b   : > { %v6046_v57 = vadd.f32 %v2836_v20, %v2832_v58  ;;  %v2742_v13 = vadd.f32 %v2738_v30, %v5459_v36  ;;  %v2755_v12 = vpop.permute.xlu1 %2754  ;;  %v6799_v30 = vld [vmem:[#allocation31_spill] sm:$0xff] }
 0x76c   : > { %v2819_v21 = vmul.f32 %v5464_v44, %v2743_v14  ;;  %v2763_v45 = vmul.f32 %v5531_v5, %v2755_v12  ;;  %2882 = vrot.lane.b32.xlu1 %v2743_v14, %s4622_s29  ;;  %v2753_v55 = vpop.permute.xlu0 %2752 }
 0x76d   : > { %v2818_v2 = vmul.f32 %v2742_v13, %v5473_v31  ;;  %v2762_v27 = vmul.f32 %v5560_v49, %v2753_v55  ;;  %2880 = vrot.lane.b32.xlu0 %v2742_v13, %s4622_s29 }
 0x76e   : > { %v2767_v32 = vadd.f32 %v2763_v45, %v5462_v0 }
 0x76f   : > { %v2766_v58 = vadd.f32 %v2762_v27, %v5467_v22  ;;  %v2779_v61 = vpop.permute.xlu1 %2778 }
 0x770   : > { %v2823_v10 = vmul.f32 %v6762_v62, %v2767_v32  ;;  %v2787_v17 = vmul.f32 %v6763_v41, %v2779_v61  ;;  %2906 = vrot.lane.b32.xlu1 %v2767_v32, %s4622_s29  ;;  %v2777_v20 = vpop.permute.xlu0 %2776 }
 0x771   : > { %v2822_v14 = vmul.f32 %v2766_v58, %v6799_v30  ;;  %v2786_v12 = vmul.f32 %v6764_v59, %v2777_v20  ;;  %2904 = vrot.lane.b32.xlu0 %v2766_v58, %s4622_s29 }
 0x772   : > { %v2827_v55 = vadd.f32 %v2823_v10, %v2819_v21  ;;  %v2791_v13 = vadd.f32 %v2787_v17, %v5482_v47 }
 0x773   : > { %v2826_v45 = vadd.f32 %v2822_v14, %v2818_v2  ;;  %v2790_v27 = vadd.f32 %v2786_v12, %v6765_v18  ;;  %v2803_v31 = vpop.permute.xlu1 %2802 }
 0x774   : > { %v2831_v62 = vmul.f32 %v6766_v33, %v2791_v13  ;;  %v2811_v61 = vmul.f32 %v6768_v38, %v2803_v31  ;;  %2930 = vrot.lane.b32.xlu1 %v2791_v13, %s4622_s29  ;;  %v2801_v32 = vpop.permute.xlu0 %2800  ;;  %v6800_v13 = vld [vmem:[#allocation34_spill] sm:$0xff] }
 0x775   : > { %v2830_v30 = vmul.f32 %v2790_v27, %v6767_v19  ;;  %v2810_v20 = vmul.f32 %v6769_v16, %v2801_v32  ;;  %2928 = vrot.lane.b32.xlu0 %v2790_v27, %s4622_s29  ;;  %v6801_v27 = vld [vmem:[#allocation40_spill] sm:$0xff] }
 0x776   : > { %v2835_v21 = vadd.f32 %v2831_v62, %v2827_v55  ;;  %v2815_v58 = vadd.f32 %v2811_v61, %v5503_v60  ;;  %v6802_v62 = vld [vmem:[#allocation27_spill] sm:$0xff]  ;;  %v6804_v55 = vld [vmem:[#allocation32_spill] sm:$0xff]  ;;  %v6806_v61 = vld [vmem:[#allocation37_spill] sm:$0xff] }
 0x777   : > { %v2834_v2 = vadd.f32 %v2830_v30, %v2826_v45  ;;  %v2814_v10 = vadd.f32 %v2810_v20, %v5510_v15  ;;  %v6803_v30 = vld [vmem:[#allocation33_spill] sm:$0xff]  ;;  %v6805_v45 = vmov 3   ;;  %v6807_v32 = vld [vmem:[#allocation44_spill] sm:$0xff] }
 0x778   : > { %v2839_v17 = vmul.f32 %v5608_v48, %v2815_v58  ;;  %2954 = vrot.lane.b32.xlu1 %v2815_v58, %s4622_s29  ;;  %v6808_v20 = vld [vmem:[#allocation45_spill] sm:$0xff]  ;;  %v6810_v58 = vld [vmem:[#allocation35_spill] sm:$0xff] }
 0x779   : > { %v2838_v31 = vmul.f32 %v2814_v10, %v5615_v50  ;;  %2952 = vrot.lane.b32.xlu0 %v2814_v10, %s4622_s29  ;;  %v6811_v10 = vld [vmem:[#allocation47_spill] sm:$0xff]  ;;  %s4555_s29 = sshll.u32 %s4627_s28, 4  ;;  %s4556_s29 = int_to_ptr.vmem [resolvable:$false] %s4555_s29 }
 0x77a   : > { %v6077_v14 = vadd.f32 %v2839_v17, %v2835_v21  ;;  %v6809_v21 = vld [vmem:[#allocation36_spill] sm:$0xff]  ;;  %v6813_v17 = vld [vmem:[#allocation50_spill] sm:$0xff]  ;;  %s4557_s8 = scalar_lea.vmem %s4556_s29, 1024  ;;  %p4558_p0 = scmp.lt.s32.totalorder %s6587_s17, %s4556_s29 }
 0x77b   : > { %v2842_v12 = vadd.f32 %v2838_v31, %v2834_v2  ;;  %v4548_v2 = vld [vmem:[%s6641_s4 + $0x10] sm:$0xff]  ;;  %v6814_v31 = vld [vmem:[#allocation46_spill] sm:$0xff] }
 0x77c   : > { %2238 = vperm.xlu1 %4435, %v6800_v13   ;;  %v6716_v13 = vmov 6  }
 0x77d   : > { %1949 = vperm.xlu0 %4431, %v6801_v27   ;;  %v6815_v27 = vmov 5  }
 0x780   : > { %2243 = vperm.xlu1 %4435, %v6802_v62   ;;  %v6816_v62 = vld [vmem:[#allocation52_spill] sm:$0xff] }
 0x781   : > { %4436 = vset.pattern.permute.xlu0 %v6793_v34 }
 0x782   : > { %2096 = vperm.xlu0 %4436, %v6803_v30   ;;  %v6715_v30 = vmov 7  }
 0x784   : > { %4437 = vset.pattern.permute.xlu1 %v6793_v34  ;;  %v4547_v34 = vld [vmem:[%s6641_s4] sm:$0xff] }
 0x785   : > { %2101 = vperm.xlu1 %4437, %v6804_v55   ;;  %v6817_v55 = vld [vmem:[#allocation51_spill] sm:$0xff] }
 0x786   : > { %4439 = vset.pattern.permute.xlu0 %v6805_v45 }
 0x787   : > { %2395 = vperm.xlu0 %4439, %v6806_v61   ;;  %v6115_v61 = vpop.permute.xlu1 %1857 }
 0x789   : > { %4438 = vset.pattern.permute.xlu1 %v6805_v45 }
 0x78a   : > { %2390 = vperm.xlu1 %4438, %v6807_v32  }
 0x78b   : > { %2405 = vperm.xlu0 %4439, %v6808_v20   ;;  %v6119_v32 = vpop.permute.xlu1 %1934 }
 0x78e   : > { %4440 = vset.pattern.permute.xlu1 %v6798_v7  ;;  %v6812_v7 = vld [vmem:[#allocation48_spill] sm:$0xff] }
 0x78f   : > { %2248 = vperm.xlu1 %4440, %v6809_v21   ;;  %4443 = vset.pattern.permute.xlu0 %v6796_v25 }
 0x790   : > { %1853 = vperm.xlu0 %4443, %v4547_v34  }
 0x793   : > { %2253 = vperm.xlu1 %4440, %v6810_v58  }
 0x794   : > { %1861 = vperm.xlu0 %4443, %v4548_v2  }
 0x797   : > { %4441 = vset.pattern.permute.xlu1 %v6796_v25 }
 0x798   : > { %2547 = vperm.xlu1 %4441, %v6811_v10   ;;  %2542 = vperm.xlu0 %4443, %v6812_v7  }
 0x79c   : > { %4442 = vset.pattern.permute.xlu1 %v6805_v45  ;;  %2552 = vperm.xlu0 %4443, %v6813_v17   ;;  %v6818_v45 = vld [vmem:[#allocation49_spill] sm:$0xff]  ;;  %v6819_v17 = vld [vmem:[#allocation23_spill] sm:$0xff] }
 0x79d   : > { %2400 = vperm.xlu1 %4442, %v6814_v31  }
 0x7a0   : > { %4447 = vset.pattern.permute.xlu0 %v6716_v13 }
 0x7a1   : > { %4444 = vset.pattern.permute.xlu1 %v6815_v27  ;;  %2851 = vperm.xlu0 %4447, %v6044_v46   ;;  %v6122_v46 = vpop.permute.xlu1 %2086 }
 0x7a2   : > { %2694 = vperm.xlu1 %4444, %v6816_v62  }
 0x7a5   : > { %4450 = vset.pattern.permute.xlu0 %v6715_v30 }
 0x7a6   : > { %2699 = vperm.xlu1 %4444, %v6817_v55   ;;  %v6820_v55 = vld [vmem:[#allocation25_spill] sm:$0xff] }
 0x7aa   : > { %4445 = vset.pattern.permute.xlu1 %v6796_v25  ;;  %v6126_v25 = vpop.permute.xlu1 %2091 }
 0x7ab   : > { %2557 = vperm.xlu1 %4445, %v6818_v45  }
 0x7ae   : > { %v6129_v20 = vpop.permute.xlu1 %1865 }
 0x7af   : > { %4446 = vset.pattern.permute.xlu1 %v6815_v27 }
 0x7b0   : > { %2704 = vperm.xlu1 %4446, %v5991_v3   ;;  %v6133_v3 = vpop.permute.xlu0 %1939 }
 0x7b2   : > { %v6131_v21 = vpop.permute.xlu1 %1944 }
 0x7b4   : > { %2709 = vperm.xlu1 %4446, %v5989_v8  }
 0x7b8   : > { %4448 = vset.pattern.permute.xlu1 %v6716_v13 }
 0x7b9   : > { %2846 = vperm.xlu1 %4448, %v6046_v57  }
 0x7bd   : > { %2856 = vperm.xlu1 %4448, %v2842_v12  }
 0x7c1   : > { %4449 = vset.pattern.permute.xlu1 %v6715_v30 }
 0x7ce   : > { %v2879_v34 = vpop.permute.xlu1 %2878 }
 0x7cf   : > { %v2889_v8 = vmul.f32 %v5479_v29, %v2879_v34  ;;  %v2877_v58 = vpop.permute.xlu0 %2876  ;;  %v6821_v34 = vld [vmem:[#allocation28_spill] sm:$0xff] }
 0x7d0   : > { %v2888_v2 = vmul.f32 %v5488_v28, %v2877_v58 }
 0x7d1   : > { %v2893_v57 = vadd.f32 %v2889_v8, %v5433_v9  ;;  %v6822_v9 = vld [vmem:[#allocation24_spill] sm:$0xff] }
 0x7d2   : > { %v2903_v10 = vpop.permute.xlu1 %2902  ;;  %v2892_v31 = vadd.f32 %v2888_v2, %v6819_v17 }
 0x7d3   : > { %v2913_v12 = vmul.f32 %v5507_v4, %v2903_v10  ;;  %v2901_v7 = vpop.permute.xlu0 %2900  ;;  %v2969_v29 = vmul.f32 %v5438_v51, %v2893_v57  ;;  %v6823_v4 = vld [vmem:[#allocation29_spill] sm:$0xff] }
 0x7d4   : > { %v2912_v27 = vmul.f32 %v5499_v40, %v2901_v7  ;;  %v2968_v8 = vmul.f32 %v2892_v31, %v6822_v9  ;;  %v6824_v9 = vld [vmem:[#allocation30_spill] sm:$0xff] }
 0x7d5   : > { %v2917_v62 = vadd.f32 %v2913_v12, %v5453_v35 }
 0x7d6   : > { %v2916_v45 = vadd.f32 %v2912_v27, %v6820_v55  ;;  %v2927_v30 = vpop.permute.xlu1 %2926 }
 0x7d7   : > { %v2973_v13 = vmul.f32 %v6821_v34, %v2917_v62  ;;  %v2937_v28 = vmul.f32 %v5545_v52, %v2927_v30  ;;  %v2925_v58 = vpop.permute.xlu0 %2924 }
 0x7d8   : > { %v2972_v10 = vmul.f32 %v2916_v45, %v6823_v4  ;;  %v2936_v2 = vmul.f32 %v5514_v11, %v2925_v58 }
 0x7d9   : > { %v2977_v17 = vadd.f32 %v2973_v13, %v2969_v29  ;;  %v2941_v40 = vadd.f32 %v2937_v28, %v5471_v42 }
 0x7da   : > { %v2976_v35 = vadd.f32 %v2972_v10, %v2968_v8  ;;  %v2940_v12 = vadd.f32 %v2936_v2, %v5476_v26  ;;  %v2951_v7 = vpop.permute.xlu1 %2950  ;;  %v6826_v2 = vld [vmem:[#allocation31_spill] sm:$0xff] }
 0x7db   : > { %v2981_v51 = vmul.f32 %v5547_v53, %v2941_v40  ;;  %v2961_v57 = vmul.f32 %v5576_v1, %v2951_v7  ;;  %v2949_v27 = vpop.permute.xlu0 %2948 }
 0x7dc   : > { %v2980_v52 = vmul.f32 %v2940_v12, %v5554_v6  ;;  %v2960_v30 = vmul.f32 %v5538_v63, %v2949_v27 }
 0x7dd   : > { %v2985_v31 = vadd.f32 %v2981_v51, %v2977_v17  ;;  %v2965_v62 = vadd.f32 %v2961_v57, %v5492_v39 }
 0x7de   : > { %v2984_v11 = vadd.f32 %v2980_v52, %v2976_v35  ;;  %v2964_v13 = vadd.f32 %v2960_v30, %v5495_v24  ;;  %v2883_v42 = vpop.permute.xlu1 %2882  ;;  %v6828_v52 = vmov 7  }
 0x7df   : > { %v2989_v55 = vmul.f32 %v5594_v56, %v2965_v62  ;;  %v2891_v26 = vmul.f32 %v5525_v23, %v2883_v42  ;;  %v2881_v45 = vpop.permute.xlu0 %2880 }
 0x7e0   : > { %v2988_v53 = vmul.f32 %v2964_v13, %v5599_v54  ;;  %v2890_v1 = vmul.f32 %v5517_v37, %v2881_v45 }
 0x7e1   : > { %v2993_v29 = vadd.f32 %v2989_v55, %v2985_v31  ;;  %v2895_v63 = vadd.f32 %v2891_v26, %v5448_v43 }
 0x7e2   : > { %v2992_v6 = vadd.f32 %v2988_v53, %v2984_v11  ;;  %v2907_v34 = vpop.permute.xlu1 %2906  ;;  %v2894_v24 = vadd.f32 %v2890_v1, %v5459_v36 }
 0x7e3   : > { %v2915_v39 = vmul.f32 %v5531_v5, %v2907_v34  ;;  %3003 = vperm.xlu1 %4449, %v2993_v29   ;;  %v2905_v28 = vpop.permute.xlu0 %2904  ;;  %v2971_v37 = vmul.f32 %v5464_v44, %v2895_v63  ;;  %v6825_v5 = vld [vmem:[#allocation26_spill] sm:$0xff] }
 0x7e4   : > { %v2914_v56 = vmul.f32 %v5560_v49, %v2905_v28  ;;  %2998 = vperm.xlu0 %4450, %v2992_v6   ;;  %v2970_v10 = vmul.f32 %v2894_v24, %v6825_v5  ;;  %v6827_v49 = vmov 6   ;;  %v6829_v6 = vld [vmem:[#allocation20_spill] sm:$0xff] }
 0x7e5   : > { %v2919_v23 = vadd.f32 %v2915_v39, %v5462_v0  ;;  %v6830_v28 = vld [vmem:[#allocation16_spill] sm:$0xff] }
 0x7e6   : > { %v2918_v54 = vadd.f32 %v2914_v56, %v5467_v22  ;;  %v2931_v58 = vpop.permute.xlu1 %2930  ;;  %v1952_v24 = vmul.f32 %v6119_v32, %v6830_v28 }
 0x7e7   : > { %v2975_v8 = vmul.f32 %v6824_v9, %v2919_v23  ;;  %v2939_v43 = vmul.f32 %v6763_v41, %v2931_v58  ;;  %v2929_v4 = vpop.permute.xlu0 %2928  ;;  %v6831_v23 = vld [vmem:[#allocation19_spill] sm:$0xff]  ;;  %v1953_v58 = vmul.f32 %v6133_v3, %v6830_v28 }
 0x7e8   : > { %v2974_v17 = vmul.f32 %v2918_v54, %v6826_v2  ;;  %v2938_v36 = vmul.f32 %v6764_v59, %v2929_v4  ;;  %4451 = vset.pattern.permute.xlu0 %v6827_v49  ;;  %v1869_v54 = vmul.f32 %v6115_v61, %v6831_v23  ;;  %v6833_v2 = vld [vmem:[#allocation7_spill] sm:$0xff]  ;;  %v6834_v49 = vld [vmem:[#allocation8_spill] sm:$0xff] }
 0x7e9   : > { %v2979_v40 = vadd.f32 %v2975_v8, %v2971_v37  ;;  %v2943_v0 = vadd.f32 %v2939_v43, %v5482_v47  ;;  %2861 = vperm.xlu0 %4451, %v6077_v14   ;;  %v6832_v37 = vld [vmem:[#allocation6_spill] sm:$0xff] }
 0x7ea   : > { %v2978_v22 = vadd.f32 %v2974_v17, %v2970_v10  ;;  %v2942_v44 = vadd.f32 %v2938_v36, %v6765_v18  ;;  %v2955_v35 = vpop.permute.xlu1 %2954  ;;  %v2104_v9 = vmul.f32 %v6122_v46, %v6832_v37  ;;  %v2105_v4 = vmul.f32 %v6126_v25, %v6832_v37 }
 0x7eb   : > { %v2983_v41 = vmul.f32 %v6766_v33, %v2943_v0  ;;  %v2963_v12 = vmul.f32 %v6768_v38, %v2955_v35  ;;  %v2953_v7 = vpop.permute.xlu0 %2952  ;;  %v1957_v10 = vadd.f32 %v1953_v58, %v1869_v54  ;;  %v6840_v54 = vld [vmem:[#allocation21_spill] sm:$0xff] }
 0x7ec   : > { %v2982_v51 = vmul.f32 %v2942_v44, %v6767_v19  ;;  %v2962_v59 = vmul.f32 %v6769_v16, %v2953_v7  ;;  %v3024_v19 = vld [vmem:[%s6642_s5 + $0x100] sm:$0xff] }
 0x7ed   : > { %v2987_v57 = vadd.f32 %v2983_v41, %v2979_v40  ;;  %v2967_v27 = vadd.f32 %v2963_v12, %v5503_v60  ;;  %4452 = vset.pattern.permute.xlu0 %v6828_v52  ;;  %4279 = vmatprep.mubr.msk.f32.mxu0 %vm677_vm3, %v3024_v19  ;;  %v2109_v36 = vadd.f32 %v2105_v4, %v1957_v10  ;;  %v6835_v44 = vld [vmem:[#allocation9_spill] sm:$0xff]  ;;  %v6836_v12 = vld [vmem:[#allocation10_spill] sm:$0xff] }
 0x7ee   : > { %v2986_v47 = vadd.f32 %v2982_v51, %v2978_v22  ;;  %v2966_v14 = vadd.f32 %v2962_v59, %v5510_v15 }
 0x7ef   : > { %v2991_v18 = vmul.f32 %v5608_v48, %v2967_v27 }
 0x7f0   : > { %v2990_v30 = vmul.f32 %v2966_v14, %v5615_v50 }
 0x7f1   : > { %v2995_v33 = vadd.f32 %v2991_v18, %v2987_v57  ;;  %v6837_v18 = vld [vmem:[#allocation17_spill] sm:$0xff] }
 0x7f2   : > { %v2994_v31 = vadd.f32 %v2990_v30, %v2986_v47 }
 0x7f4   : > { %3008 = vperm.xlu1 %4449, %v2994_v31   ;;  %v6838_v31 = vld [vmem:[#allocation22_spill] sm:$0xff] }
 0x7f8   : > { %3013 = vperm.xlu1 %4449, %v2995_v33  }
 0x7fb   : > { %v2239_v60 = vpop.permute.xlu1 %2238 }
 0x7fc   : > { %v1950_v50 = vpop.permute.xlu0 %1949  ;;  %v2256_v32 = vmul.f32 %v2239_v60, %v6833_v2 }
 0x7ff   : > { %v2244_v38 = vpop.permute.xlu1 %2243 }
 0x800   : > { %v2257_v17 = vmul.f32 %v2244_v38, %v6833_v2 }
 0x801   : > { %v2097_v13 = vpop.permute.xlu0 %2096 }
 0x802   : > { %v2261_v22 = vadd.f32 %v2257_v17, %v2109_v36  ;;  %v2106_v58 = vmul.f32 %v2097_v13, %v6832_v37 }
 0x804   : > { %v6190_v16 = vpop.permute.xlu1 %2101 }
 0x806   : > { %v2396_v55 = vpop.permute.xlu0 %2395 }
 0x807   : > { %v2409_v61 = vmul.f32 %v2396_v55, %v6834_v49 }
 0x809   : > { %v2391_v62 = vpop.permute.xlu1 %2390  ;;  %v2413_v41 = vadd.f32 %v2409_v61, %v2261_v22 }
 0x80a   : > { %v6198_v45 = vpop.permute.xlu0 %2405  ;;  %v2408_v35 = vmul.f32 %v2391_v62, %v6834_v49 }
 0x80e   : > { %v6192_v15 = vpop.permute.xlu1 %2248 }
 0x80f   : > { %v1854_v1 = vpop.permute.xlu0 %1853 }
 0x810   : > { %v1868_v34 = vmul.f32 %v1854_v1, %v6829_v6  ;;  %v1954_v1 = vmul.f32 %v6131_v21, %v6830_v28 }
 0x812   : > { %v6194_v48 = vpop.permute.xlu1 %2253  ;;  %v1956_v56 = vadd.f32 %v1952_v24, %v1868_v34  ;;  %v1955_v24 = vmul.f32 %v1950_v50, %v6830_v28  ;;  %v2258_v50 = vmul.f32 %v6192_v15, %v6833_v2 }
 0x813   : > { %v1862_v63 = vpop.permute.xlu0 %1861  ;;  %v2259_v21 = vmul.f32 %v6194_v48, %v6833_v2 }
 0x814   : > { %v2108_v5 = vadd.f32 %v2104_v9, %v1956_v56  ;;  %v1870_v19 = vmul.f32 %v1862_v63, %v6838_v31  ;;  %v1871_v63 = vmul.f32 %v6129_v20, %v6840_v54  ;;  %v2107_v9 = vmul.f32 %v6190_v16, %v6832_v37  ;;  %v3031_v31 = vld [vmem:[%s6642_s5 + $0x138] sm:$0xff]  ;;  %v3045_v54 = vld [vmem:[%s6642_s5 + $0x1a8] sm:$0xff] }
 0x815   : > { %v2411_v16 = vmul.f32 %v6198_v45, %v6834_v49 }
 0x816   : > { %v2260_v40 = vadd.f32 %v2256_v32, %v2108_v5  ;;  %v1958_v56 = vadd.f32 %v1954_v1, %v1870_v19  ;;  %v1959_v4 = vadd.f32 %v1955_v24, %v1871_v63  ;;  %v3032_v19 = vld [vmem:[%s6642_s5 + $0x140] sm:$0xff]  ;;  %v3038_v1 = vld [vmem:[%s6642_s5 + $0x170] sm:$0xff] }
 0x817   : > { %v2548_v11 = vpop.permute.xlu1 %2547  ;;  %v2543_v8 = vpop.permute.xlu0 %2542  ;;  %v3042_v24 = vld [vmem:[%s6642_s5 + $0x190] sm:$0xff] }
 0x818   : > { %v2561_v46 = vmul.f32 %v2548_v11, %v6835_v44  ;;  %v2412_v7 = vadd.f32 %v2408_v35, %v2260_v40  ;;  %v2560_v51 = vmul.f32 %v2543_v8, %v6835_v44  ;;  %v6839_v11 = vld [vmem:[#allocation18_spill] sm:$0xff]  ;;  %v2110_v5 = vadd.f32 %v2106_v58, %v1958_v56  ;;  %v3043_v56 = vld [vmem:[%s6642_s5 + $0x198] sm:$0xff]  ;;  %v3046_v63 = vld [vmem:[%s6642_s5 + $0x1b0] sm:$0xff] }
 0x819   : > { %v2111_v10 = vadd.f32 %v2107_v9, %v1959_v4  ;;  %v3047_v58 = vld [vmem:[%s6642_s5 + $0x1b8] sm:$0xff]  ;;  %v3048_v9 = vld [vmem:[%s6642_s5 + $0x1c0] sm:$0xff]  ;;  %v3050_v4 = vld [vmem:[%s6642_s5 + $0x1d0] sm:$0xff] }
 0x81a   : > { %v2565_v59 = vadd.f32 %v2561_v46, %v2413_v41  ;;  %v2564_v14 = vadd.f32 %v2560_v51, %v2412_v7  ;;  %v2262_v13 = vadd.f32 %v2258_v50, %v2110_v5  ;;  %v3052_v5 = vld [vmem:[%s6642_s5 + $0x1e0] sm:$0xff]  ;;  %v3054_v50 = vld [vmem:[%s6642_s5 + $0x1f0] sm:$0xff] }
 0x81b   : > { %v2553_v0 = vpop.permute.xlu0 %2552  ;;  %v2263_v17 = vadd.f32 %v2259_v21, %v2111_v10  ;;  %v3051_v21 = vld [vmem:[%s6642_s5 + $0x1d8] sm:$0xff]  ;;  %v3053_v10 = vld [vmem:[%s6642_s5 + $0x1e8] sm:$0xff] }
 0x81c   : > { %v6196_v42 = vpop.permute.xlu1 %2400  ;;  %v2562_v61 = vmul.f32 %v2553_v0, %v6835_v44 }
 0x81d   : > { %v2410_v20 = vmul.f32 %v6196_v42, %v6834_v49  ;;  %v2415_v40 = vadd.f32 %v2411_v16, %v2263_v17  ;;  %v3378_v17 = vld [vmem:[%s6643_s6 + $0x108] sm:$0xff]  ;;  %v3377_v16 = vld [vmem:[%s6643_s6 + $0x100] sm:$0xff] }
 0x81f   : > { %v2414_v32 = vadd.f32 %v2410_v20, %v2262_v13  ;;  %v3055_v20 = vld [vmem:[%s6642_s5 + $0x1f8] sm:$0xff] }
 0x820   : > { %v2852_v57 = vpop.permute.xlu0 %2851 }
 0x821   : > { %v2695_v26 = vpop.permute.xlu1 %2694  ;;  %v2865_v33 = vmul.f32 %v2852_v57, %v6837_v18  ;;  %v2566_v46 = vadd.f32 %v2562_v61, %v2414_v32 }
 0x822   : > { %v2712_v27 = vmul.f32 %v2695_v26, %v6836_v12 }
 0x824   : > { %v2716_v60 = vadd.f32 %v2712_v27, %v2564_v14  ;;  %v3028_v14 = vld [vmem:[%s6642_s5 + $0x120] sm:$0xff] }
 0x825   : > { %v2700_v53 = vpop.permute.xlu1 %2699 }
 0x826   : > { %v2713_v25 = vmul.f32 %v2700_v53, %v6836_v12 }
 0x828   : > { %v2717_v47 = vadd.f32 %v2713_v25, %v2565_v59 }
 0x82a   : > { %v6200_v29 = vpop.permute.xlu1 %2557  ;;  %v2869_v62 = vadd.f32 %v2865_v33, %v2717_v47  ;;  %v3027_v47 = vld [vmem:[%s6642_s5 + $0x118] sm:$0xff]  ;;  %v3030_v33 = vld [vmem:[%s6642_s5 + $0x130] sm:$0xff] }
 0x82b   : > { %v2563_v36 = vmul.f32 %v6200_v29, %v6835_v44 }
 0x82d   : > { %v2567_v42 = vadd.f32 %v2563_v36, %v2415_v40  ;;  %v3379_v40 = vld [vmem:[%s6643_s6 + $0x110] sm:$0xff] }
 0x82f   : > { %v6203_v39 = vpop.permute.xlu1 %2704 }
 0x833   : > { %v2710_v43 = vpop.permute.xlu1 %2709 }
 0x834   : > { %v2715_v15 = vmul.f32 %v2710_v43, %v6836_v12  ;;  %v3025_v43 = vld [vmem:[%s6642_s5 + $0x108] sm:$0xff] }
 0x836   : > { %v2719_v25 = vadd.f32 %v2715_v15, %v2567_v42  ;;  %v3380_v15 = vld [vmem:[%s6643_s6 + $0x118] sm:$0xff] }
 0x838   : > { %v2847_v3 = vpop.permute.xlu1 %2846 }
 0x839   : > { %v2864_v30 = vmul.f32 %v2847_v3, %v6837_v18  ;;  %v2714_v3 = vmul.f32 %v6203_v39, %v6836_v12 }
 0x83b   : > { %v2868_v6 = vadd.f32 %v2864_v30, %v2716_v60  ;;  %v2718_v41 = vadd.f32 %v2714_v3, %v2566_v46  ;;  %v3029_v30 = vld [vmem:[%s6642_s5 + $0x128] sm:$0xff] }
 0x83c   : > { %v2857_v52 = vpop.permute.xlu1 %2856  ;;  %v3033_v60 = vld [vmem:[%s6642_s5 + $0x148] sm:$0xff] }
 0x83d   : > { %v2866_v35 = vmul.f32 %v2857_v52, %v6837_v18  ;;  %v3026_v52 = vld [vmem:[%s6642_s5 + $0x110] sm:$0xff] }
 0x83f   : > { %v2870_v51 = vadd.f32 %v2866_v35, %v2718_v41 }
 0x862   : > { %v3004_v38 = vpop.permute.xlu1 %3003 }
 0x863   : > { %v3017_v55 = vmul.f32 %v3004_v38, %v6839_v11  ;;  %v2999_v53 = vpop.permute.xlu0 %2998  ;;  %v3034_v38 = vld [vmem:[%s6642_s5 + $0x150] sm:$0xff] }
 0x864   : > { %v3016_v26 = vmul.f32 %v2999_v53, %v6839_v11  ;;  %v3037_v53 = vld [vmem:[%s6642_s5 + $0x168] sm:$0xff] }
 0x865   : > { %v3021_v34 = vadd.f32 %v3017_v55, %v2869_v62  ;;  %v3035_v62 = vld [vmem:[%s6642_s5 + $0x158] sm:$0xff]  ;;  %v3036_v55 = vld [vmem:[%s6642_s5 + $0x160] sm:$0xff] }
 0x866   : > { %v3020_v23 = vadd.f32 %v3016_v26, %v2868_v6  ;;  %v3039_v6 = vld [vmem:[%s6642_s5 + $0x178] sm:$0xff]  ;;  %v3040_v26 = vld [vmem:[%s6642_s5 + $0x180] sm:$0xff] }
 0x868   : > { %v4351_v8 = vpack.c.bf16 %v3021_v34, %v3020_v23  ;;  %v2862_v48 = vpop.permute.xlu0 %2861  ;;  %v3041_v34 = vld [vmem:[%s6642_s5 + $0x188] sm:$0xff]  ;;  %v3044_v23 = vld [vmem:[%s6642_s5 + $0x1a0] sm:$0xff] }
 0x869   : > { %v2867_v45 = vmul.f32 %v2862_v48, %v6837_v18 }
 0x86a   : > { %4352 = vmatprep.subr.bf16.mxu0 %v4351_v8 }
 0x86b   : > { %4354 = vmatpush3.bf16.msra.mxu0 %v4351_v8  ;;  %v2871_v0 = vadd.f32 %v2867_v45, %v2719_v25  ;;  %v3049_v8 = vld [vmem:[%s6642_s5 + $0x1c8] sm:$0xff]  ;;  %v3381_v45 = vld [vmem:[%s6643_s6 + $0x120] sm:$0xff] }
 0x86c   : > { %v3382_v25 = vld [vmem:[%s6643_s6 + $0x128] sm:$0xff] }
 0x873   : > { %v3009_v22 = vpop.permute.xlu1 %3008 }
 0x874   : > { %v3018_v29 = vmul.f32 %v3009_v22, %v6839_v11 }
 0x876   : > { %v3022_v57 = vadd.f32 %v3018_v29, %v2870_v51 }
 0x877   : > { %v3014_v7 = vpop.permute.xlu1 %3013 }
 0x878   : > { %v3019_v59 = vmul.f32 %v3014_v7, %v6839_v11 }
 0x87a   : > { %v3023_v39 = vadd.f32 %v3019_v59, %v2871_v0  ;;  %v3384_v0 = vld [vmem:[%s6643_s6 + $0x138] sm:$0xff] }
 0x87c   : > { %v4355_v27 = vpack.c.bf16 %v3023_v39, %v3022_v57 }
 0x87e   : > { %4356 = vmatprep.subr.bf16.mxu0 %v4355_v27 }
 0x87f   : > { %4358 = vmatpush3.bf16.msra.mxu0 %v4355_v27 }
 0x882   : > { %4280 = vmatmul.mubr.msk.f32.vlgmr.msra.gmra.mrb[26].mxu0 %vm677_vm3, %v3025_v43  ;;  %v3383_v43 = vld [vmem:[%s6643_s6 + $0x130] sm:$0xff] }
 0x883   : > { %4282 = vmatprep.mubr.msk.f32.mxu0 %vm677_vm3, %v3026_v52 }
 0x886   : > { %4283 = vmatmul.mubr.msk.f32.gmra.mrb[28].mxu0 %vm677_vm3, %v3027_v47 }
 0x887   : > { %4285 = vmatprep.mubr.msk.f32.mxu0 %vm677_vm3, %v3028_v14 }
 0x88a   : > { %4286 = vmatmul.mubr.msk.f32.gmra.mrb[30].mxu0 %vm677_vm3, %v3029_v30 }
 0x88b   : > { %4288 = vmatprep.mubr.msk.f32.mxu0 %vm677_vm3, %v3030_v33 }
 0x88e   : > { %4289 = vmatmul.mubr.msk.f32.gmra.mrb[32].mxu0 %vm677_vm3, %v3031_v31  ;;  %v3385_v31 = vld [vmem:[%s6643_s6 + $0x140] sm:$0xff] }
 0x88f   : > { %4291 = vmatprep.mubr.msk.f32.mxu0 %vm677_vm3, %v3032_v19 }
 0x892   : > { %4292 = vmatmul.mubr.msk.f32.gmra.mrb[34].mxu0 %vm677_vm3, %v3033_v60  ;;  %v3386_v60 = vld [vmem:[%s6643_s6 + $0x148] sm:$0xff] }
 0x893   : > { %4294 = vmatprep.mubr.msk.f32.mxu0 %vm677_vm3, %v3034_v38 }
 0x896   : > { %4295 = vmatmul.mubr.msk.f32.gmra.mrb[36].mxu0 %vm677_vm3, %v3035_v62 }
 0x897   : > { %4297 = vmatprep.mubr.msk.f32.mxu0 %vm677_vm3, %v3036_v55  ;;  %v3388_v55 = vld [vmem:[%s6643_s6 + $0x158] sm:$0xff] }
 0x89a   : > { %4298 = vmatmul.mubr.msk.f32.gmra.mrb[38].mxu0 %vm677_vm3, %v3037_v53 }
 0x89b   : > { %4300 = vmatprep.mubr.msk.f32.mxu0 %vm677_vm3, %v3038_v1 }
 0x89e   : > { %4301 = vmatmul.mubr.msk.f32.gmra.mrb[40].mxu0 %vm677_vm3, %v3039_v6 }
 0x89f   : > { %4303 = vmatprep.mubr.msk.f32.mxu0 %vm677_vm3, %v3040_v26 }
 0x8a2   : > { %4304 = vmatmul.mubr.msk.f32.gmra.mrb[42].mxu0 %vm677_vm3, %v3041_v34 }
 0x8a3   : > { %4306 = vmatprep.mubr.msk.f32.mxu0 %vm677_vm3, %v3042_v24 }
 0x8a6   : > { %4307 = vmatmul.mubr.msk.f32.gmra.mrb[44].mxu0 %vm677_vm3, %v3043_v56  ;;  %v3387_v56 = vld [vmem:[%s6643_s6 + $0x150] sm:$0xff] }
 0x8a7   : > { %4309 = vmatprep.mubr.msk.f32.mxu0 %vm677_vm3, %v3044_v23  ;;  %v3390_v23 = vld [vmem:[%s6643_s6 + $0x168] sm:$0xff] }
 0x8aa   : > { %4310 = vmatmul.mubr.msk.f32.gmra.mrb[46].mxu0 %vm677_vm3, %v3045_v54 }
 0x8ab   : > { %4312 = vmatprep.mubr.msk.f32.mxu0 %vm677_vm3, %v3046_v63 }
 0x8ae   : > { %4313 = vmatmul.mubr.msk.f32.gmra.mrb[48].mxu0 %vm677_vm3, %v3047_v58 }
 0x8af   : > { %4315 = vmatprep.mubr.msk.f32.mxu0 %vm677_vm3, %v3048_v9 }
 0x8b2   : > { %4316 = vmatmul.mubr.msk.f32.gmra.mrb[50].mxu0 %vm677_vm3, %v3049_v8 }
 0x8b3   : > { %4318 = vmatprep.mubr.msk.f32.mxu0 %vm677_vm3, %v3050_v4 }
 0x8b6   : > { %4319 = vmatmul.mubr.msk.f32.gmra.mrb[52].mxu0 %vm677_vm3, %v3051_v21  ;;  %v3389_v21 = vld [vmem:[%s6643_s6 + $0x160] sm:$0xff] }
 0x8b7   : > { %4321 = vmatprep.mubr.msk.f32.mxu0 %vm677_vm3, %v3052_v5 }
 0x8ba   : > { %4322 = vmatmul.mubr.msk.f32.gmra.mrb[54].mxu0 %vm677_vm3, %v3053_v10 }
 0x8bb   : > { %4324 = vmatprep.mubr.msk.f32.mxu0 %vm677_vm3, %v3054_v50 }
 0x8be   : > { %4325 = vmatmul.mubr.msk.f32.gmra.mrb[56].mxu0 %vm677_vm3, %v3055_v20 }
 0x955   : > { %v4281_v13 = vpop.f32.mrb[26].mxu0 }
 0x956   : > { %v3410_v32 = vmul.f32 %v4281_v13, %v3378_v17  ;;  %v3218_v36 = vpop.f32.mrb[27].mxu0  ;;  %v3392_v17 = vld [vmem:[%s6643_s6 + $0x178] sm:$0xff] }
 0x957   : > { %v3409_v48 = vmul.f32 %v3377_v16, %v3218_v36  ;;  %v3394_v16 = vld [vmem:[%s6643_s6 + $0x188] sm:$0xff] }
 0x958   : > { %v3444_v61 = vsel %vm292_vm0, %v3410_v32, 0.0 }
 0x959   : > { %v4284_v3 = vpop.f32.mrb[28].mxu0  ;;  %3445 = vadd.xlane.f32.xlu0 %v3444_v61  ;;  %v3441_v35 = vsel %vm292_vm0, %v3409_v48, 0.0  ;;  %v3393_v61 = vld [vmem:[%s6643_s6 + $0x180] sm:$0xff] }
 0x95a   : > { %v3228_v22 = vpop.f32.mrb[29].mxu0  ;;  %v3412_v46 = vmul.f32 %v4284_v3, %v3380_v15 }
 0x95b   : > { %v3411_v42 = vmul.f32 %v3379_v40, %v3228_v22  ;;  %v3391_v40 = vld [vmem:[%s6643_s6 + $0x170] sm:$0xff] }
 0x95c   : > { %v3450_v57 = vsel %vm292_vm0, %v3412_v46, 0.0 }
 0x95d   : > { %v4287_v41 = vpop.f32.mrb[30].mxu0  ;;  %3442 = vadd.xlane.f32.xlu0 %v3441_v35  ;;  %v3447_v29 = vsel %vm292_vm0, %v3411_v42, 0.0 }
 0x95e   : > { %3448 = vadd.xlane.f32.xlu1 %v3447_v29  ;;  %v3238_v7 = vpop.f32.mrb[31].mxu0  ;;  %v3414_v59 = vmul.f32 %v4287_v41, %v3382_v25  ;;  %v3396_v41 = vld [vmem:[%s6643_s6 + $0x198] sm:$0xff]  ;;  %v3398_v29 = vld [vmem:[%s6643_s6 + $0x1a8] sm:$0xff] }
 0x95f   : > { %v3413_v51 = vmul.f32 %v3381_v45, %v3238_v7 }
 0x960   : > { %v3456_v30 = vsel %vm292_vm0, %v3414_v59, 0.0 }
 0x961   : > { %3451 = vadd.xlane.f32.xlu0 %v3450_v57  ;;  %v3453_v39 = vsel %vm292_vm0, %v3413_v51, 0.0  ;;  %v4290_v27 = vpop.f32.mrb[32].mxu0  ;;  %v3397_v57 = vld [vmem:[%s6643_s6 + $0x1a0] sm:$0xff] }
 0x962   : > { %3454 = vadd.xlane.f32.xlu1 %v3453_v39  ;;  %v3416_v52 = vmul.f32 %v4290_v27, %v3384_v0  ;;  %v3248_v47 = vpop.f32.mrb[33].mxu0  ;;  %v3395_v39 = vld [vmem:[%s6643_s6 + $0x190] sm:$0xff] }
 0x963   : > { %v3415_v14 = vmul.f32 %v3383_v43, %v3248_v47 }
 0x964   : > { %v3462_v33 = vsel %vm292_vm0, %v3416_v52, 0.0 }
 0x965   : > { %v4293_v19 = vpop.f32.mrb[34].mxu0  ;;  %3457 = vadd.xlane.f32.xlu0 %v3456_v30  ;;  %v3459_v1 = vsel %vm292_vm0, %v3415_v14, 0.0 }
 0x966   : > { %3463 = vadd.xlane.f32.xlu1 %v3462_v33  ;;  %v3258_v38 = vpop.f32.mrb[35].mxu0  ;;  %v3418_v53 = vmul.f32 %v4293_v19, %v3386_v60  ;;  %v3402_v60 = vld [vmem:[%s6643_s6 + $0x1c8] sm:$0xff] }
 0x967   : > { %v3417_v62 = vmul.f32 %v3385_v31, %v3258_v38  ;;  %v3400_v31 = vld [vmem:[%s6643_s6 + $0x1b8] sm:$0xff] }
 0x968   : > { %v3468_v54 = vsel %vm292_vm0, %v3418_v53, 0.0 }
 0x969   : > { %3460 = vadd.xlane.f32.xlu0 %v3459_v1  ;;  %v3465_v6 = vsel %vm292_vm0, %v3417_v62, 0.0  ;;  %v4296_v26 = vpop.f32.mrb[36].mxu0  ;;  %v3401_v1 = vld [vmem:[%s6643_s6 + $0x1c0] sm:$0xff] }
 0x96a   : > { %3466 = vadd.xlane.f32.xlu1 %v3465_v6  ;;  %v3420_v34 = vmul.f32 %v4296_v26, %v3388_v55  ;;  %v3268_v24 = vpop.f32.mrb[37].mxu0  ;;  %v3399_v6 = vld [vmem:[%s6643_s6 + $0x1b0] sm:$0xff] }
 0x96b   : > { %v3419_v58 = vmul.f32 %v3387_v56, %v3268_v24 }
 0x96c   : > { %v3474_v63 = vsel %vm292_vm0, %v3420_v34, 0.0 }
 0x96d   : > { %3469 = vadd.xlane.f32.xlu0 %v3468_v54  ;;  %v4299_v9 = vpop.f32.mrb[38].mxu0  ;;  %v3471_v10 = vsel %vm292_vm0, %v3419_v58, 0.0 }
 0x96e   : > { %3475 = vadd.xlane.f32.xlu1 %v3474_v63  ;;  %v3422_v8 = vmul.f32 %v4299_v9, %v3390_v23  ;;  %v3278_v4 = vpop.f32.mrb[39].mxu0  ;;  %v3403_v9 = vld [vmem:[%s6643_s6 + $0x1d0] sm:$0xff] }
 0x96f   : > { %v3421_v50 = vmul.f32 %v3389_v21, %v3278_v4 }
 0x970   : > { %v3480_v5 = vsel %vm292_vm0, %v3422_v8, 0.0  ;;  %v3406_v8 = vld [vmem:[%s6643_s6 + $0x1e8] sm:$0xff] }
 0x971   : > { %3481 = vadd.xlane.f32.xlu0 %v3480_v5  ;;  %v4302_v20 = vpop.f32.mrb[40].mxu0  ;;  %v3477_v48 = vsel %vm292_vm0, %v3421_v50, 0.0  ;;  %v3405_v50 = vld [vmem:[%s6643_s6 + $0x1e0] sm:$0xff] }
 0x972   : > { %3472 = vadd.xlane.f32.xlu1 %v3471_v10  ;;  %v3288_v13 = vpop.f32.mrb[41].mxu0  ;;  %v3424_v32 = vmul.f32 %v4302_v20, %v3392_v17 }
 0x973   : > { %v3423_v46 = vmul.f32 %v3391_v40, %v3288_v13 }
 0x974   : > { %v3486_v35 = vsel %vm292_vm0, %v3424_v32, 0.0  ;;  %v3407_v32 = vld [vmem:[%s6643_s6 + $0x1f0] sm:$0xff] }
 0x975   : > { %v4305_v36 = vpop.f32.mrb[42].mxu0  ;;  %v3483_v59 = vsel %vm292_vm0, %v3423_v46, 0.0 }
 0x976   : > { %v3426_v3 = vmul.f32 %v4305_v36, %v3394_v16  ;;  %3478 = vadd.xlane.f32.xlu1 %v3477_v48  ;;  %v3298_v15 = vpop.f32.mrb[43].mxu0  ;;  %v3404_v36 = vld [vmem:[%s6643_s6 + $0x1d8] sm:$0xff] }
 0x977   : > { %v3425_v42 = vmul.f32 %v3393_v61, %v3298_v15 }
 0x978   : > { %v3492_v22 = vsel %vm292_vm0, %v3426_v3, 0.0  ;;  %v3408_v3 = vld [vmem:[%s6643_s6 + $0x1f8] sm:$0xff] }
 0x979   : > { %3493 = vadd.xlane.f32.xlu0 %v3492_v22  ;;  %v4308_v45 = vpop.f32.mrb[44].mxu0  ;;  %v3489_v7 = vsel %vm292_vm0, %v3425_v42, 0.0 }
 0x97a   : > { %3487 = vadd.xlane.f32.xlu1 %v3486_v35  ;;  %v3308_v25 = vpop.f32.mrb[45].mxu0  ;;  %v3428_v51 = vmul.f32 %v4308_v45, %v3396_v41 }
 0x97b   : > { %v3427_v14 = vmul.f32 %v3395_v39, %v3308_v25 }
 0x97c   : > { %v3498_v30 = vsel %vm292_vm0, %v3428_v51, 0.0 }
 0x97d   : > { %3490 = vadd.xlane.f32.xlu0 %v3489_v7  ;;  %v4311_v0 = vpop.f32.mrb[46].mxu0  ;;  %v3495_v53 = vsel %vm292_vm0, %v3427_v14, 0.0 }
 0x97e   : > { %v3430_v27 = vmul.f32 %v4311_v0, %v3398_v29  ;;  %3484 = vadd.xlane.f32.xlu1 %v3483_v59  ;;  %v3318_v43 = vpop.f32.mrb[47].mxu0 }
 0x97f   : > { %v3429_v47 = vmul.f32 %v3397_v57, %v3318_v43  ;;  %v4549_v43 = vld [vmem:[%s6640_s3 + $0x10] sm:$0xff] }
 0x980   : > { %v3504_v52 = vsel %vm292_vm0, %v3430_v27, 0.0 }
 0x981   : > { %3505 = vadd.xlane.f32.xlu0 %v3504_v52  ;;  %v4314_v33 = vpop.f32.mrb[48].mxu0  ;;  %v3501_v38 = vsel %vm292_vm0, %v3429_v47, 0.0  ;;  %v6841_v52 = vld [vmem:[#allocation15_spill] sm:$0xff] }
 0x982   : > { %3499 = vadd.xlane.f32.xlu1 %v3498_v30  ;;  %v3328_v19 = vpop.f32.mrb[49].mxu0  ;;  %v3432_v62 = vmul.f32 %v4314_v33, %v3400_v31  ;;  %v629_v47 = vadd.f32 %v4549_v43, %v6841_v52 }
 0x983   : > { %v3431_v23 = vmul.f32 %v3399_v6, %v3328_v19 }
 0x984   : > { %v3510_v54 = vsel %vm292_vm0, %v3432_v62, 0.0  ;;  %v3897_v33 = vmul.f32 -1.442695, %v629_v47 }
 0x985   : > { %3502 = vadd.xlane.f32.xlu0 %v3501_v38  ;;  %v4317_v55 = vpop.f32.mrb[50].mxu0  ;;  %v3507_v10 = vsel %vm292_vm0, %v3431_v23, 0.0 }
 0x986   : > { %v3434_v26 = vmul.f32 %v4317_v55, %v3402_v60  ;;  %3496 = vadd.xlane.f32.xlu1 %v3495_v53  ;;  %v3338_v34 = vpop.f32.mrb[51].mxu0  ;;  %4517 = vpow2.f32 %v3897_v33 }
 0x987   : > { %v3433_v56 = vmul.f32 %v3401_v1, %v3338_v34 }
 0x988   : > { %v3516_v24 = vsel %vm292_vm0, %v3434_v26, 0.0 }
 0x989   : > { %3517 = vadd.xlane.f32.xlu0 %v3516_v24  ;;  %v4320_v63 = vpop.f32.mrb[52].mxu0  ;;  %v3513_v4 = vsel %vm292_vm0, %v3433_v56, 0.0 }
 0x98a   : > { %3511 = vadd.xlane.f32.xlu1 %v3510_v54  ;;  %v3348_v58 = vpop.f32.mrb[53].mxu0  ;;  %v3436_v22 = vmul.f32 %v4320_v63, %v3404_v36 }
 0x98b   : > { %v3435_v21 = vmul.f32 %v3403_v9, %v3348_v58 }
 0x98c   : > { %v3522_v45 = vsel %vm292_vm0, %v3436_v22, 0.0 }
 0x98d   : > { %3514 = vadd.xlane.f32.xlu0 %v3513_v4  ;;  %v4323_v5 = vpop.f32.mrb[54].mxu0  ;;  %v3519_v61 = vsel %vm292_vm0, %v3435_v21, 0.0 }
 0x98e   : > { %v3438_v20 = vmul.f32 %v4323_v5, %v3406_v8  ;;  %3508 = vadd.xlane.f32.xlu1 %v3507_v10  ;;  %v3358_v17 = vpop.f32.mrb[55].mxu0 }
 0x98f   : > { %v3437_v13 = vmul.f32 %v3405_v50, %v3358_v17 }
 0x990   : > { %v3528_v16 = vsel %vm292_vm0, %v3438_v20, 0.0  ;;  %v4518_v1 = vpop.eup %4517 }
 0x991   : > { %3529 = vadd.xlane.f32.xlu0 %v3528_v16  ;;  %v4326_v48 = vpop.f32.mrb[56].mxu0  ;;  %v3525_v42 = vsel %vm292_vm0, %v3437_v13, 0.0  ;;  %v635_v34 = vadd.f32 1.0, %v4518_v1  ;;  %v6842_v13 = vld [vmem:[#allocation12_spill] sm:$0xff] }
 0x992   : > { %3520 = vadd.xlane.f32.xlu1 %v3519_v61  ;;  %v3368_v40 = vpop.f32.mrb[57].mxu0  ;;  %v3440_v35 = vmul.f32 %v4326_v48, %v3408_v3  ;;  %v3886_v16 = vmul.f32 -1.442695, %v6842_v13 }
 0x993   : > { %v3439_v15 = vmul.f32 %v3407_v32, %v3368_v40  ;;  %4519 = vrcp.f32 %v635_v34 }
 0x994   : > { %v3534_v41 = vsel %vm292_vm0, %v3440_v35, 0.0  ;;  %4521 = vpow2.f32 %v3886_v16 }
 0x995   : > { %3526 = vadd.xlane.f32.xlu0 %v3525_v42  ;;  %v3531_v46 = vsel %vm292_vm0, %v3439_v15, 0.0 }
 0x996   : > { %3532 = vadd.xlane.f32.xlu1 %v3531_v46 }
 0x999   : > { %3523 = vadd.xlane.f32.xlu0 %v3522_v45 }
 0x99d   : > { %3535 = vadd.xlane.f32.xlu0 %v3534_v41  ;;  %v4520_v43 = vpop.eup %4519 }
 0x99e   : > { %v4522_v16 = vpop.eup %4521 }
 0x9e6   : > { %v3446_v25 = vpop.xlane.xlu0 %3445 }
 0x9e7   : > { %v3538_v23 = vmul.f32 %v3446_v25, %v6830_v28 }
 0x9ea   : > { %v3443_v29 = vpop.xlane.xlu0 %3442 }
 0x9eb   : > { %v3449_v7 = vpop.xlane.xlu1 %3448  ;;  %v3537_v5 = vmul.f32 %v3443_v29, %v6830_v28 }
 0x9ec   : > { %v3539_v32 = vmul.f32 %v3449_v7, %v6830_v28 }
 0x9ee   : > { %v3452_v51 = vpop.xlane.xlu0 %3451 }
 0x9ef   : > { %v3455_v0 = vpop.xlane.xlu1 %3454  ;;  %v3540_v52 = vmul.f32 %v3452_v51, %v6830_v28 }
 0x9f0   : > { %v3545_v58 = vmul.f32 %v3455_v0, %v6832_v37 }
 0x9f2   : > { %v3458_v59 = vpop.xlane.xlu0 %3457  ;;  %v3549_v48 = vadd.f32 %v3545_v58, %v3537_v5 }
 0x9f3   : > { %v3464_v57 = vpop.xlane.xlu1 %3463  ;;  %v3546_v24 = vmul.f32 %v3458_v59, %v6832_v37 }
 0x9f4   : > { %v3548_v29 = vmul.f32 %v3464_v57, %v6832_v37 }
 0x9f5   : > { %v3550_v9 = vadd.f32 %v3546_v24, %v3538_v23 }
 0x9f6   : > { %v3461_v39 = vpop.xlane.xlu0 %3460 }
 0x9f7   : > { %v3467_v27 = vpop.xlane.xlu1 %3466  ;;  %v3547_v4 = vmul.f32 %v3461_v39, %v6832_v37 }
 0x9f8   : > { %v3553_v10 = vmul.f32 %v3467_v27, %v6833_v2 }
 0x9f9   : > { %v3551_v15 = vadd.f32 %v3547_v4, %v3539_v32 }
 0x9fa   : > { %v3470_v30 = vpop.xlane.xlu0 %3469  ;;  %v3557_v46 = vadd.f32 %v3553_v10, %v3549_v48 }
 0x9fb   : > { %v3476_v14 = vpop.xlane.xlu1 %3475  ;;  %v3554_v54 = vmul.f32 %v3470_v30, %v6833_v2 }
 0x9fc   : > { %v3556_v47 = vmul.f32 %v3476_v14, %v6833_v2 }
 0x9fd   : > { %v3558_v50 = vadd.f32 %v3554_v54, %v3550_v9 }
 0x9fe   : > { %v3482_v19 = vpop.xlane.xlu0 %3481 }
 0x9ff   : > { %v3473_v31 = vpop.xlane.xlu1 %3472  ;;  %v3562_v8 = vmul.f32 %v3482_v19, %v6834_v49 }
 0xa00   : > { %v3555_v36 = vmul.f32 %v3473_v31, %v6833_v2  ;;  %v6843_v2 = vld [vmem:[#allocation5_spill] sm:$0xff] }
 0xa01   : > { %v3566_v61 = vadd.f32 %v3562_v8, %v3558_v50  ;;  %v6844_v14 = vsub.s32 0, %v6843_v2 }
 0xa02   : > { %v3559_v7 = vadd.f32 %v3555_v36, %v3551_v15 }
 0xa03   : > { %v3479_v60 = vpop.xlane.xlu1 %3478  ;;  %v3604_v34 = vrot.slane %v4520_v43, %v6844_v14  ;;  %v6847_v14 = vld [vmem:[#allocation13_spill] sm:$0xff] }
 0xa04   : > { %v3561_v40 = vmul.f32 %v3479_v60, %v6834_v49 }
 0xa06   : > { %v3494_v38 = vpop.xlane.xlu0 %3493  ;;  %v3565_v59 = vadd.f32 %v3561_v40, %v3557_v46 }
 0xa07   : > { %v3488_v62 = vpop.xlane.xlu1 %3487  ;;  %v3570_v20 = vmul.f32 %v3494_v38, %v6835_v44 }
 0xa09   : > { %v3574_v35 = vadd.f32 %v3570_v20, %v3566_v61 }
 0xa0a   : > { %v3491_v55 = vpop.xlane.xlu0 %3490 }
 0xa0b   : > { %v3485_v53 = vpop.xlane.xlu1 %3484  ;;  %v3569_v45 = vmul.f32 %v3491_v55, %v6835_v44  ;;  %v3552_v55 = vadd.f32 %v3548_v29, %v3540_v52 }
 0xa0c   : > { %v3563_v22 = vmul.f32 %v3485_v53, %v6834_v49 }
 0xa0d   : > { %v3573_v19 = vadd.f32 %v3569_v45, %v3565_v59  ;;  %v3560_v24 = vadd.f32 %v3556_v47, %v3552_v55  ;;  %v6845_v45 = vld [vmem:[#allocation14_spill] sm:$0xff] }
 0xa0e   : > { %v3506_v6 = vpop.xlane.xlu0 %3505  ;;  %v3567_v30 = vadd.f32 %v3563_v22, %v3559_v7 }
 0xa0f   : > { %v3500_v26 = vpop.xlane.xlu1 %3499  ;;  %v3578_v3 = vmul.f32 %v3506_v6, %v6836_v12  ;;  %v3564_v6 = vmul.f32 %v3488_v62, %v6834_v49 }
 0xa10   : > { %v3572_v54 = vmul.f32 %v3500_v26, %v6835_v44 }
 0xa11   : > { %v3582_v39 = vadd.f32 %v3578_v3, %v3574_v35  ;;  %v3568_v5 = vadd.f32 %v3564_v6, %v3560_v24 }
 0xa12   : > { %v3503_v56 = vpop.xlane.xlu0 %3502 }
 0xa13   : > { %v3497_v63 = vpop.xlane.xlu1 %3496  ;;  %v3577_v27 = vmul.f32 %v3503_v56, %v6836_v12  ;;  %v3576_v32 = vadd.f32 %v3572_v54, %v3568_v5 }
 0xa14   : > { %v3571_v0 = vmul.f32 %v3497_v63, %v6835_v44 }
 0xa15   : > { %v3581_v28 = vadd.f32 %v3577_v27, %v3573_v19 }
 0xa16   : > { %v3518_v21 = vpop.xlane.xlu0 %3517  ;;  %v3575_v53 = vadd.f32 %v3571_v0, %v3567_v30 }
 0xa17   : > { %v3512_v17 = vpop.xlane.xlu1 %3511  ;;  %v3586_v41 = vmul.f32 %v3518_v21, %v6837_v18 }
 0xa18   : > { %v3580_v49 = vmul.f32 %v3512_v17, %v6836_v12  ;;  %v402_v17 = vadd.f32 1.0, %v4522_v16 }
 0xa19   : > { %v3590_v60 = vadd.f32 %v3586_v41, %v3582_v39  ;;  %v3888_v41 = vmul.f32 -1.442695, %v6845_v45  ;;  %v6846_v39 = vld [vmem:[#allocation11_spill] sm:$0xff] }
 0xa1a   : > { %v3515_v42 = vpop.xlane.xlu0 %3514  ;;  %v3584_v36 = vadd.f32 %v3580_v49, %v3576_v32  ;;  %4523 = vrcp.f32 %v402_v17  ;;  %v3887_v27 = vmul.f32 -1.442695, %v6846_v39  ;;  %v4550_v32 = vld [vmem:[%s6640_s3 + $0x8] sm:$0xff] }
 0xa1b   : > { %v3509_v25 = vpop.xlane.xlu1 %3508  ;;  %v3585_v37 = vmul.f32 %v3515_v42, %v6837_v18  ;;  %4525 = vpow2.f32 %v3888_v41 }
 0xa1c   : > { %v3579_v33 = vmul.f32 %v3509_v25, %v6836_v12  ;;  %4527 = vpow2.f32 %v3887_v27 }
 0xa1d   : > { %v3589_v63 = vadd.f32 %v3585_v37, %v3581_v28 }
 0xa1e   : > { %v3530_v31 = vpop.xlane.xlu0 %3529  ;;  %v3583_v56 = vadd.f32 %v3579_v33, %v3575_v53 }
 0xa1f   : > { %v3594_v57 = vmul.f32 %v3530_v31, %v6839_v11  ;;  %v3521_v38 = vpop.xlane.xlu1 %3520 }
 0xa20   : > { %v3587_v1 = vmul.f32 %v3521_v38, %v6837_v18 }
 0xa21   : > { %v3598_v51 = vadd.f32 %v3594_v57, %v3590_v60 }
 0xa22   : > { %v3527_v23 = vpop.xlane.xlu0 %3526  ;;  %v3591_v4 = vadd.f32 %v3587_v1, %v3583_v56 }
 0xa23   : > { %v3593_v58 = vmul.f32 %v3527_v23, %v6839_v11  ;;  %v3533_v9 = vpop.xlane.xlu1 %3532  ;;  %v3606_v8 = vmul.f32 %v3604_v34, %v3598_v51  ;;  %v284_v51 = vld [vmem:[%s6640_s3] sm:$0xff] }
 0xa24   : > { %v3595_v21 = vmul.f32 %v3533_v9, %v6839_v11  ;;  %4327 = vmatprep.subr.mxu1 %v284_v51 }
 0xa25   : > { %v3597_v62 = vadd.f32 %v3593_v58, %v3589_v63  ;;  %v3612_v10 = vsel %vm292_vm0, %v3606_v8, 0.0  ;;  %4328 = vmatpush3.msra.mxu1 %v284_v51 }
 0xa26   : > { %v3599_v50 = vadd.f32 %v3595_v21, %v3591_v4  ;;  %v3524_v20 = vpop.xlane.xlu0 %3523  ;;  %3613 = vadd.xlane.f32.xlu0 %v3612_v10 }
 0xa27   : > { %v3588_v44 = vmul.f32 %v3524_v20, %v6837_v18  ;;  %v3605_v26 = vmul.f32 %v3604_v34, %v3597_v62  ;;  %v4524_v18 = vpop.eup %4523 }
 0xa28   : > { %v3607_v61 = vmul.f32 %v3604_v34, %v3599_v50  ;;  %v414_v35 = vmul.f32 %v4524_v18, %v6842_v13  ;;  %v4526_v43 = vpop.eup %4525 }
 0xa29   : > { %v3609_v48 = vsel %vm292_vm0, %v3605_v26, 0.0  ;;  %v3592_v3 = vadd.f32 %v3588_v44, %v3584_v36  ;;  %v404_v30 = vadd.f32 1.0, %v4526_v43  ;;  %v4528_v38 = vpop.eup %4527  ;;  %v6848_v44 = vsub.s32 6, %v6843_v2 }
 0xa2a   : > { %v3536_v40 = vpop.xlane.xlu0 %3535  ;;  %3610 = vadd.xlane.f32.xlu1 %v3609_v48  ;;  %v3615_v22 = vsel %vm292_vm0, %v3607_v61, 0.0  ;;  %v403_v55 = vadd.f32 1.0, %v4528_v38 }
 0xa2b   : > { %v3596_v12 = vmul.f32 %v3536_v40, %v6839_v11  ;;  %4529 = vrcp.f32 %v404_v30  ;;  %v6849_v40 = vsub.s32 7, %v6843_v2 }
 0xa2c   : > { %4531 = vrcp.f32 %v403_v55 }
 0xa2d   : > { %v3600_v15 = vadd.f32 %v3596_v12, %v3592_v3  ;;  %v3673_v3 = vrot.slane %v4550_v32, %v6849_v40 }
 0xa2e   : > { %3616 = vadd.xlane.f32.xlu1 %v3615_v22 }
 0xa2f   : > { %v3608_v42 = vmul.f32 %v3604_v34, %v3600_v15  ;;  %v3889_v34 = vmul.f32 -1.442695, %v6847_v14 }
 0xa31   : > { %v3618_v46 = vsel %vm292_vm0, %v3608_v42, 0.0  ;;  %4533 = vpow2.f32 %v3889_v34 }
 0xa32   : > { %3619 = vadd.xlane.f32.xlu0 %v3618_v46 }
 0xa35   : > { %v4530_v53 = vpop.eup %4529 }
 0xa36   : > { %v416_v1 = vmul.f32 %v4530_v53, %v6845_v45  ;;  %v4532_v6 = vpop.eup %4531 }
 0xa37   : > { %v415_v28 = vmul.f32 %v4532_v6, %v6846_v39 }
 0xa3b   : > { %v4534_v54 = vpop.eup %4533 }
 0xa3c   : > { %v405_v58 = vadd.f32 1.0, %v4534_v54 }
 0xa3e   : > { %4535 = vrcp.f32 %v405_v58 }
 0xa3f   : > { %3682 = vrot.lane.b32.xlu1 %v414_v35, %s4626_s23 }
 0xab3   : > { %v3614_v11 = vpop.xlane.xlu0 %3613 }
 0xab4   : > { %v3623_v25 = vmul.f32 0.125, %v3614_v11 }
 0xab6   : > { %v3627_v29 = vsub.f32 %v3606_v8, %v3623_v25  ;;  %v4536_v8 = vpop.eup %4535 }
 0xab7   : > { %v3611_v7 = vpop.xlane.xlu1 %3610  ;;  %v417_v4 = vmul.f32 %v4536_v8, %v6847_v14 }
 0xab8   : > { %v3622_v0 = vmul.f32 0.125, %v3611_v7  ;;  %v3631_v59 = vmul.f32 %v3627_v29, %v3627_v29 }
 0xaba   : > { %v3626_v52 = vsub.f32 %v3605_v26, %v3622_v0  ;;  %v3637_v47 = vsel %vm292_vm0, %v3631_v59, 0.0  ;;  %v3665_v26 = vrot.slane %v4550_v32, %v6848_v44 }
 0xabb   : > { %3638 = vadd.xlane.f32.xlu0 %v3637_v47  ;;  %v3617_v24 = vpop.xlane.xlu1 %3616 }
 0xabc   : > { %v3630_v13 = vmul.f32 %v3626_v52, %v3626_v52  ;;  %v3624_v56 = vmul.f32 0.125, %v3617_v24 }
 0xabe   : > { %v3634_v33 = vsel %vm292_vm0, %v3630_v13, 0.0  ;;  %v3628_v23 = vsub.f32 %v3607_v61, %v3624_v56 }
 0xabf   : > { %v3620_v31 = vpop.xlane.xlu0 %3619  ;;  %3635 = vadd.xlane.f32.xlu1 %v3634_v33  ;;  %v3683_v21 = vpop.permute.xlu1 %3682 }
 0xac0   : > { %v3625_v19 = vmul.f32 0.125, %v3620_v31  ;;  %v3632_v63 = vmul.f32 %v3628_v23, %v3628_v23 }
 0xac2   : > { %v6555_v60 = vsub.f32 %v3608_v42, %v3625_v19  ;;  %v3640_v9 = vsel %vm292_vm0, %v3632_v63, 0.0 }
 0xac4   : > { %v3633_v37 = vmul.f32 %v6555_v60, %v6555_v60 }
 0xac6   : > { %v3643_v57 = vsel %vm292_vm0, %v3633_v37, 0.0 }
 0xac7   : > { %3644 = vadd.xlane.f32.xlu0 %v3643_v57 }
 0xad0   : > { %3686 = vrot.lane.b32.xlu1 %v416_v1, %s4626_s23 }
 0xadd   : > { %3684 = vrot.lane.b32.xlu0 %v415_v28, %s4626_s23 }
 0xaf4   : > { %3641 = vadd.xlane.f32.xlu1 %v3640_v9 }
 0xb05   : > { %3688 = vrot.lane.b32.xlu1 %v417_v4, %s4626_s23  ;;  %s4551_s23 = scalar_lea.vmem %s6587_s17, 512 }
 0xb06   : > { %p4552_p11 = scmp.ne.s32.totalorder %s6587_s17, %s4551_s23  ;;  %p4559_p1 = scmp.lt.s32.totalorder %s4557_s8, %s4551_s23 }
 0xb08   : > { %p4553_p12 = pnand %p4552_p11, %p4708_p5  ;;  %p4560_p2 = por %p4559_p1, %p4558_p0 }
 0xb0a   : > { %p4554_p13 = pneg %p4553_p12 }
 0xb0c   : > { %p4561_p3 = pnand %p4560_p2, %p4554_p13 }
 0xb48   : > { %v3639_v5 = vpop.xlane.xlu0 %3638 }
 0xb49   : > { %v3647_v49 = vmul.f32 0.125, %v3639_v5 }
 0xb4b   : > { %v3651_v62 = vadd.f32 1e-05, %v3647_v49 }
 0xb4c   : > { %v3636_v10 = vpop.xlane.xlu1 %3635 }
 0xb4d   : > { %4537 = vrsqrt.f32 %v3651_v62  ;;  %v3646_v50 = vmul.f32 0.125, %v3636_v10 }
 0xb4f   : > { %v3650_v20 = vadd.f32 1e-05, %v3646_v50 }
 0xb50   : > { %v3687_v41 = vpop.permute.xlu1 %3686 }
 0xb51   : > { %4539 = vrsqrt.f32 %v3650_v20 }
 0xb54   : > { %v3645_v17 = vpop.xlane.xlu0 %3644 }
 0xb55   : > { %v3649_v45 = vmul.f32 0.125, %v3645_v17 }
 0xb57   : > { %v4538_v16 = vpop.eup %4537  ;;  %v3653_v11 = vadd.f32 1e-05, %v3649_v45 }
 0xb58   : > { %v3659_v36 = vmul.f32 %v4538_v16, %v3627_v29  ;;  %v3685_v46 = vpop.permute.xlu0 %3684 }
 0xb59   : > { %4541 = vrsqrt.f32 %v3653_v11 }
 0xb5a   : > { %v3667_v61 = vmul.f32 %v3665_v26, %v3659_v36 }
 0xb5b   : > { %v4540_v48 = vpop.eup %4539 }
 0xb5c   : > { %v3658_v12 = vmul.f32 %v4540_v48, %v3626_v52  ;;  %v3675_v22 = vadd.f32 %v3673_v3, %v3667_v61 }
 0xb5e   : > { %v3666_v15 = vmul.f32 %v3665_v26, %v3658_v12  ;;  %v3695_v35 = vmul.f32 %v3685_v46, %v3675_v22 }
 0xb60   : > { %v3674_v42 = vadd.f32 %v3673_v3, %v3666_v15 }
 0xb62   : > { %v3694_v18 = vmul.f32 %v3683_v21, %v3674_v42 }
 0xb63   : > { %v4542_v7 = vpop.eup %4541 }
 0xb64   : > { %4329 = vmatprep.mubr.msk.f32.mxu1 %vm292_vm0, %v3694_v18  ;;  %v3661_v0 = vmul.f32 %v4542_v7, %v6555_v60 }
 0xb65   : > { %4330 = vmatmul.mubr.msk.f32.vlgmr.msra.gmra.mrb[50].mxu1 %vm292_vm0, %v3695_v35 }
 0xb66   : > { %v3669_v27 = vmul.f32 %v3665_v26, %v3661_v0 }
 0xb68   : > { %v3677_v13 = vadd.f32 %v3673_v3, %v3669_v27 }
 0xb81   : > { %v3642_v25 = vpop.xlane.xlu1 %3641 }
 0xb82   : > { %v3648_v29 = vmul.f32 0.125, %v3642_v25 }
 0xb84   : > { %v3652_v2 = vadd.f32 1e-05, %v3648_v29 }
 0xb85   : > { %v3689_v52 = vpop.permute.xlu1 %3688 }
 0xb86   : > { %4543 = vrsqrt.f32 %v3652_v2  ;;  %v3697_v33 = vmul.f32 %v3689_v52, %v3677_v13 }
 0xb90   : > { %v4544_v59 = vpop.eup %4543 }
 0xb91   : > { %v3660_v39 = vmul.f32 %v4544_v59, %v3628_v23 }
 0xb93   : > { %v3668_v43 = vmul.f32 %v3665_v26, %v3660_v39 }
 0xb95   : > { %v3676_v47 = vadd.f32 %v3673_v3, %v3668_v43 }
 0xb97   : > { %v3696_v30 = vmul.f32 %v3687_v41, %v3676_v47 }
 0xb99   : > { %4332 = vmatprep.mubr.msk.f32.mxu1 %vm292_vm0, %v3696_v30 }
 0xb9a   : > { %4333 = vmatmul.mubr.msk.f32.gmra.mrb[52].mxu1 %vm292_vm0, %v3697_v33 }
 0xc38   : > { %v4331_v31 = vpop.f32.mrb[50].mxu1 }
 0xc39   : > { %3796 = vst.msk [vmem:[%s272_s16 + $0x8] sm:$0xff] %vm292_vm0, %v4331_v31  ;;  %v3776_v19 = vpop.f32.mrb[51].mxu1 }
 0xc3a   : > { %3795 = vst.msk [vmem:[%s272_s16] sm:$0xff] %vm292_vm0, %v3776_v19 }
 0xc6d   : > { %v4334_v60 = vpop.f32.mrb[52].mxu1 }
 0xc6e   : > { %3798 = vst.msk [vmem:[%s272_s16 + $0x18] sm:$0xff] %vm292_vm0, %v4334_v60  ;;  %v3786_v37 = vpop.f32.mrb[53].mxu1 }
 0xc6f   : > { %3797 = vst.msk [vmem:[%s272_s16 + $0x10] sm:$0xff] %vm292_vm0, %v3786_v37 }
 0xc70   : > { %4564 = shalt.err (!%p4561_p3)
}
 0xc71   : > { %s4565_s9 = scalar_lea.hbm %s6592_s21, 512  ;;  %s4569_s15 = scalar_lea.hbm %s6644_s7, 1024 }
 0xc72   : > { %p4566_p4 = scmp.ne.s32.totalorder %s6592_s21, %s4565_s9  ;;  %p4570_p9 = scmp.lt.u32.totalorder %s6592_s21, %s6644_s7 }
 0xc73   : > { %p4571_p10 = scmp.lt.u32.totalorder %s4569_s15, %s4565_s9  ;;  %p4573_p12 = scmp.lt.u32.totalorder %s4565_s9, %s6592_s21 }
 0xc74   : > { %p4567_p7 = pnand %p4566_p4, %p4708_p5 }
 0xc75   : > { %p4572_p11 = por %p4571_p10, %p4570_p9 }
 0xc76   : > { %p4568_p8 = pneg %p4567_p7 }
 0xc77   : > { %p4574_p13 = por %p4573_p12, %p4572_p11 }
 0xc79   : > { %p4575_p0 = pnand %p4574_p13, %p4568_p8 }
 0xc7b   : > { %4578 = shalt.err (!%p4575_p0)
}
 0xc7c   : > { %s4628_s19 = smov 128   ;;  %s4629_s20 = smov 8  }
 0xc7d   : > { %4363 = dma.vmem_to_hbm [thread:$0]  (%p4708_p5), %s6587_s17, 512, %s6592_s21, %s6596_s22, %s4628_s19, %s4628_s19, %s4629_s20  }
 0xc7e PF: > { %p4369_p1 = scmp.ge.s32.totalorder %s4613_s27, 2  ;;  %s3828_s23 = sand.u32 1, %s4601_s24  }
 0xc7f   : > { %s3829_s28 = scalar_lea.sflag [#allocation3], %s3828_s23 }
 0xc80   : > { %p4366_p2 = pnand %p4369_p1, %p4712_p6 }
 0xc82   : > { %4596 = dma.done.wait (!%p4366_p2), %s3829_s28, 512  }
 0xc83   : > { %4598 = vsyncadd (!%p4366_p2), %s3829_s28, 4294966784  ;;  %p17_p3 = scmp.ge.s32.totalorder %s4695_s30, 4   ;;  %s6850_s24 = smov %s4605_s25 }
 0xc84   : > { %s6851_s25 = smov %s4609_s26  ;;  %s6852_s26 = smov %s4706_s10 }
 0xc85   : > { %s6853_s27 = smov %s4695_s30  ;;  %19 = sbr.rel (!%p17_p3) target bundleno = 3 (0x3), region = 83 }
 0xc8c   :  { %3834 = vsyncpa [#allocation3], 1 }
 0xc8d   :  { %3836 = vsyncpa [#allocation3 + $0x1], 1 }

</bundles_post_ra>
